<compile_context>
chip_gen: v7x
topology: tpu7x:2x2x1
jax: 0.10.0
libtpu: 0.0.40
codegen_flags: <defaults>
</compile_context>

<pallas_src>
import functools

import numpy as np
import jax
import jax.numpy as jnp
from jax.experimental import pallas as pl
from jax.experimental.pallas import tpu as pltpu


# ---------------------------------------------------------------------------
# Kernel
# ---------------------------------------------------------------------------
def _window_attn_kernel(x_ref, wqkv_ref, bqkv_ref, rpb_ref, wp_ref, bp_ref,
                        *rest, num_heads, nW, mask_mode):
    """Fused window attention for a block of TB windows.

    x_ref:    (TB, N, C)       input tokens for TB windows (streamed)
    wqkv_ref: (C, 3C)          fused QKV weight (in x out), scale folded in Q
    bqkv_ref: (1, 3C)          fused QKV bias (scale folded in Q part)
    rpb_ref:  (H, N, N)        relative position bias, resident
    wp_ref:   (H, hd, C)       output projection weight grouped per head
    bp_ref:   (1, C)           output projection bias
    mask_ref: (nW, N, N)       (optional) additive shift mask, resident
    o_ref:    (TB, N, C)
    """
    if mask_mode is None:
        (o_ref,) = rest
        mask_ref = None
    else:
        mask_ref, o_ref = rest

    TB, N, C = x_ref.shape
    H = num_heads
    hd = C // H
    f32 = jnp.float32

    x = x_ref[...]
    mmdt = x.dtype                         # MXU operand dtype (bf16 model -> bf16)
    x2 = x.reshape(TB * N, C)

    # Fused QKV projection: one MXU stream, f32 accumulation.
    qkv = jnp.dot(x2, wqkv_ref[...], preferred_element_type=f32)
    qkv = qkv + bqkv_ref[...].astype(f32)                      # (TB*N, 3C)

    # Head-major batched views (H*TB, N, hd); batch index = h*TB + b.
    def heads(base):
        parts = [qkv[:, base + h * hd: base + (h + 1) * hd].reshape(TB, N, hd)
                 for h in range(H)]
        return jnp.concatenate(parts, axis=0).astype(mmdt)

    q = heads(0)
    k = heads(C)
    v = heads(2 * C)

    # Attention logits for all heads/windows in one batched matmul (f32 accum).
    a = jnp.einsum('bnd,bmd->bnm', q, k, preferred_element_type=f32)
    a = a.reshape(H, TB, N, N) + rpb_ref[...].astype(f32)[:, None, :, :]

    if mask_mode == "tiled":
        # TB % nW == 0 -> block start is a multiple of nW: static mapping.
        m = mask_ref[...].astype(f32)                          # (nW, N, N)
        reps = TB // nW
        if reps > 1:
            m = jnp.broadcast_to(m[None], (reps, nW, N, N)).reshape(TB, N, N)
        a = a + m[None, :, :, :]
    elif mask_mode == "sliced":
        # nW % TB == 0 -> contiguous slice of the resident mask.
        start = (pl.program_id(0) * TB) % nW
        m = mask_ref[pl.ds(start, TB)].astype(f32)             # (TB, N, N)
        a = a + m[None, :, :, :]

    # Numerically-stable softmax over the last dim (exp on EUP, approx recip).
    a = a - jnp.max(a, axis=-1, keepdims=True)
    p = jnp.exp(a)
    p = p * pl.reciprocal(jnp.sum(p, axis=-1, keepdims=True), approx=True)
    p = p.reshape(H * TB, N, N).astype(mmdt)

    # Context, still head-major: (H*TB, N, hd).
    ctx = jnp.einsum('bnm,bmd->bnd', p, v, preferred_element_type=f32)
    ctx = ctx.reshape(H, TB * N, hd).astype(mmdt)

    # Output projection as a head-batched matmul + reduction over heads; this
    # avoids re-interleaving heads back onto the lane axis.
    y = jnp.einsum('htd,hdc->htc', ctx, wp_ref[...], preferred_element_type=f32)
    y = jnp.sum(y, axis=0) + bp_ref[...].astype(f32)           # (TB*N, C)
    o_ref[...] = y.reshape(TB, N, C).astype(o_ref.dtype)


# ---------------------------------------------------------------------------
# VMEM planning / block-size selection
# ---------------------------------------------------------------------------
def _vmem_plan():
    """(vmem_limit_bytes, streamed-block budget) per TPU generation."""
    try:
        cap = int(pltpu.get_tpu_info().vmem_capacity_bytes)
    except Exception:
        cap = 64 * 1024 * 1024
    if cap >= 96 * 1024 * 1024:                 # v5e / v6e: 128 MiB per core
        return 100 * 1024 * 1024, 40 * 1024 * 1024
    return 30 * 1024 * 1024, 12 * 1024 * 1024   # v7x: 64 MiB per core


def _auto_block_windows(budget, B_, N, C, H, itemsize):
    """Pick TB from a per-block VMEM budget, keeping >=4 grid steps if possible."""
    f32b = (3 * N * C + 2 * H * N * N + H * N * C + 2 * N * C) * 4
    mdtb = (4 * N * C + 4 * N * C + H * N * N) * itemsize
    per_win = max(1, f32b + mdtb)
    tb = max(1, budget // per_win)
    tb = min(tb, max(1, -(-B_ // 4)), 256)      # keep >=4 steps (2-TC + pipelining)
    return int(tb)


def _legalize_tb(tb, nW):
    """Force TB % nW == 0 (tiled mask) or nW % TB == 0 (sliced mask)."""
    if tb >= nW:
        return max(nW, (tb // nW) * nW)
    while nW % tb != 0:
        tb -= 1
    return max(1, tb)


# ---------------------------------------------------------------------------
# Wrapper
# ---------------------------------------------------------------------------
def window_attention_forward(x, w_qkv, b_qkv, w_proj, b_proj,
                             rpb_table, rel_index, num_heads,
                             mask=None, qk_scale=None, block_windows=None):
    """JAX/Pallas equivalent of WindowAttention.forward.

    x:         (B_, N, C)             windows of tokens
    w_qkv:     (3C, C)  b_qkv: (3C,)  PyTorch nn.Linear layout (out x in)
    w_proj:    (C, C)   b_proj: (C,)
    rpb_table: ((2Wh-1)*(2Ww-1), num_heads)
    rel_index: (N, N) int             relative_position_index buffer
    mask:      (nW, N, N) or None
    returns:   (B_, N, C)
    """
    B_, N, C = x.shape
    assert C % num_heads == 0
    H = num_heads
    hd = C // H
    scale = float(qk_scale) if qk_scale is not None else float(hd) ** -0.5
    mdt = x.dtype

    # ---- parameter glue (host-side, one-time) ----
    w_all = jnp.transpose(w_qkv).astype(jnp.float32)                 # (C, 3C) in x out
    w_fused = jnp.concatenate([w_all[:, :C] * scale, w_all[:, C:]],
                              axis=1).astype(mdt)                     # scale folded
    b_all = b_qkv.astype(jnp.float32)
    b_fused = jnp.concatenate([b_all[:C] * scale, b_all[C:]]).reshape(1, 3 * C)
    wp = jnp.transpose(w_proj).astype(mdt).reshape(C, C).reshape(H, hd, C)
    bp = b_proj.reshape(1, C).astype(jnp.float32)

    # relative position bias -> (H, N, N)  (gather glue)
    rpb = rpb_table[rel_index.reshape(-1)].reshape(N, N, H)
    rpb = jnp.transpose(rpb, (2, 0, 1)).astype(mdt)

    has_mask = mask is not None
    nW = int(mask.shape[0]) if has_mask else 1
    if has_mask:
        assert B_ % nW == 0, "batch of windows must be a multiple of nW"
        mask = mask.astype(mdt)

    # ---- block size / VMEM plan ----
    vmem_limit, budget = _vmem_plan()
    if block_windows is not None:
        TB = int(block_windows)
    else:
        TB = _auto_block_windows(budget, B_, N, C, H, x.dtype.itemsize)
    TB = max(1, min(TB, B_))
    if has_mask:
        TB = _legalize_tb(TB, nW)
    mask_mode = None
    if has_mask:
        mask_mode = "tiled" if TB % nW == 0 else "sliced"

    n_steps = -(-B_ // TB)
    Bp = n_steps * TB
    xp = jnp.pad(x, ((0, Bp - B_), (0, 0), (0, 0))) if Bp != B_ else x

    kernel = functools.partial(_window_attn_kernel, num_heads=H, nW=nW,
                               mask_mode=mask_mode)

    in_specs = [
        pl.BlockSpec((TB, N, C), lambda i: (i, 0, 0)),       # x (streamed)
        pl.BlockSpec((C, 3 * C), lambda i: (0, 0)),          # fused qkv weight
        pl.BlockSpec((1, 3 * C), lambda i: (0, 0)),          # fused qkv bias
        pl.BlockSpec((H, N, N), lambda i: (0, 0, 0)),        # rel-pos bias
        pl.BlockSpec((H, hd, C), lambda i: (0, 0, 0)),       # proj weight (per head)
        pl.BlockSpec((1, C), lambda i: (0, 0)),              # proj bias
    ]
    args = [xp, w_fused, b_fused, rpb, wp, bp]
    if has_mask:
        in_specs.append(pl.BlockSpec((nW, N, N), lambda i: (0, 0, 0)))
        args.append(mask)

    # advisory cost estimate for XLA scheduling around the custom call
    flops_per_win = 2 * N * C * (3 * C) + 4 * N * N * C + 2 * N * C * C
    bytes_accessed = int(
        (xp.size + Bp * N * C) * x.dtype.itemsize
        + (w_fused.size + wp.size + rpb.size) * w_fused.dtype.itemsize
        + (b_fused.size + bp.size) * 4
        + (mask.size * mask.dtype.itemsize if has_mask else 0))
    cost = pl.CostEstimate(flops=int(Bp * flops_per_win),
                           transcendentals=int(Bp * H * N * N),
                           bytes_accessed=bytes_accessed)

    out = pl.pallas_call(
        kernel,
        out_shape=jax.ShapeDtypeStruct((Bp, N, C), x.dtype),
        grid=(n_steps,),
        in_specs=in_specs,
        out_specs=pl.BlockSpec((TB, N, C), lambda i: (i, 0, 0)),
        compiler_params=pltpu.CompilerParams(
            dimension_semantics=("parallel",),
            vmem_limit_bytes=vmem_limit),
        cost_estimate=cost,
    )(*args)

    if Bp != B_:
        out = out[:B_]
    return out


# ---------------------------------------------------------------------------
# Pure-JAX reference (mirrors the PyTorch module exactly)
# ---------------------------------------------------------------------------
def _reference_forward(x, w_qkv, b_qkv, w_proj, b_proj, rpb_table, rel_index,
                       num_heads, mask=None, qk_scale=None):
    B_, N, C = x.shape
    hd = C // num_heads
    scale = qk_scale if qk_scale is not None else hd ** (-0.5)

    qkv = x @ w_qkv.T + b_qkv
    qkv = qkv.reshape(B_, N, 3, num_heads, hd).transpose(2, 0, 3, 1, 4)
    q, k, v = qkv[0], qkv[1], qkv[2]
    q = q * scale
    attn = jnp.einsum('bhnd,bhmd->bhnm', q, k)

    rpb = rpb_table[rel_index.reshape(-1)].reshape(N, N, num_heads)
    rpb = jnp.transpose(rpb, (2, 0, 1))
    attn = attn + rpb[None]

    if mask is not None:
        nW = mask.shape[0]
        attn = attn.reshape(B_ // nW, nW, num_heads, N, N) + mask[None, :, None]
        attn = attn.reshape(B_, num_heads, N, N)
    attn = jax.nn.softmax(attn, axis=-1)

    out = jnp.einsum('bhnm,bhmd->bhnd', attn, v)
    out = out.transpose(0, 2, 1, 3).reshape(B_, N, C)
    return out @ w_proj.T + b_proj


def _relative_position_index(window_size):
    """Same buffer the PyTorch module registers (host-side, deterministic)."""
    Wh, Ww = window_size
    coords = np.stack(np.meshgrid(np.arange(Wh), np.arange(Ww), indexing='ij'))
    coords_flatten = coords.reshape(2, -1)
    rel = coords_flatten[:, :, None] - coords_flatten[:, None, :]
    rel = rel.transpose(1, 2, 0).astype(np.int64)
    rel[:, :, 0] += Wh - 1
    rel[:, :, 1] += Ww - 1
    rel[:, :, 0] *= 2 * Ww - 1
    return jnp.asarray(rel.sum(-1), dtype=jnp.int32)


# ---------------------------------------------------------------------------
# Demo / self-test
# ---------------------------------------------------------------------------
if __name__ == "__main__":
    # 8x8 windows, dim=32, 4 heads, batch of 2 images x 4 windows -> (8, 64, 32)
    B, nW, num_heads, dim = 2, 4, 4, 32
    window_size = (8, 8)
    N = window_size[0] * window_size[1]
    B_ = B * nW

    key = jax.random.PRNGKey(0)
    kx, kqkv, kbq, kp, kbp, kt, km = jax.random.split(key, 7)

    x = jax.random.normal(kx, (B_, N, dim), dtype=jnp.float32)
    w_qkv = 0.05 * jax.random.normal(kqkv, (3 * dim, dim), dtype=jnp.float32)
    b_qkv = 0.02 * jax.random.normal(kbq, (3 * dim,), dtype=jnp.float32)
    w_proj = 0.05 * jax.random.normal(kp, (dim, dim), dtype=jnp.float32)
    b_proj = 0.02 * jax.random.normal(kbp, (dim,), dtype=jnp.float32)
    rpb_table = 0.02 * jax.random.normal(
        kt, ((2 * window_size[0] - 1) * (2 * window_size[1] - 1), num_heads),
        dtype=jnp.float32)
    # shifted-window style additive mask (0 / -100), one per window position
    mask = jnp.where(jax.random.uniform(km, (nW, N, N)) > 0.3, 0.0, -100.0)
    mask = mask.astype(jnp.float32)

    rel_index = _relative_position_index(window_size)

    ref_m = _reference_forward(x, w_qkv, b_qkv, w_proj, b_proj, rpb_table,
                               rel_index, num_heads, mask=mask)
    ref_n = _reference_forward(x, w_qkv, b_qkv, w_proj, b_proj, rpb_table,
                               rel_index, num_heads, mask=None)

    def check(out, ref, tag):
        out = jax.block_until_ready(out)
        assert out.shape == ref.shape, (tag, out.shape)
        ok = jnp.allclose(out, ref, atol=2e-2, rtol=2e-2)
        assert bool(ok), (tag, float(jnp.max(jnp.abs(out - ref))))

    # 1) masked, auto block size -> multi-step grid, "sliced" mask mode
    out1 = window_attention_forward(x, w_qkv, b_qkv, w_proj, b_proj,
                                    rpb_table, rel_index, num_heads, mask=mask)
    check(out1, ref_m, "masked/auto")

    # 2) masked, TB = B_ -> "tiled" mask mode (static window->mask mapping)
    out2 = window_attention_forward(x, w_qkv, b_qkv, w_proj, b_proj,
                                    rpb_table, rel_index, num_heads, mask=mask,
                                    block_windows=8)
    check(out2, ref_m, "masked/tiled")

    # 3) unmasked, TB=3 -> exercises multi-step grid + tail padding
    out3 = window_attention_forward(x, w_qkv, b_qkv, w_proj, b_proj,
                                    rpb_table, rel_index, num_heads, mask=None,
                                    block_windows=3)
    check(out3, ref_n, "unmasked/pad")

    print("KERNEL_OK")
</pallas_src>

<mosaic_0001>
module attributes {stable_mosaic.version = 11 : i64} {
  func.func @_window_attn_kernel(%arg0: i32, %arg1: memref<2x64x32xf32, #tpu.memory_space<vmem>>, %arg2: memref<32x96xf32, #tpu.memory_space<vmem>>, %arg3: memref<1x96xf32, #tpu.memory_space<vmem>>, %arg4: memref<4x64x64xf32, #tpu.memory_space<vmem>>, %arg5: memref<4x8x32xf32, #tpu.memory_space<vmem>>, %arg6: memref<1x32xf32, #tpu.memory_space<vmem>>, %arg7: memref<4x64x64xf32, #tpu.memory_space<vmem>>, %arg8: memref<2x64x32xf32, #tpu.memory_space<vmem>>) attributes {dimension_semantics = [#tpu.dimension_semantics<parallel>], iteration_bounds = array<i64: 4>, scalar_prefetch = 0 : i64, scratch_operands = 0 : i64, tpu.core_type = #tpu.core_type<tc>, window_params = [{transform_indices = @transform_0, window_bounds = array<i64: 2, 64, 32>}, {pipeline_mode = #tpu.pipeline_mode<synchronous>, transform_indices = @transform_1, window_bounds = array<i64: 32, 96>}, {pipeline_mode = #tpu.pipeline_mode<synchronous>, transform_indices = @transform_2, window_bounds = array<i64: 1, 96>}, {pipeline_mode = #tpu.pipeline_mode<synchronous>, transform_indices = @transform_3, window_bounds = array<i64: 4, 64, 64>}, {pipeline_mode = #tpu.pipeline_mode<synchronous>, transform_indices = @transform_4, window_bounds = array<i64: 4, 8, 32>}, {pipeline_mode = #tpu.pipeline_mode<synchronous>, transform_indices = @transform_5, window_bounds = array<i64: 1, 32>}, {pipeline_mode = #tpu.pipeline_mode<synchronous>, transform_indices = @transform_6, window_bounds = array<i64: 4, 64, 64>}, {transform_indices = @transform_7, window_bounds = array<i64: 2, 64, 32>}]} {
    %c0 = arith.constant 0 : index
    %c0_0 = arith.constant 0 : index
    %c0_1 = arith.constant 0 : index
    %0 = vector.load %arg1[%c0, %c0_0, %c0_1] : memref<2x64x32xf32, #tpu.memory_space<vmem>>, vector<2x64x32xf32>
    %1 = vector.shape_cast %0 : vector<2x64x32xf32> to vector<128x32xf32>
    %c0_2 = arith.constant 0 : index
    %c0_3 = arith.constant 0 : index
    %2 = vector.load %arg2[%c0_2, %c0_3] : memref<32x96xf32, #tpu.memory_space<vmem>>, vector<32x96xf32>
    %cst = arith.constant dense<0.000000e+00> : vector<128x96xf32>
    %3 = tpu.matmul %1, %2, %cst {dimension_numbers = #tpu.dot_dimension_numbers<[1], [0], [0], [1], [0, 0, 1, 1], [], []>} : vector<128x32xf32>, vector<32x96xf32>, vector<128x96xf32> -> vector<128x96xf32>
    %c0_4 = arith.constant 0 : index
    %c0_5 = arith.constant 0 : index
    %4 = vector.load %arg3[%c0_4, %c0_5] : memref<1x96xf32, #tpu.memory_space<vmem>>, vector<1x96xf32>
    %5 = vector.broadcast %4 : vector<1x96xf32> to vector<128x96xf32>
    %6 = arith.addf %3, %5 : vector<128x96xf32>
    %7 = vector.extract_strided_slice %6 {offsets = [0, 0], sizes = [128, 8], strides = [1, 1]} : vector<128x96xf32> to vector<128x8xf32>
    %8 = vector.shape_cast %7 : vector<128x8xf32> to vector<2x64x8xf32>
    %9 = vector.extract_strided_slice %6 {offsets = [0, 8], sizes = [128, 8], strides = [1, 1]} : vector<128x96xf32> to vector<128x8xf32>
    %10 = vector.shape_cast %9 : vector<128x8xf32> to vector<2x64x8xf32>
    %11 = vector.extract_strided_slice %6 {offsets = [0, 16], sizes = [128, 8], strides = [1, 1]} : vector<128x96xf32> to vector<128x8xf32>
    %12 = vector.shape_cast %11 : vector<128x8xf32> to vector<2x64x8xf32>
    %13 = vector.extract_strided_slice %6 {offsets = [0, 24], sizes = [128, 8], strides = [1, 1]} : vector<128x96xf32> to vector<128x8xf32>
    %14 = vector.shape_cast %13 : vector<128x8xf32> to vector<2x64x8xf32>
    %15 = tpu.concatenate %8, %10, %12, %14 in 0 : vector<2x64x8xf32>, vector<2x64x8xf32>, vector<2x64x8xf32>, vector<2x64x8xf32> -> vector<8x64x8xf32>
    %16 = vector.extract_strided_slice %6 {offsets = [0, 32], sizes = [128, 8], strides = [1, 1]} : vector<128x96xf32> to vector<128x8xf32>
    %17 = vector.shape_cast %16 : vector<128x8xf32> to vector<2x64x8xf32>
    %18 = vector.extract_strided_slice %6 {offsets = [0, 40], sizes = [128, 8], strides = [1, 1]} : vector<128x96xf32> to vector<128x8xf32>
    %19 = vector.shape_cast %18 : vector<128x8xf32> to vector<2x64x8xf32>
    %20 = vector.extract_strided_slice %6 {offsets = [0, 48], sizes = [128, 8], strides = [1, 1]} : vector<128x96xf32> to vector<128x8xf32>
    %21 = vector.shape_cast %20 : vector<128x8xf32> to vector<2x64x8xf32>
    %22 = vector.extract_strided_slice %6 {offsets = [0, 56], sizes = [128, 8], strides = [1, 1]} : vector<128x96xf32> to vector<128x8xf32>
    %23 = vector.shape_cast %22 : vector<128x8xf32> to vector<2x64x8xf32>
    %24 = tpu.concatenate %17, %19, %21, %23 in 0 : vector<2x64x8xf32>, vector<2x64x8xf32>, vector<2x64x8xf32>, vector<2x64x8xf32> -> vector<8x64x8xf32>
    %25 = vector.extract_strided_slice %6 {offsets = [0, 64], sizes = [128, 8], strides = [1, 1]} : vector<128x96xf32> to vector<128x8xf32>
    %26 = vector.shape_cast %25 : vector<128x8xf32> to vector<2x64x8xf32>
    %27 = vector.extract_strided_slice %6 {offsets = [0, 72], sizes = [128, 8], strides = [1, 1]} : vector<128x96xf32> to vector<128x8xf32>
    %28 = vector.shape_cast %27 : vector<128x8xf32> to vector<2x64x8xf32>
    %29 = vector.extract_strided_slice %6 {offsets = [0, 80], sizes = [128, 8], strides = [1, 1]} : vector<128x96xf32> to vector<128x8xf32>
    %30 = vector.shape_cast %29 : vector<128x8xf32> to vector<2x64x8xf32>
    %31 = vector.extract_strided_slice %6 {offsets = [0, 88], sizes = [128, 8], strides = [1, 1]} : vector<128x96xf32> to vector<128x8xf32>
    %32 = vector.shape_cast %31 : vector<128x8xf32> to vector<2x64x8xf32>
    %33 = tpu.concatenate %26, %28, %30, %32 in 0 : vector<2x64x8xf32>, vector<2x64x8xf32>, vector<2x64x8xf32>, vector<2x64x8xf32> -> vector<8x64x8xf32>
    "tpu.trace_start"() <{level = 10 : i32, message = "bnd,bmd->bnm"}> : () -> ()
    %cst_6 = arith.constant dense<0.000000e+00> : vector<8x64x64xf32>
    %34 = tpu.matmul %15, %24, %cst_6 {dimension_numbers = #tpu.dot_dimension_numbers<[2], [2], [1], [1], [0, 0, 0, 1, 1, 1], [0], [0]>} : vector<8x64x8xf32>, vector<8x64x8xf32>, vector<8x64x64xf32> -> vector<8x64x64xf32>
    "tpu.trace_stop"() : () -> ()
    %35 = vector.shape_cast %34 : vector<8x64x64xf32> to vector<4x2x64x64xf32>
    %c0_7 = arith.constant 0 : index
    %c0_8 = arith.constant 0 : index
    %c0_9 = arith.constant 0 : index
    %36 = vector.load %arg4[%c0_7, %c0_8, %c0_9] : memref<4x64x64xf32, #tpu.memory_space<vmem>>, vector<4x64x64xf32>
    %37 = vector.shape_cast %36 : vector<4x64x64xf32> to vector<4x1x64x64xf32>
    %38 = vector.broadcast %37 : vector<4x1x64x64xf32> to vector<4x2x64x64xf32>
    %39 = arith.addf %35, %38 : vector<4x2x64x64xf32>
    %c2_i32 = arith.constant 2 : i32
    %40 = arith.muli %arg0, %c2_i32 : i32
    %c4_i32 = arith.constant 4 : i32
    %c0_i32 = arith.constant 0 : i32
    %41 = arith.cmpi eq, %c4_i32, %c0_i32 : i32
    %c1_i32 = arith.constant 1 : i32
    %42 = arith.select %41, %c1_i32, %c4_i32 : i32
    %43 = arith.remsi %40, %42 : i32
    %c0_i32_10 = arith.constant 0 : i32
    %44 = arith.cmpi ne, %43, %c0_i32_10 : i32
    %c0_i32_11 = arith.constant 0 : i32
    %45 = arith.cmpi slt, %43, %c0_i32_11 : i32
    %c0_i32_12 = arith.constant 0 : i32
    %46 = arith.cmpi slt, %42, %c0_i32_12 : i32
    %47 = arith.xori %45, %46 : i1
    %48 = arith.andi %47, %44 : i1
    %49 = arith.addi %43, %42 : i32
    %50 = arith.select %48, %49, %43 : i32
    %51 = arith.index_cast %50 : i32 to index
    %c0_13 = arith.constant 0 : index
    %c0_14 = arith.constant 0 : index
    %52 = vector.load %arg7[%51, %c0_13, %c0_14] : memref<4x64x64xf32, #tpu.memory_space<vmem>>, vector<2x64x64xf32>
    %53 = vector.shape_cast %52 : vector<2x64x64xf32> to vector<1x2x64x64xf32>
    %54 = vector.broadcast %53 : vector<1x2x64x64xf32> to vector<4x2x64x64xf32>
    %55 = arith.addf %39, %54 : vector<4x2x64x64xf32>
    %cst_15 = arith.constant dense<0xFF800000> : vector<4x2x64xf32>
    %56 = vector.multi_reduction <maximumf>, %55, %cst_15 [3] : vector<4x2x64x64xf32> to vector<4x2x64xf32>
    %57 = vector.shape_cast %56 : vector<4x2x64xf32> to vector<4x2x64x1xf32>
    %58 = vector.broadcast %57 : vector<4x2x64x1xf32> to vector<4x2x64x64xf32>
    %59 = arith.subf %55, %58 : vector<4x2x64x64xf32>
    %60 = math.exp %59 : vector<4x2x64x64xf32>
    %cst_16 = arith.constant dense<0.000000e+00> : vector<4x2x64xf32>
    %61 = vector.multi_reduction <add>, %60, %cst_16 [3] : vector<4x2x64x64xf32> to vector<4x2x64xf32>
    %62 = vector.shape_cast %61 : vector<4x2x64xf32> to vector<4x2x64x1xf32>
    %63 = tpu.reciprocal %62 {approx = true} : vector<4x2x64x1xf32> -> vector<4x2x64x1xf32>
    %64 = vector.broadcast %63 : vector<4x2x64x1xf32> to vector<4x2x64x64xf32>
    %65 = arith.mulf %60, %64 : vector<4x2x64x64xf32>
    %66 = vector.shape_cast %65 : vector<4x2x64x64xf32> to vector<8x64x64xf32>
    "tpu.trace_start"() <{level = 10 : i32, message = "bnm,bmd->bnd"}> : () -> ()
    %cst_17 = arith.constant dense<0.000000e+00> : vector<8x64x8xf32>
    %67 = tpu.matmul %66, %33, %cst_17 {dimension_numbers = #tpu.dot_dimension_numbers<[2], [1], [1], [2], [0, 0, 0, 1, 1, 2], [0], [0]>} : vector<8x64x64xf32>, vector<8x64x8xf32>, vector<8x64x8xf32> -> vector<8x64x8xf32>
    "tpu.trace_stop"() : () -> ()
    %68 = vector.shape_cast %67 : vector<8x64x8xf32> to vector<4x128x8xf32>
    %c0_18 = arith.constant 0 : index
    %c0_19 = arith.constant 0 : index
    %c0_20 = arith.constant 0 : index
    %69 = vector.load %arg5[%c0_18, %c0_19, %c0_20] : memref<4x8x32xf32, #tpu.memory_space<vmem>>, vector<4x8x32xf32>
    "tpu.trace_start"() <{level = 10 : i32, message = "htd,hdc->htc"}> : () -> ()
    %cst_21 = arith.constant dense<0.000000e+00> : vector<4x128x32xf32>
    %70 = tpu.matmul %68, %69, %cst_21 {dimension_numbers = #tpu.dot_dimension_numbers<[2], [1], [1], [2], [0, 0, 0, 1, 1, 2], [0], [0]>} : vector<4x128x8xf32>, vector<4x8x32xf32>, vector<4x128x32xf32> -> vector<4x128x32xf32>
    "tpu.trace_stop"() : () -> ()
    %cst_22 = arith.constant dense<0.000000e+00> : vector<128x32xf32>
    %71 = vector.multi_reduction <add>, %70, %cst_22 [0] : vector<4x128x32xf32> to vector<128x32xf32>
    %c0_23 = arith.constant 0 : index
    %c0_24 = arith.constant 0 : index
    %72 = vector.load %arg6[%c0_23, %c0_24] : memref<1x32xf32, #tpu.memory_space<vmem>>, vector<1x32xf32>
    %73 = vector.broadcast %72 : vector<1x32xf32> to vector<128x32xf32>
    %74 = arith.addf %71, %73 : vector<128x32xf32>
    %75 = vector.shape_cast %74 : vector<128x32xf32> to vector<2x64x32xf32>
    %c0_25 = arith.constant 0 : index
    %c0_26 = arith.constant 0 : index
    %c0_27 = arith.constant 0 : index
    %76 = vector.load %arg8[%c0_25, %c0_26, %c0_27] : memref<2x64x32xf32, #tpu.memory_space<vmem>>, vector<2x64x32xf32>
    tpu.vector_store %arg8[%c0_25, %c0_26, %c0_27], %75 {strides = array<i32>} : memref<2x64x32xf32, #tpu.memory_space<vmem>>, vector<2x64x32xf32>,
    return
  }
  func.func @transform_0(%arg0: i32) -> (i32, i32, i32) {
    %c0_i32 = arith.constant 0 : i32
    %c0_i32_0 = arith.constant 0 : i32
    %c0_i32_1 = arith.constant 0 : i32
    return %arg0, %c0_i32, %c0_i32_0 : i32, i32, i32
  }
  func.func @transform_1(%arg0: i32) -> (i32, i32) {
    %c0_i32 = arith.constant 0 : i32
    %c0_i32_0 = arith.constant 0 : i32
    %c0_i32_1 = arith.constant 0 : i32
    return %c0_i32, %c0_i32_0 : i32, i32
  }
  func.func @transform_2(%arg0: i32) -> (i32, i32) {
    %c0_i32 = arith.constant 0 : i32
    %c0_i32_0 = arith.constant 0 : i32
    %c0_i32_1 = arith.constant 0 : i32
    return %c0_i32, %c0_i32_0 : i32, i32
  }
  func.func @transform_3(%arg0: i32) -> (i32, i32, i32) {
    %c0_i32 = arith.constant 0 : i32
    %c0_i32_0 = arith.constant 0 : i32
    %c0_i32_1 = arith.constant 0 : i32
    %c0_i32_2 = arith.constant 0 : i32
    return %c0_i32, %c0_i32_0, %c0_i32_1 : i32, i32, i32
  }
  func.func @transform_4(%arg0: i32) -> (i32, i32, i32) {
    %c0_i32 = arith.constant 0 : i32
    %c0_i32_0 = arith.constant 0 : i32
    %c0_i32_1 = arith.constant 0 : i32
    %c0_i32_2 = arith.constant 0 : i32
    return %c0_i32, %c0_i32_0, %c0_i32_1 : i32, i32, i32
  }
  func.func @transform_5(%arg0: i32) -> (i32, i32) {
    %c0_i32 = arith.constant 0 : i32
    %c0_i32_0 = arith.constant 0 : i32
    %c0_i32_1 = arith.constant 0 : i32
    return %c0_i32, %c0_i32_0 : i32, i32
  }
  func.func @transform_6(%arg0: i32) -> (i32, i32, i32) {
    %c0_i32 = arith.constant 0 : i32
    %c0_i32_0 = arith.constant 0 : i32
    %c0_i32_1 = arith.constant 0 : i32
    %c0_i32_2 = arith.constant 0 : i32
    return %c0_i32, %c0_i32_0, %c0_i32_1 : i32, i32, i32
  }
  func.func @transform_7(%arg0: i32) -> (i32, i32, i32) {
    %c0_i32 = arith.constant 0 : i32
    %c0_i32_0 = arith.constant 0 : i32
    %c0_i32_1 = arith.constant 0 : i32
    return %arg0, %c0_i32, %c0_i32_0 : i32, i32, i32
  }
}

</mosaic_0001>

<bundles_post_ra>
// kernel: tpu_custom_call.1
= control target key start
LH: loop header
LB: loop body
LE: loop exit
PB: predicated region body
PF: predicated region fallthrough
CT: control target
= control target key end

     0   :  { %s7157_s24 = smov 0   ;;  %s9381_s0 = inlined_call_operand.vmem [shape: f32[8,64,32], index: 0, kind: input, shape index: {}]   ;;  %s9382_s1 = inlined_call_operand.vmem [shape: f32[32,96], index: 1, kind: input, shape index: {}]   ;;  %s9383_s2 = inlined_call_operand.vmem [shape: f32[1,96], index: 2, kind: input, shape index: {}]   ;;  %s9384_s3 = inlined_call_operand.vmem [shape: f32[4,64,64], index: 3, kind: input, shape index: {}]   ;;  %s9385_s4 = inlined_call_operand.vmem [shape: f32[4,8,32], index: 4, kind: input, shape index: {}]   ;;  %s9386_s5 = inlined_call_operand.vmem [shape: f32[1,32], index: 5, kind: input, shape index: {}]   ;;  %s9387_s6 = inlined_call_operand.vmem [shape: f32[4,64,64], index: 6, kind: input, shape index: {}]   ;;  %s9388_s7 = inlined_call_operand.vmem [shape: f32[8,64,32], index: 7, kind: output, shape index: {}]  }
   0x1 LB: > { %s4952_s25 = sadd.s32 4294967295, %s7110_s24   ;;  %p4956_p0 = scmp.ge.s32.totalorder %s7110_s24, 1  ;;  %s7110_s24 = sphi %s7157_s24, %s17_s24  }
   0x2   : > { %p239_p1 = scmp.lt.s32.totalorder %s7110_s24, 5 }
   0x4   : > { %p240_p2 = pnand %p4956_p0, %p239_p1 }
   0x6   : > { %243 = sbr.rel (%p240_p2) target bundleno = 1677 (0x68d), region = 48 }
   0xd   : > { %v303_v0 = vld [vmem:[%s9382_s1] sm:$0xff]  ;;  %v304_v1 = vld [vmem:[%s9382_s1 + $0x8] sm:$0xff]  ;;  %v305_v2 = vld [vmem:[%s9382_s1 + $0x10] sm:$0xff]  ;;  %s7174_s9 = sshll.u32 %s4952_s25, 1  ;;  %vm314_vm0 = vcmask 261120   ;;  %vm636_vm1 = vcmask 64512  }
   0xe   : > { %v6174_v3 = vpack.c.bf16 %v304_v1, %v303_v0  ;;  %v306_v4 = vld [vmem:[%s9382_s1 + $0x18] sm:$0xff]  ;;  %p274_p3 = scmp.lt.s32.totalorder %s7174_s9, 7  ;;  %v7226_v22 = vld [vmem:[%s9383_s2] ss:$0 sm:$0xff]  ;;  %s7112_s19 = smov 120   ;;  %vm7419_vm2 = vmpackc.low %vm636_vm1, %vm636_vm1  ;;  %vm2036_vm3 = vcmask 523264  }
   0xf   : > { %v6178_v5 = vpack.c.bf16 %v306_v4, %v305_v2  ;;  %s7113_s20 = smov 112   ;;  %s7114_s21 = smov 96  }
  0x10   : > { %6175 = vmatprep.subr.bf16.mxu0 %v6174_v3  ;;  %s7181_s12 = scalar_select %p274_p3, %s7174_s9, 7 }
  0x11   : > { %6177 = vmatpush3.bf16.msra.mxu0 %v6174_v3  ;;  %s7115_s22 = smov 104   ;;  %s7116_s23 = smov 64  }
  0x12   : > { %6179 = vmatprep.subr.bf16.mxu0 %v6178_v5  ;;  %s5244_s13 = sshll.u32 %s7181_s12, 6  ;;  %s1943_s25 = ssub.s32 0, %s7174_s9 }
  0x13   : > { %s7189_s16 = scalar_lea.vmem %s9381_s0, %s5244_s13  ;;  %s5109_s26 = smin.u32 %s7174_s9, %s1943_s25 }
  0x14   : > { %v287_v6 = vld [vmem:[%s7189_s16] sm:$0xff]  ;;  %v288_v7 = vld [vmem:[%s7189_s16 + $0x8] sm:$0xff]  ;;  %v289_v8 = vld [vmem:[%s7189_s16 + $0x10] sm:$0xff]  ;;  %s1945_s27 = sand.u32 3, %s5109_s26   ;;  %p1942_p4 = scmp.lt.s32.totalorder %s7174_s9, 0 }
  0x15   : > { %6181 = vmatpush3.bf16.msra.mxu0 %v6178_v5  ;;  %5598 = vmatprep.mubr.msk.f32.mxu0 %vm314_vm0, %v287_v6  ;;  %v290_v9 = vld [vmem:[%s7189_s16 + $0x18] sm:$0xff]  ;;  %v291_v10 = vld [vmem:[%s7189_s16 + $0x20] sm:$0xff]  ;;  %v292_v11 = vld [vmem:[%s7189_s16 + $0x28] sm:$0xff]  ;;  %s1946_s28 = ssub.s32 0, %s1945_s27  ;;  %s9306_s15 = scalar_lea.vmem %s9388_s7, %s5244_s13 }
  0x16   : > { %v293_v12 = vld [vmem:[%s7189_s16 + $0x30] sm:$0xff]  ;;  %v294_v13 = vld [vmem:[%s7189_s16 + $0x38] sm:$0xff]  ;;  %v295_v14 = vld [vmem:[%s7189_s16 + $0x40] sm:$0xff]  ;;  %s9587_s28 = smov (!%p1942_p4, %s1946_s28), %s1945_s27 }
  0x17   : > { %v296_v15 = vld [vmem:[%s7189_s16 + $0x48] sm:$0xff]  ;;  %v297_v16 = vld [vmem:[%s7189_s16 + $0x50] sm:$0xff]  ;;  %v298_v17 = vld [vmem:[%s7189_s16 + $0x58] sm:$0xff]  ;;  %p5111_p5 = scmp.lt.s32.totalorder %s9587_s28, 0  ;;  %s1952_s29 = sadd.s32 4, %s9587_s28 }
  0x18   : > { %5599 = vmatmul.mubr.msk.f32.vlgmr.msra.gmra.mrb[0].mxu0 %vm314_vm0, %v288_v7  ;;  %v299_v18 = vld [vmem:[%s7189_s16 + $0x60] sm:$0xff]  ;;  %v300_v19 = vld [vmem:[%s7189_s16 + $0x68] sm:$0xff]  ;;  %v301_v20 = vld [vmem:[%s7189_s16 + $0x70] sm:$0xff] }
  0x19   : > { %5601 = vmatprep.mubr.msk.f32.mxu0 %vm314_vm0, %v289_v8  ;;  %v302_v21 = vld [vmem:[%s7189_s16 + $0x78] sm:$0xff]  ;;  %s9589_s29 = smov (!%p5111_p5, %s1952_s29), %s9587_s28 }
  0x1a   : > { %s5112_s30 = sshll.u32 %s9589_s29, 6 }
  0x1b   : > { %s7933_s10 = scalar_lea.vmem %s9387_s6, %s5112_s30 }
  0x1c   : > { %5602 = vmatmul.mubr.msk.f32.gmra.mrb[2].mxu0 %vm314_vm0, %v290_v9 }
  0x1d   : > { %5604 = vmatprep.mubr.msk.f32.mxu0 %vm314_vm0, %v291_v10 }
  0x20   : > { %5605 = vmatmul.mubr.msk.f32.gmra.mrb[4].mxu0 %vm314_vm0, %v292_v11 }
  0x21   : > { %5607 = vmatprep.mubr.msk.f32.mxu0 %vm314_vm0, %v293_v12 }
  0x24   : > { %5608 = vmatmul.mubr.msk.f32.gmra.mrb[6].mxu0 %vm314_vm0, %v294_v13 }
  0x25   : > { %5610 = vmatprep.mubr.msk.f32.mxu0 %vm314_vm0, %v295_v14 }
  0x28   : > { %5611 = vmatmul.mubr.msk.f32.gmra.mrb[8].mxu0 %vm314_vm0, %v296_v15 }
  0x29   : > { %5613 = vmatprep.mubr.msk.f32.mxu0 %vm314_vm0, %v297_v16 }
  0x2c   : > { %5614 = vmatmul.mubr.msk.f32.gmra.mrb[10].mxu0 %vm314_vm0, %v298_v17 }
  0x2d   : > { %5616 = vmatprep.mubr.msk.f32.mxu0 %vm314_vm0, %v299_v18 }
  0x30   : > { %5617 = vmatmul.mubr.msk.f32.gmra.mrb[12].mxu0 %vm314_vm0, %v300_v19 }
  0x31   : > { %5619 = vmatprep.mubr.msk.f32.mxu0 %vm314_vm0, %v301_v20 }
  0x34   : > { %5620 = vmatmul.mubr.msk.f32.gmra.mrb[14].mxu0 %vm314_vm0, %v302_v21 }
  0xeb   : > { %v5600_v23 = vpop.f32.mrb[0].mxu0 }
  0xec   : > { %v7229_v24 = vadd.f32 %v5600_v23, %v7226_v22  ;;  %v429_v25 = vpop.f32.mrb[1].mxu0 }
  0xed   : > { %v7232_v26 = vadd.f32 %v7226_v22, %v429_v25 }
  0xee   : > { %526 = vrot.lane.b32.xlu0 %v7229_v24, %s7112_s19 }
  0xef   : > { %556 = vrot.lane.b32.xlu1 %v7232_v26, %s7113_s20  ;;  %5638 = vmatprep.mubr.msk.f32.mxu1 %vm636_vm1, %v7232_v26  ;;  %v5603_v27 = vpop.f32.mrb[2].mxu0  ;;  %v7256_v34 = vpack.i.bf16 %v7229_v24, %v7232_v26 }
  0xf0   : > { %v7241_v28 = vadd.f32 %v5603_v27, %v7226_v22  ;;  %v439_v29 = vpop.f32.mrb[3].mxu0 }
  0xf1   : > { %v7250_v32 = vadd.f32 %v7226_v22, %v439_v29 }
  0xf2   : > { %558 = vrot.lane.b32.xlu0 %v7229_v24, %s7113_s20 }
  0xf3   : > { %530 = vrot.lane.b32.xlu1 %v7241_v28, %s7112_s19  ;;  %v5606_v30 = vpop.f32.mrb[4].mxu0  ;;  %v7264_v38 = vpack.i.bf16 %v7241_v28, %v7250_v32 }
  0xf4   : > { %v449_v31 = vpop.f32.mrb[5].mxu0  ;;  %v7276_v42 = vadd.f32 %v5606_v30, %v7226_v22 }
  0xf5   : > { %v7268_v40 = vadd.f32 %v7226_v22, %v449_v31 }
  0xf6   : > { %524 = vrot.lane.b32.xlu0 %v7232_v26, %s7112_s19 }
  0xf7   : > { %562 = vrot.lane.b32.xlu1 %v7241_v28, %s7113_s20  ;;  %v5609_v33 = vpop.f32.mrb[6].mxu0  ;;  %v7284_v45 = vpack.i.bf16 %v7276_v42, %v7268_v40 }
  0xf8   : > { %v459_v35 = vpop.f32.mrb[7].mxu0  ;;  %v7291_v47 = vadd.f32 %v5609_v33, %v7226_v22 }
  0xf9   : > { %v7300_v52 = vadd.f32 %v7226_v22, %v459_v35 }
  0xfa   : > { %6524 = vrot.lane.b32.xlu0 %v7256_v34, %s7114_s21 }
  0xfb   : > { %528 = vrot.lane.b32.xlu1 %v7250_v32, %s7112_s19  ;;  %v5612_v36 = vpop.f32.mrb[8].mxu0  ;;  %v7315_v54 = vpack.i.bf16 %v7291_v47, %v7300_v52 }
  0xfc   : > { %v469_v37 = vpop.f32.mrb[9].mxu0  ;;  %v7307_v53 = vadd.f32 %v5612_v36, %v7226_v22 }
  0xfd   : > { %v470_v39 = vadd.f32 %v7226_v22, %v469_v37 }
  0xfe   : > { %560 = vrot.lane.b32.xlu0 %v7250_v32, %s7113_s20 }
  0xff   : > { %6529 = vrot.lane.b32.xlu1 %v7264_v38, %s7114_s21  ;;  %5666 = vmatprep.mubr.msk.f32.mxu0 %vm636_vm1, %v470_v39  ;;  %v5615_v41 = vpop.f32.mrb[10].mxu0  ;;  %v7322_v55 = vpack.i.bf16 %v7307_v53, %v470_v39 }
 0x100   : > { %v479_v43 = vpop.f32.mrb[11].mxu0  ;;  %v7328_v56 = vadd.f32 %v5615_v41, %v7226_v22 }
 0x101   : > { %v7332_v57 = vadd.f32 %v7226_v22, %v479_v43 }
 0x102   : > { %532 = vrot.lane.b32.xlu0 %v7268_v40, %s7112_s19 }
 0x103   : > { %534 = vrot.lane.b32.xlu1 %v7276_v42, %s7112_s19  ;;  %v5618_v44 = vpop.f32.mrb[12].mxu0  ;;  %v7342_v58 = vpack.i.bf16 %v7328_v56, %v7332_v57 }
 0x104   : > { %v489_v46 = vpop.f32.mrb[13].mxu0  ;;  %v7347_v59 = vadd.f32 %v5618_v44, %v7226_v22 }
 0x105   : > { %v7352_v60 = vadd.f32 %v7226_v22, %v489_v46 }
 0x106   : > { %6534 = vrot.lane.b32.xlu0 %v7284_v45, %s7114_s21 }
 0x107   : > { %566 = vrot.lane.b32.xlu1 %v7276_v42, %s7113_s20  ;;  %v5621_v48 = vpop.f32.mrb[14].mxu0  ;;  %v7366_v61 = vpack.i.bf16 %v7347_v59, %v7352_v60 }
 0x108   : > { %v7294_v49 = vadd.f32 %v5621_v48, %v7226_v22  ;;  %v499_v50 = vpop.f32.mrb[15].mxu0 }
 0x109   : > { %v7297_v51 = vadd.f32 %v7226_v22, %v499_v50 }
 0x10a   : > { %564 = vrot.lane.b32.xlu0 %v7268_v40, %s7113_s20 }
 0x10b   : > { %538 = vrot.lane.b32.xlu1 %v7291_v47, %s7112_s19  ;;  %v7390_v62 = vpack.i.bf16 %v7294_v49, %v7297_v51 }
 0x10e   : > { %536 = vrot.lane.b32.xlu0 %v7300_v52, %s7112_s19 }
 0x10f   : > { %542 = vrot.lane.b32.xlu1 %v7307_v53, %s7112_s19 }
 0x112   : > { %6539 = vrot.lane.b32.xlu0 %v7315_v54, %s7114_s21 }
 0x113   : > { %574 = vrot.lane.b32.xlu1 %v7307_v53, %s7113_s20 }
 0x116   : > { %540 = vrot.lane.b32.xlu0 %v470_v39, %s7112_s19 }
 0x117   : > { %6544 = vrot.lane.b32.xlu1 %v7322_v55, %s7114_s21 }
 0x11a   : > { %572 = vrot.lane.b32.xlu0 %v470_v39, %s7113_s20 }
 0x11b   : > { %546 = vrot.lane.b32.xlu1 %v7328_v56, %s7112_s19 }
 0x11e   : > { %544 = vrot.lane.b32.xlu0 %v7332_v57, %s7112_s19 }
 0x11f   : > { %570 = vrot.lane.b32.xlu1 %v7291_v47, %s7113_s20 }
 0x122   : > { %568 = vrot.lane.b32.xlu0 %v7300_v52, %s7113_s20 }
 0x123   : > { %6549 = vrot.lane.b32.xlu1 %v7342_v58, %s7114_s21 }
 0x126   : > { %550 = vrot.lane.b32.xlu0 %v7347_v59, %s7112_s19 }
 0x127   : > { %548 = vrot.lane.b32.xlu1 %v7352_v60, %s7112_s19 }
 0x12a   : > { %576 = vrot.lane.b32.xlu0 %v7332_v57, %s7113_s20 }
 0x12b   : > { %578 = vrot.lane.b32.xlu1 %v7328_v56, %s7113_s20 }
 0x12e   : > { %552 = vrot.lane.b32.xlu0 %v7297_v51, %s7112_s19 }
 0x12f   : > { %554 = vrot.lane.b32.xlu1 %v7294_v49, %s7112_s19 }
 0x132   : > { %6554 = vrot.lane.b32.xlu0 %v7366_v61, %s7114_s21 }
 0x133   : > { %582 = vrot.lane.b32.xlu1 %v7347_v59, %s7113_s20 }
 0x136   : > { %580 = vrot.lane.b32.xlu0 %v7352_v60, %s7113_s20 }
 0x137   : > { %590 = vrot.lane.b32.xlu1 %v7229_v24, %s7115_s22 }
 0x13a   : > { %588 = vrot.lane.b32.xlu0 %v7232_v26, %s7115_s22 }
 0x13b   : > { %586 = vrot.lane.b32.xlu1 %v7294_v49, %s7113_s20 }
 0x13e   : > { %592 = vrot.lane.b32.xlu0 %v7250_v32, %s7115_s22 }
 0x13f   : > { %594 = vrot.lane.b32.xlu1 %v7241_v28, %s7115_s22 }
 0x142   : > { %596 = vrot.lane.b32.xlu0 %v7268_v40, %s7115_s22 }
 0x146   : > { %6559 = vrot.lane.b32.xlu0 %v7390_v62, %s7114_s21 }
 0x14a   : > { %584 = vrot.lane.b32.xlu0 %v7297_v51, %s7113_s20 }
 0x14e   : > { %604 = vrot.lane.b32.xlu0 %v470_v39, %s7115_s22 }
 0x160   : > { %v7397_v63 = vpop.permute.xlu0 %526 }
 0x161   : > { %v7399_v0 = vpop.permute.xlu1 %556 }
 0x164   : > { %v7401_v1 = vpop.permute.xlu0 %558 }
 0x165   : > { %v7403_v2 = vpop.permute.xlu1 %530 }
 0x168   : > { %v7405_v3 = vpop.permute.xlu0 %524 }
 0x169   : > { %v7407_v4 = vpop.permute.xlu1 %562  ;;  %v7411_v5 = vpack.i.bf16 %v7397_v63, %v7405_v3 }
 0x16b   : > { %6564 = vrot.lane.b32.xlu1 %v7411_v5, %s7114_s21 }
 0x16c   : > { %v6525_v6 = vpop.permute.xlu0 %6524 }
 0x16d   : > { %v7415_v7 = vpop.permute.xlu1 %528  ;;  %v6527_v8 = vunpack.i.h.bf16 %v6525_v6  ;;  %v6526_v9 = vunpack.i.l.bf16 %v6525_v6 }
 0x16e   : > { %v7431_v14 = vpack.i.bf16 %v7403_v2, %v7415_v7 }
 0x16f   : > { %598 = vrot.lane.b32.xlu1 %v7276_v42, %s7115_s22  ;;  %v6182_v11 = vpack.c.bf16 %v6527_v8, %v6526_v9 }
 0x170   : > { %v7425_v12 = vpop.permute.xlu0 %560 }
 0x171   : > { %v6530_v13 = vpop.permute.xlu1 %6529  ;;  %6184 = vmatprep.subr.msk.bf16.mxu1 %vm7419_vm2, %v6182_v11 }
 0x172   : > { %v6532_v15 = vunpack.i.h.bf16 %v6530_v13  ;;  %v6531_v16 = vunpack.i.l.bf16 %v6530_v13  ;;  %6187 = vmatpush3.bf16.xpose.msk.msra.mxu1 %vm7419_vm2, %v6182_v11 }
 0x173   : > { %6569 = vrot.lane.b32.xlu1 %v7431_v14, %s7114_s21 }
 0x174   : > { %v6188_v17 = vpack.c.bf16 %v6532_v15, %v6531_v16  ;;  %v7437_v18 = vpop.permute.xlu0 %532 }
 0x175   : > { %v7439_v19 = vpop.permute.xlu1 %534 }
 0x176   : > { %6190 = vmatprep.subr.msk.bf16.mxu1 %vm7419_vm2, %v6188_v17  ;;  %v7445_v20 = vpack.i.bf16 %v7439_v19, %v7437_v18 }
 0x177   : > { %606 = vrot.lane.b32.xlu1 %v7307_v53, %s7115_s22 }
 0x178   : > { %6574 = vrot.lane.b32.xlu0 %v7445_v20, %s7114_s21  ;;  %v6535_v21 = vpop.permute.xlu0 %6534 }
 0x179   : > { %v6537_v22 = vunpack.i.h.bf16 %v6535_v21  ;;  %v6536_v23 = vunpack.i.l.bf16 %v6535_v21  ;;  %v7451_v25 = vpop.permute.xlu1 %566 }
 0x17a   : > { %6193 = vmatpush3.bf16.xpose.msk.msra.mxu1 %vm7419_vm2, %v6188_v17 }
 0x17b   : > { %v6194_v26 = vpack.c.bf16 %v6537_v22, %v6536_v23 }
 0x17c   : > { %600 = vrot.lane.b32.xlu0 %v7300_v52, %s7115_s22  ;;  %v7457_v27 = vpop.permute.xlu0 %564 }
 0x17d   : > { %v7459_v29 = vpop.permute.xlu1 %538  ;;  %6196 = vmatprep.subr.msk.bf16.mxu1 %vm7419_vm2, %v6194_v26 }
 0x180   : > { %v7463_v30 = vpop.permute.xlu0 %536 }
 0x181   : > { %v7465_v31 = vpop.permute.xlu1 %542  ;;  %v7469_v33 = vpack.i.bf16 %v7459_v29, %v7463_v30 }
 0x182   : > { %6199 = vmatpush3.bf16.xpose.msk.msra.mxu1 %vm7419_vm2, %v6194_v26  ;;  %v7531_v26 = vpack.i.bf16 %v7401_v1, %v7399_v0 }
 0x183   : > { %6579 = vrot.lane.b32.xlu0 %v7469_v33, %s7114_s21 }
 0x184   : > { %v6540_v35 = vpop.permute.xlu0 %6539 }
 0x185   : > { %v6542_v36 = vunpack.i.h.bf16 %v6540_v35  ;;  %v6541_v37 = vunpack.i.l.bf16 %v6540_v35  ;;  %v7475_v39 = vpop.permute.xlu1 %574 }
 0x186   : > { %9456 = vst [vmem:[#allocation2_spill] sm:$0xff] %v7475_v39 }
 0x187   : > { %v6200_v41 = vpack.c.bf16 %v6542_v36, %v6541_v37  ;;  %608 = vrot.lane.b32.xlu0 %v7332_v57, %s7115_s22  ;;  %v7565_v36 = vpack.i.bf16 %v7407_v4, %v7425_v12 }
 0x188   : > { %v7479_v43 = vpop.permute.xlu0 %540 }
 0x189   : > { %v6545_v44 = vpop.permute.xlu1 %6544  ;;  %6202 = vmatprep.subr.msk.bf16.mxu1 %vm7419_vm2, %v6200_v41  ;;  %v7485_v46 = vpack.i.bf16 %v7465_v31, %v7479_v43 }
 0x18a   : > { %v6547_v48 = vunpack.i.h.bf16 %v6545_v44  ;;  %v6546_v50 = vunpack.i.l.bf16 %v6545_v44  ;;  %6205 = vmatpush3.bf16.xpose.msk.msra.mxu1 %vm7419_vm2, %v6200_v41 }
 0x18b   : > { %6584 = vrot.lane.b32.xlu1 %v7485_v46, %s7114_s21 }
 0x18c   : > { %v6206_v6 = vpack.c.bf16 %v6547_v48, %v6546_v50  ;;  %v7491_v8 = vpop.permute.xlu0 %572 }
 0x18d   : > { %v7493_v9 = vpop.permute.xlu1 %546 }
 0x18e   : > { %6208 = vmatprep.subr.msk.bf16.mxu0 %vm7419_vm2, %v6206_v6 }
 0x18f   : > { %6211 = vmatpush3.bf16.xpose.msk.msra.mxu0 %vm7419_vm2, %v6206_v6  ;;  %602 = vrot.lane.b32.xlu1 %v7291_v47, %s7115_s22 }
 0x190   : > { %v7501_v11 = vpop.permute.xlu0 %544 }
 0x191   : > { %v7503_v13 = vpop.permute.xlu1 %570  ;;  %5639 = vmatmul.mubr.msk.f32.vlgmr.msra.gmra.mrb[0].mxu1 %vm636_vm1, %v7229_v24  ;;  %v7509_v15 = vpack.i.bf16 %v7493_v9, %v7501_v11 }
 0x192   : > { %5641 = vmatprep.mubr.msk.f32.mxu1 %vm636_vm1, %v7250_v32 }
 0x193   : > { %6589 = vrot.lane.b32.xlu1 %v7509_v15, %s7114_s21 }
 0x194   : > { %v7515_v16 = vpop.permute.xlu0 %568 }
 0x195   : > { %v6550_v17 = vpop.permute.xlu1 %6549  ;;  %5642 = vmatmul.mubr.msk.f32.gmra.mrb[2].mxu1 %vm636_vm1, %v7241_v28 }
 0x196   : > { %v6552_v21 = vunpack.i.h.bf16 %v6550_v17  ;;  %v6551_v22 = vunpack.i.l.bf16 %v6550_v17  ;;  %5644 = vmatprep.mubr.msk.f32.mxu1 %vm636_vm1, %v7268_v40  ;;  %v7587_v17 = vpack.i.bf16 %v7475_v39, %v7491_v8 }
 0x197   : > { %610 = vrot.lane.b32.xlu1 %v7328_v56, %s7115_s22 }
 0x198   : > { %v6212_v24 = vpack.c.bf16 %v6552_v21, %v6551_v22  ;;  %v7523_v23 = vpop.permute.xlu0 %550  ;;  %v7593_v21 = vpack.i.bf16 %v7451_v25, %v7457_v27 }
 0x199   : > { %v7525_v32 = vpop.permute.xlu1 %548  ;;  %5645 = vmatmul.mubr.msk.f32.gmra.mrb[4].mxu1 %vm636_vm1, %v7276_v42 }
 0x19a   : > { %5647 = vmatprep.mubr.msk.f32.mxu1 %vm636_vm1, %v7300_v52  ;;  %v7537_v28 = vpack.i.bf16 %v7523_v23, %v7525_v32  ;;  %6214 = vmatprep.subr.msk.bf16.mxu0 %vm7419_vm2, %v6212_v24 }
 0x19b   : > { %6594 = vrot.lane.b32.xlu1 %v7531_v26, %s7114_s21  ;;  %6217 = vmatpush3.bf16.xpose.msk.msra.mxu0 %vm7419_vm2, %v6212_v24 }
 0x19c   : > { %6599 = vrot.lane.b32.xlu0 %v7537_v28, %s7114_s21  ;;  %v7547_v40 = vpop.permute.xlu0 %576 }
 0x19d   : > { %9457 = vst [vmem:[#allocation3_spill] sm:$0xff] %v7547_v40  ;;  %v7549_v42 = vpop.permute.xlu1 %578  ;;  %5648 = vmatmul.mubr.msk.f32.gmra.mrb[6].mxu1 %vm636_vm1, %v7291_v47 }
 0x19e   : > { %9458 = vst [vmem:[#allocation4_spill] sm:$0xff] %v7549_v42  ;;  %5694 = vmatprep.mubr.msk.f32.mxu1 %vm636_vm1, %v7405_v3 }
 0x19f   : > { %614 = vrot.lane.b32.xlu1 %v7347_v59, %s7115_s22 }
 0x1a0   : > { %612 = vrot.lane.b32.xlu0 %v7352_v60, %s7115_s22  ;;  %v7559_v52 = vpop.permute.xlu0 %552 }
 0x1a1   : > { %v7561_v35 = vpop.permute.xlu1 %554 }
 0x1a2   : > { %v7569_v47 = vpack.i.bf16 %v7561_v35, %v7559_v52 }
 0x1a3   : > { %6604 = vrot.lane.b32.xlu1 %v7565_v36, %s7114_s21 }
 0x1a4   : > { %9459 = vst [vmem:[#allocation5_spill] sm:$0xff] %v7569_v47  ;;  %6609 = vrot.lane.b32.xlu0 %v7569_v47, %s7114_s21  ;;  %v6555_v3 = vpop.permute.xlu0 %6554 }
 0x1a5   : > { %v6557_v37 = vunpack.i.h.bf16 %v6555_v3  ;;  %v6556_v41 = vunpack.i.l.bf16 %v6555_v3  ;;  %v7575_v44 = vpop.permute.xlu1 %582  ;;  %v7607_v3 = vpack.i.bf16 %v7549_v42, %v7547_v40 }
 0x1a6   : > { %9460 = vst [vmem:[#allocation6_spill] sm:$0xff] %v7575_v44 }
 0x1a7   : > { %v6218_v48 = vpack.c.bf16 %v6557_v37, %v6556_v41  ;;  %618 = vrot.lane.b32.xlu1 %v7294_v49, %s7115_s22  ;;  %9463 = vst [vmem:[#allocation9_spill] sm:$0xff] %v7607_v3  ;;  %v7611_v37 = vpack.i.bf16 %v7503_v13, %v7515_v16 }
 0x1a8   : > { %616 = vrot.lane.b32.xlu0 %v7297_v51, %s7115_s22  ;;  %v7581_v50 = vpop.permute.xlu0 %580 }
 0x1a9   : > { %9461 = vst [vmem:[#allocation7_spill] sm:$0xff] %v7581_v50  ;;  %v7583_v6 = vpop.permute.xlu1 %590  ;;  %6220 = vmatprep.subr.msk.bf16.mxu0 %vm7419_vm2, %v6218_v48  ;;  %9464 = vst [vmem:[#allocation10_spill] sm:$0xff] %v7611_v37  ;;  %v7627_v42 = vpack.i.bf16 %v7575_v44, %v7581_v50 }
 0x1aa   : > { %9462 = vst [vmem:[#allocation8_spill] sm:$0xff] %v7583_v6  ;;  %6223 = vmatpush3.bf16.xpose.msk.msra.mxu0 %vm7419_vm2, %v6218_v48 }
 0x1ab   : > { %6619 = vrot.lane.b32.xlu1 %v7587_v17, %s7114_s21  ;;  %9466 = vst [vmem:[#allocation12_spill] sm:$0xff] %v7627_v42 }
 0x1ac   : > { %6614 = vrot.lane.b32.xlu0 %v7593_v21, %s7114_s21  ;;  %v7601_v22 = vpop.permute.xlu0 %588 }
 0x1ad   : > { %v7603_v24 = vpop.permute.xlu1 %586  ;;  %v7621_v48 = vpack.i.bf16 %v7583_v6, %v7601_v22 }
 0x1af   : > { %6629 = vrot.lane.b32.xlu1 %v7607_v3, %s7114_s21 }
 0x1b0   : > { %6624 = vrot.lane.b32.xlu0 %v7611_v37, %s7114_s21  ;;  %v7617_v41 = vpop.permute.xlu0 %592 }
 0x1b1   : > { %v7623_v47 = vpop.permute.xlu1 %594 }
 0x1b2   : > { %9465 = vst [vmem:[#allocation11_spill] sm:$0xff] %v7623_v47  ;;  %v7637_v37 = vpack.i.bf16 %v7623_v47, %v7617_v41 }
 0x1b3   : > { %6639 = vrot.lane.b32.xlu1 %v7621_v48, %s7114_s21 }
 0x1b4   : > { %6634 = vrot.lane.b32.xlu0 %v7627_v42, %s7114_s21  ;;  %v7633_v3 = vpop.permute.xlu0 %596 }
 0x1b5   : > { %9467 = vst [vmem:[#allocation13_spill] sm:$0xff] %v7633_v3 }
 0x1b7   : > { %6649 = vrot.lane.b32.xlu1 %v7637_v37, %s7114_s21 }
 0x1b8   : > { %v6560_v6 = vpop.permute.xlu0 %6559 }
 0x1b9   : > { %v6562_v40 = vunpack.i.h.bf16 %v6560_v6  ;;  %v6561_v39 = vunpack.i.l.bf16 %v6560_v6 }
 0x1bb   : > { %v6224_v44 = vpack.c.bf16 %v6562_v40, %v6561_v39 }
 0x1bc   : > { %v7641_v50 = vpop.permute.xlu0 %584 }
 0x1bd   : > { %6226 = vmatprep.subr.msk.bf16.mxu0 %vm7419_vm2, %v6224_v44  ;;  %v7647_v42 = vpack.i.bf16 %v7603_v24, %v7641_v50 }
 0x1be   : > { %6229 = vmatpush3.bf16.xpose.msk.msra.mxu0 %vm7419_vm2, %v6224_v44 }
 0x1bf   : > { %6644 = vrot.lane.b32.xlu0 %v7647_v42, %s7114_s21 }
 0x1c5   : > { %5667 = vmatmul.mubr.msk.f32.vlgmr.msra.gmra.mrb[16].mxu0 %vm636_vm1, %v7307_v53 }
 0x1c6   : > { %5669 = vmatprep.mubr.msk.f32.mxu0 %vm636_vm1, %v7332_v57 }
 0x1c9   : > { %5670 = vmatmul.mubr.msk.f32.gmra.mrb[18].mxu0 %vm636_vm1, %v7328_v56 }
 0x1ca   : > { %5672 = vmatprep.mubr.msk.f32.mxu0 %vm636_vm1, %v7352_v60 }
 0x1cd   : > { %5673 = vmatmul.mubr.msk.f32.gmra.mrb[20].mxu0 %vm636_vm1, %v7347_v59 }
 0x1ce   : > { %5675 = vmatprep.mubr.msk.f32.mxu0 %vm636_vm1, %v7297_v51  ;;  %v7681_v51 = vpop.permute.xlu0 %604 }
 0x1d1   : > { %5676 = vmatmul.mubr.msk.f32.gmra.mrb[22].mxu0 %vm636_vm1, %v7294_v49 }
 0x1d2   : > { %5722 = vmatprep.mubr.msk.f32.mxu0 %vm636_vm1, %v7479_v43 }
 0x1dd   : > { %v6565_v53 = vpop.permute.xlu1 %6564 }
 0x1de   : > { %v6567_v57 = vunpack.i.h.bf16 %v6565_v53  ;;  %v6566_v39 = vunpack.i.l.bf16 %v6565_v53 }
 0x1e0   : > { %v6230_v40 = vpack.c.bf16 %v6567_v57, %v6566_v39 }
 0x1e1   : > { %v7669_v56 = vpop.permute.xlu1 %598 }
 0x1e2   : > { %9468 = vst [vmem:[#allocation14_spill] sm:$0xff] %v7669_v56  ;;  %6232 = vmatprep.subr.msk.bf16.mxu1 %vm7419_vm2, %v6230_v40  ;;  %v7675_v59 = vpack.i.bf16 %v7669_v56, %v7633_v3 }
 0x1e3   : > { %6235 = vmatpush3.bf16.xpose.msk.msra.mxu1 %vm7419_vm2, %v6230_v40 }
 0x1e4   : > { %6654 = vrot.lane.b32.xlu0 %v7675_v59, %s7114_s21 }
 0x1e5   : > { %v6570_v49 = vpop.permute.xlu1 %6569 }
 0x1e6   : > { %v6572_v60 = vunpack.i.h.bf16 %v6570_v49  ;;  %v6571_v43 = vunpack.i.l.bf16 %v6570_v49 }
 0x1e8   : > { %v6236_v44 = vpack.c.bf16 %v6572_v60, %v6571_v43 }
 0x1e9   : > { %v7683_v6 = vpop.permute.xlu1 %606 }
 0x1ea   : > { %9469 = vst [vmem:[#allocation15_spill] sm:$0xff] %v7683_v6  ;;  %v6575_v53 = vpop.permute.xlu0 %6574  ;;  %6238 = vmatprep.subr.msk.bf16.mxu1 %vm7419_vm2, %v6236_v44  ;;  %v7689_v57 = vpack.i.bf16 %v7683_v6, %v7681_v51 }
 0x1eb   : > { %v6577_v39 = vunpack.i.h.bf16 %v6575_v53  ;;  %v6576_v40 = vunpack.i.l.bf16 %v6575_v53  ;;  %6241 = vmatpush3.bf16.xpose.msk.msra.mxu1 %vm7419_vm2, %v6236_v44 }
 0x1ec   : > { %6659 = vrot.lane.b32.xlu1 %v7689_v57, %s7114_s21 }
 0x1ed   : > { %v6242_v49 = vpack.c.bf16 %v6577_v39, %v6576_v40 }
 0x1ee   : > { %v7697_v60 = vpop.permute.xlu0 %600 }
 0x1ef   : > { %6244 = vmatprep.subr.msk.bf16.mxu1 %vm7419_vm2, %v6242_v49 }
 0x1f3   : > { %6247 = vmatpush3.bf16.xpose.msk.msra.mxu1 %vm7419_vm2, %v6242_v49 }
 0x1f5   : > { %v6580_v43 = vpop.permute.xlu0 %6579 }
 0x1f6   : > { %v6582_v6 = vunpack.i.h.bf16 %v6580_v43  ;;  %v6581_v56 = vunpack.i.l.bf16 %v6580_v43 }
 0x1f8   : > { %v6248_v3 = vpack.c.bf16 %v6582_v6, %v6581_v56 }
 0x1f9   : > { %v7725_v43 = vpop.permute.xlu0 %608 }
 0x1fa   : > { %6250 = vmatprep.subr.msk.bf16.mxu1 %vm7419_vm2, %v6248_v3 }
 0x1fb   : > { %6253 = vmatpush3.bf16.xpose.msk.msra.mxu1 %vm7419_vm2, %v6248_v3 }
 0x1fd   : > { %v6585_v44 = vpop.permute.xlu1 %6584 }
 0x1fe   : > { %v6587_v53 = vunpack.i.h.bf16 %v6585_v44  ;;  %v6586_v39 = vunpack.i.l.bf16 %v6585_v44 }
 0x200   : > { %v6254_v40 = vpack.c.bf16 %v6587_v53, %v6586_v39 }
 0x201   : > { %v7705_v47 = vpop.permute.xlu1 %602 }
 0x202   : > { %5695 = vmatmul.mubr.msk.f32.vlgmr.msra.gmra.mrb[8].mxu1 %vm636_vm1, %v7397_v63  ;;  %6256 = vmatprep.subr.msk.bf16.mxu0 %vm7419_vm2, %v6254_v40  ;;  %v7713_v56 = vpack.i.bf16 %v7705_v47, %v7697_v60 }
 0x203   : > { %5697 = vmatprep.mubr.msk.f32.mxu1 %vm636_vm1, %v7415_v7  ;;  %6259 = vmatpush3.bf16.xpose.msk.msra.mxu0 %vm7419_vm2, %v6254_v40 }
 0x204   : > { %6664 = vrot.lane.b32.xlu0 %v7713_v56, %s7114_s21 }
 0x205   : > { %v6590_v3 = vpop.permute.xlu1 %6589 }
 0x206   : > { %v6592_v6 = vunpack.i.h.bf16 %v6590_v3  ;;  %v6591_v49 = vunpack.i.l.bf16 %v6590_v3  ;;  %5698 = vmatmul.mubr.msk.f32.gmra.mrb[10].mxu1 %vm636_vm1, %v7403_v2 }
 0x207   : > { %5700 = vmatprep.mubr.msk.f32.mxu1 %vm636_vm1, %v7437_v18 }
 0x208   : > { %v6260_v63 = vpack.c.bf16 %v6592_v6, %v6591_v49 }
 0x209   : > { %v7727_v44 = vpop.permute.xlu1 %610 }
 0x20a   : > { %9470 = vst [vmem:[#allocation16_spill] sm:$0xff] %v7727_v44  ;;  %5701 = vmatmul.mubr.msk.f32.gmra.mrb[12].mxu1 %vm636_vm1, %v7439_v19  ;;  %6262 = vmatprep.subr.msk.bf16.mxu0 %vm7419_vm2, %v6260_v63  ;;  %v7735_v7 = vpack.i.bf16 %v7727_v44, %v7725_v43 }
 0x20b   : > { %5703 = vmatprep.mubr.msk.f32.mxu1 %vm636_vm1, %v7463_v30  ;;  %6265 = vmatpush3.bf16.xpose.msk.msra.mxu0 %vm7419_vm2, %v6260_v63 }
 0x20c   : > { %6669 = vrot.lane.b32.xlu1 %v7735_v7, %s7114_s21 }
 0x20d   : > { %v6595_v2 = vpop.permute.xlu1 %6594 }
 0x20e   : > { %v6597_v18 = vunpack.i.h.bf16 %v6595_v2  ;;  %v6596_v53 = vunpack.i.l.bf16 %v6595_v2  ;;  %v6600_v19 = vpop.permute.xlu0 %6599  ;;  %5704 = vmatmul.mubr.msk.f32.gmra.mrb[14].mxu1 %vm636_vm1, %v7459_v29 }
 0x20f   : > { %v6602_v39 = vunpack.i.h.bf16 %v6600_v19  ;;  %v6601_v40 = vunpack.i.l.bf16 %v6600_v19  ;;  %5750 = vmatprep.mubr.msk.f32.mxu1 %vm636_vm1, %v7399_v0 }
 0x210   : > { %v6278_v3 = vpack.c.bf16 %v6597_v18, %v6596_v53 }
 0x211   : > { %v6266_v30 = vpack.c.bf16 %v6602_v39, %v6601_v40  ;;  %v7747_v6 = vpop.permute.xlu1 %614 }
 0x212   : > { %v7749_v49 = vpop.permute.xlu0 %612  ;;  %6280 = vmatprep.subr.msk.bf16.mxu1 %vm7419_vm2, %v6278_v3 }
 0x213   : > { %6268 = vmatprep.subr.msk.bf16.mxu0 %vm7419_vm2, %v6266_v30  ;;  %6283 = vmatpush3.bf16.xpose.msk.msra.mxu1 %vm7419_vm2, %v6278_v3  ;;  %v7759_v29 = vpack.i.bf16 %v7747_v6, %v7749_v49 }
 0x214   : > { %6271 = vmatpush3.bf16.xpose.msk.msra.mxu0 %vm7419_vm2, %v6266_v30 }
 0x215   : > { %9471 = vst [vmem:[#allocation17_spill] sm:$0xff] %v7759_v29  ;;  %v6605_v0 = vpop.permute.xlu1 %6604  ;;  %6674 = vrot.lane.b32.xlu0 %v7759_v29, %s7114_s21 }
 0x216   : > { %v6607_v63 = vunpack.i.h.bf16 %v6605_v0  ;;  %v6606_v2 = vunpack.i.l.bf16 %v6605_v0  ;;  %v6610_v18 = vpop.permute.xlu0 %6609 }
 0x217   : > { %v6612_v53 = vunpack.i.h.bf16 %v6610_v18  ;;  %v6611_v19 = vunpack.i.l.bf16 %v6610_v18 }
 0x218   : > { %v6284_v39 = vpack.c.bf16 %v6607_v63, %v6606_v2 }
 0x219   : > { %v6272_v40 = vpack.c.bf16 %v6612_v53, %v6611_v19  ;;  %v7765_v44 = vpop.permute.xlu1 %618  ;;  %6689 = vrot.lane.b32.xlu0 %v7264_v38, %s7116_s23 }
 0x21a   : > { %9472 = vst [vmem:[#allocation18_spill] sm:$0xff] %v7765_v44  ;;  %v7769_v3 = vpop.permute.xlu0 %616  ;;  %6286 = vmatprep.subr.msk.bf16.mxu1 %vm7419_vm2, %v6284_v39 }
 0x21b   : > { %6274 = vmatprep.subr.msk.bf16.mxu0 %vm7419_vm2, %v6272_v40  ;;  %6289 = vmatpush3.bf16.xpose.msk.msra.mxu1 %vm7419_vm2, %v6284_v39  ;;  %v7779_v30 = vpack.i.bf16 %v7765_v44, %v7769_v3 }
 0x21c   : > { %6277 = vmatpush3.bf16.xpose.msk.msra.mxu0 %vm7419_vm2, %v6272_v40 }
 0x21d   : > { %9473 = vst [vmem:[#allocation19_spill] sm:$0xff] %v7779_v30  ;;  %v6620_v0 = vpop.permute.xlu1 %6619  ;;  %6704 = vrot.lane.b32.xlu0 %v7322_v55, %s7116_s23  ;;  %6679 = vrot.lane.b32.xlu1 %v7779_v30, %s7114_s21 }
 0x21e   : > { %v6622_v38 = vunpack.i.h.bf16 %v6620_v0  ;;  %v6621_v63 = vunpack.i.l.bf16 %v6620_v0  ;;  %v6615_v2 = vpop.permute.xlu0 %6614 }
 0x21f   : > { %v6617_v18 = vunpack.i.h.bf16 %v6615_v2  ;;  %v6616_v53 = vunpack.i.l.bf16 %v6615_v2 }
 0x220   : > { %v6302_v19 = vpack.c.bf16 %v6622_v38, %v6621_v63 }
 0x221   : > { %v6290_v39 = vpack.c.bf16 %v6617_v18, %v6616_v53  ;;  %v6630_v29 = vpop.permute.xlu1 %6629  ;;  %6709 = vrot.lane.b32.xlu0 %v7411_v5, %s7116_s23  ;;  %6684 = vrot.lane.b32.xlu1 %v7256_v34, %s7116_s23  ;;  %v7972_v53 = vld [vmem:[%s7933_s10 + $0x10] sm:$0xff] }
 0x222   : > { %v6632_v40 = vunpack.i.h.bf16 %v6630_v29  ;;  %v6631_v44 = vunpack.i.l.bf16 %v6630_v29  ;;  %v6625_v55 = vpop.permute.xlu0 %6624  ;;  %6304 = vmatprep.subr.msk.bf16.mxu0 %vm7419_vm2, %v6302_v19 }
 0x223   : > { %v6627_v30 = vunpack.i.h.bf16 %v6625_v55  ;;  %v6626_v0 = vunpack.i.l.bf16 %v6625_v55  ;;  %5723 = vmatmul.mubr.msk.f32.vlgmr.msra.gmra.mrb[24].mxu0 %vm636_vm1, %v7465_v31  ;;  %6292 = vmatprep.subr.msk.bf16.mxu1 %vm7419_vm2, %v6290_v39 }
 0x224   : > { %v6308_v38 = vpack.c.bf16 %v6632_v40, %v6631_v44  ;;  %5725 = vmatprep.mubr.msk.f32.mxu0 %vm636_vm1, %v7501_v11  ;;  %6295 = vmatpush3.bf16.xpose.msk.msra.mxu1 %vm7419_vm2, %v6290_v39  ;;  %v7977_v39 = vld [vmem:[%s9384_s3 + $0x28] sm:$0xff] }
 0x225   : > { %v6296_v34 = vpack.c.bf16 %v6627_v30, %v6626_v0  ;;  %6307 = vmatpush3.bf16.xpose.msk.msra.mxu0 %vm7419_vm2, %v6302_v19  ;;  %6724 = vrot.lane.b32.xlu0 %v7366_v61, %s7116_s23  ;;  %v6640_v5 = vpop.permute.xlu1 %6639 }
 0x226   : > { %6694 = vrot.lane.b32.xlu1 %v7284_v45, %s7116_s23  ;;  %v6635_v31 = vpop.permute.xlu0 %6634  ;;  %6310 = vmatprep.subr.msk.bf16.mxu0 %vm7419_vm2, %v6308_v38  ;;  %v6642_v61 = vunpack.i.h.bf16 %v6640_v5  ;;  %v6641_v29 = vunpack.i.l.bf16 %v6640_v5 }
 0x227   : > { %5726 = vmatmul.mubr.msk.f32.gmra.mrb[26].mxu0 %vm636_vm1, %v7493_v9  ;;  %6298 = vmatprep.subr.msk.bf16.mxu1 %vm7419_vm2, %v6296_v34  ;;  %v6637_v11 = vunpack.i.h.bf16 %v6635_v31  ;;  %v6636_v44 = vunpack.i.l.bf16 %v6635_v31  ;;  %v7991_v31 = vld [vmem:[%s9384_s3 + $0x38] sm:$0xff] }
 0x228   : > { %5728 = vmatprep.mubr.msk.f32.mxu0 %vm636_vm1, %v7525_v32  ;;  %v6326_v9 = vpack.c.bf16 %v6642_v61, %v6641_v29 }
 0x229   : > { %6729 = vrot.lane.b32.xlu0 %v7445_v20, %s7116_s23  ;;  %v6314_v45 = vpack.c.bf16 %v6637_v11, %v6636_v44  ;;  %v6650_v32 = vpop.permute.xlu1 %6649 }
 0x22a   : > { %6699 = vrot.lane.b32.xlu1 %v7315_v54, %s7116_s23  ;;  %v6652_v54 = vunpack.i.h.bf16 %v6650_v32  ;;  %v6651_v20 = vunpack.i.l.bf16 %v6650_v32 }
 0x22b   : > { %5729 = vmatmul.mubr.msk.f32.gmra.mrb[28].mxu0 %vm636_vm1, %v7523_v23 }
 0x22c   : > { %5731 = vmatprep.mubr.msk.f32.mxu0 %vm636_vm1, %v7559_v52  ;;  %6301 = vmatpush3.bf16.xpose.msk.msra.mxu1 %vm7419_vm2, %v6296_v34  ;;  %v6332_v52 = vpack.c.bf16 %v6652_v54, %v6651_v20  ;;  %v7986_v34 = vld [vmem:[%s7933_s10 + $0x28] sm:$0xff] }
 0x22d   : > { %6313 = vmatpush3.bf16.xpose.msk.msra.mxu0 %vm7419_vm2, %v6308_v38  ;;  %6744 = vrot.lane.b32.xlu0 %v7485_v46, %s7116_s23 }
 0x22e   : > { %6714 = vrot.lane.b32.xlu1 %v7342_v58, %s7116_s23  ;;  %6316 = vmatprep.subr.msk.bf16.mxu0 %vm7419_vm2, %v6314_v45 }
 0x22f   : > { %6328 = vmatprep.subr.msk.bf16.mxu1 %vm7419_vm2, %v6326_v9  ;;  %5732 = vmatmul.mubr.msk.f32.gmra.mrb[30].mxu0 %vm636_vm1, %v7561_v35 }
 0x230   : > { %5778 = vmatprep.mubr.msk.f32.mxu0 %vm636_vm1, %v7491_v8 }
 0x231   : > { %6749 = vrot.lane.b32.xlu0 %v7531_v26, %s7116_s23  ;;  %v6645_v46 = vpop.permute.xlu0 %6644  ;;  %v9482_v26 = vld [vmem:[#allocation5_spill] sm:$0xff] }
 0x232   : > { %6719 = vrot.lane.b32.xlu1 %v7431_v14, %s7116_s23  ;;  %v6647_v58 = vunpack.i.h.bf16 %v6645_v46  ;;  %v6646_v23 = vunpack.i.l.bf16 %v6645_v46  ;;  %v9478_v14 = vld [vmem:[#allocation4_spill] sm:$0xff] }
 0x233   : > { %5751 = vmatmul.mubr.msk.f32.vlgmr.msra.gmra.mrb[16].mxu1 %vm636_vm1, %v7401_v1  ;;  %v9475_v1 = vld [vmem:[#allocation3_spill] sm:$0xff] }
 0x234   : > { %v6320_v30 = vpack.c.bf16 %v6647_v58, %v6646_v23  ;;  %5753 = vmatprep.mubr.msk.f32.mxu1 %vm636_vm1, %v7425_v12  ;;  %6331 = vmatpush3.bf16.xpose.msk.msra.mxu1 %vm7419_vm2, %v6326_v9  ;;  %v9477_v12 = vld [vmem:[#allocation10_spill] sm:$0xff]  ;;  %v8005_v9 = vld [vmem:[%s9384_s3 + $0x8] sm:$0xff] }
 0x235   : > { %6319 = vmatpush3.bf16.xpose.msk.msra.mxu0 %vm7419_vm2, %v6314_v45  ;;  %6764 = vrot.lane.b32.xlu0 %v7537_v28, %s7116_s23  ;;  %v8000_v45 = vld [vmem:[%s7933_s10 + $0x38] sm:$0xff] }
 0x236   : > { %6734 = vrot.lane.b32.xlu1 %v7390_v62, %s7116_s23  ;;  %6334 = vmatprep.subr.msk.bf16.mxu1 %vm7419_vm2, %v6332_v52  ;;  %v9474_v62 = vld [vmem:[#allocation2_spill] sm:$0xff] }
 0x237   : > { %6322 = vmatprep.subr.msk.bf16.mxu0 %vm7419_vm2, %v6320_v30  ;;  %5754 = vmatmul.mubr.msk.f32.gmra.mrb[18].mxu1 %vm636_vm1, %v7407_v4  ;;  %v9476_v4 = vld [vmem:[#allocation12_spill] sm:$0xff] }
 0x238   : > { %5756 = vmatprep.mubr.msk.f32.mxu1 %vm636_vm1, %v7457_v27  ;;  %v9480_v27 = vld [vmem:[#allocation9_spill] sm:$0xff] }
 0x239   : > { %6769 = vrot.lane.b32.xlu0 %v7593_v21, %s7116_s23 }
 0x23a   : > { %6739 = vrot.lane.b32.xlu1 %v7469_v33, %s7116_s23  ;;  %v9481_v33 = vld [vmem:[#allocation6_spill] sm:$0xff] }
 0x23b   : > { %5757 = vmatmul.mubr.msk.f32.gmra.mrb[20].mxu1 %vm636_vm1, %v7451_v25  ;;  %v9479_v25 = vld [vmem:[#allocation7_spill] sm:$0xff] }
 0x23c   : > { %5759 = vmatprep.mubr.msk.f32.mxu1 %vm636_vm1, %v7515_v16  ;;  %6337 = vmatpush3.bf16.xpose.msk.msra.mxu1 %vm7419_vm2, %v6332_v52 }
 0x23d   : > { %6325 = vmatpush3.bf16.xpose.msk.msra.mxu0 %vm7419_vm2, %v6320_v30  ;;  %6779 = vrot.lane.b32.xlu0 %v7587_v17, %s7116_s23  ;;  %v7940_v17 = vld [vmem:[%s9384_s3] sm:$0xff]  ;;  %v8014_v30 = vld [vmem:[%s7933_s10 + $0x8] sm:$0xff] }
 0x23e   : > { %6754 = vrot.lane.b32.xlu1 %v7509_v15, %s7116_s23 }
 0x23f   : > { %5760 = vmatmul.mubr.msk.f32.gmra.mrb[22].mxu1 %vm636_vm1, %v7503_v13 }
 0x240   : > { %5806 = vmatprep.mubr.msk.f32.mxu1 %vm636_vm1, %v7601_v22  ;;  %v7945_v22 = vld [vmem:[%s7933_s10] sm:$0xff] }
 0x241   : > { %6784 = vrot.lane.b32.xlu0 %v7621_v48, %s7116_s23 }
 0x242   : > { %6759 = vrot.lane.b32.xlu1 %v7565_v36, %s7116_s23 }
 0x244   : > { %5779 = vmatmul.mubr.msk.f32.vlgmr.msra.gmra.mrb[32].mxu0 %vm636_vm1, %v9474_v62  ;;  %v8019_v62 = vld [vmem:[%s9384_s3 + $0x20] sm:$0xff] }
 0x245   : > { %5781 = vmatprep.mubr.msk.f32.mxu0 %vm636_vm1, %v9475_v1  ;;  %6799 = vrot.lane.b32.xlu0 %v9476_v4, %s7116_s23 }
 0x246   : > { %6774 = vrot.lane.b32.xlu1 %v9477_v12, %s7116_s23 }
 0x248   : > { %5782 = vmatmul.mubr.msk.f32.gmra.mrb[34].mxu0 %vm636_vm1, %v9478_v14  ;;  %v8032_v14 = vld [vmem:[%s7933_s10 + $0x20] sm:$0xff] }
 0x249   : > { %5784 = vmatprep.mubr.msk.f32.mxu0 %vm636_vm1, %v9479_v25  ;;  %6804 = vrot.lane.b32.xlu0 %v7675_v59, %s7116_s23  ;;  %v8037_v25 = vld [vmem:[%s9384_s3 + $0x30] sm:$0xff] }
 0x24a   : > { %6789 = vrot.lane.b32.xlu1 %v9480_v27, %s7116_s23 }
 0x24c   : > { %5785 = vmatmul.mubr.msk.f32.gmra.mrb[36].mxu0 %vm636_vm1, %v9481_v33 }
 0x24d   : > { %5787 = vmatprep.mubr.msk.f32.mxu0 %vm636_vm1, %v7641_v50  ;;  %6814 = vrot.lane.b32.xlu0 %v7689_v57, %s7116_s23  ;;  %v7962_v57 = vld [vmem:[%s9384_s3 + $0x10] sm:$0xff] }
 0x24e   : > { %6794 = vrot.lane.b32.xlu1 %v7637_v37, %s7116_s23  ;;  %v7951_v37 = vld [vmem:[%s9384_s3 + $0x18] sm:$0xff] }
 0x250   : > { %5788 = vmatmul.mubr.msk.f32.gmra.mrb[38].mxu0 %vm636_vm1, %v7603_v24 }
 0x251   : > { %5834 = vmatprep.mubr.msk.f32.mxu0 %vm636_vm1, %v7681_v51  ;;  %v7957_v51 = vld [vmem:[%s7933_s10 + $0x18] sm:$0xff] }
 0x252   : > { %6809 = vrot.lane.b32.xlu1 %v7713_v56, %s7116_s23 }
 0x256   : > { %6819 = vrot.lane.b32.xlu1 %v7735_v7, %s7116_s23  ;;  %v6655_v8 = vpop.permute.xlu0 %6654 }
 0x257   : > { %v6657_v13 = vunpack.i.h.bf16 %v6655_v8  ;;  %v6656_v15 = vunpack.i.l.bf16 %v6655_v8 }
 0x259   : > { %v6338_v16 = vpack.c.bf16 %v6657_v13, %v6656_v15 }
 0x25a   : > { %6824 = vrot.lane.b32.xlu1 %v9482_v26, %s7116_s23 }
 0x25b   : > { %6340 = vmatprep.subr.msk.bf16.mxu1 %vm7419_vm2, %v6338_v16 }
 0x25c   : > { %6343 = vmatpush3.bf16.xpose.msk.msra.mxu1 %vm7419_vm2, %v6338_v16 }
 0x25e   : > { %6829 = vrot.lane.b32.xlu1 %v7647_v42, %s7116_s23  ;;  %v6660_v28 = vpop.permute.xlu1 %6659 }
 0x25f   : > { %v6662_v35 = vunpack.i.h.bf16 %v6660_v28  ;;  %v6661_v36 = vunpack.i.l.bf16 %v6660_v28  ;;  %v8046_v28 = vld [vmem:[%s7933_s10 + $0x30] sm:$0xff] }
 0x261   : > { %v6350_v50 = vpack.c.bf16 %v6662_v35, %v6661_v36  ;;  %v9483_v35 = vld [vmem:[#allocation8_spill] sm:$0xff] }
 0x263   : > { %6352 = vmatprep.subr.msk.bf16.mxu0 %vm7419_vm2, %v6350_v50 }
 0x264   : > { %v5640_v42 = vpop.f32.mrb[0].mxu1  ;;  %6355 = vmatpush3.bf16.xpose.msk.msra.mxu0 %vm7419_vm2, %v6350_v50 }
 0x265   : > { %v735_v21 = vpop.f32.mrb[1].mxu1  ;;  %v1878_v23 = vadd.f32 %v5640_v42, %v8005_v9 }
 0x266   : > { %v1877_v24 = vadd.f32 %v7940_v17, %v735_v21  ;;  %v9484_v21 = vld [vmem:[#allocation11_spill] sm:$0xff] }
 0x267   : > { %v8028_v4 = vadd.f32 %v8014_v30, %v1878_v23 }
 0x268   : > { %v7954_v48 = vadd.f32 %v7945_v22, %v1877_v24  ;;  %v5643_v59 = vpop.f32.mrb[2].mxu1 }
 0x269   : > { %v1880_v56 = vadd.f32 %v5643_v59, %v7951_v37  ;;  %v745_v7 = vpop.f32.mrb[3].mxu1  ;;  %v2040_v26 = vsel %vm2036_vm3, %v8028_v4, -inf }
 0x26a   : > { %v2037_v63 = vsel %vm2036_vm3, %v7954_v48, -inf  ;;  %v1879_v18 = vadd.f32 %v7962_v57, %v745_v7 }
 0x26b   : > { %v7968_v2 = vadd.f32 %v7957_v51, %v1880_v56  ;;  %v9485_v56 = vld [vmem:[#allocation13_spill] sm:$0xff] }
 0x26c   : > { %2038 = vmax.xlane.f32.xlu0 %v2037_v63  ;;  %v5646_v19 = vpop.f32.mrb[4].mxu1  ;;  %v7980_v55 = vadd.f32 %v7972_v53, %v1879_v18  ;;  %v9486_v18 = vld [vmem:[#allocation14_spill] sm:$0xff] }
 0x26d   : > { %v755_v40 = vpop.f32.mrb[5].mxu1  ;;  %v1882_v0 = vadd.f32 %v5646_v19, %v7977_v39  ;;  %v2046_v38 = vsel %vm2036_vm3, %v7968_v2, -inf }
 0x26e   : > { %v2043_v29 = vsel %vm2036_vm3, %v7980_v55, -inf  ;;  %v1881_v12 = vadd.f32 %v8019_v62, %v755_v40 }
 0x26f   : > { %v7994_v44 = vadd.f32 %v7986_v34, %v1882_v0 }
 0x270   : > { %2047 = vmax.xlane.f32.xlu0 %v2046_v38  ;;  %v5649_v5 = vpop.f32.mrb[6].mxu1  ;;  %v8040_v13 = vadd.f32 %v8032_v14, %v1881_v12  ;;  %v8084_v12 = vld [vmem:[%s7933_s10 + $0x48] sm:$0xff] }
 0x271   : > { %v765_v11 = vpop.f32.mrb[7].mxu1  ;;  %v1884_v61 = vadd.f32 %v5649_v5, %v7991_v31  ;;  %v2052_v58 = vsel %vm2036_vm3, %v7994_v44, -inf }
 0x272   : > { %v1883_v15 = vadd.f32 %v8037_v25, %v765_v11  ;;  %v2049_v50 = vsel %vm2036_vm3, %v8040_v13, -inf }
 0x273   : > { %v8008_v54 = vadd.f32 %v8000_v45, %v1884_v61 }
 0x274   : > { %2044 = vmax.xlane.f32.xlu0 %v2043_v29  ;;  %v8057_v36 = vadd.f32 %v8046_v28, %v1883_v15 }
 0x275   : > { %v2058_v1 = vsel %vm2036_vm3, %v8008_v54, -inf }
 0x276   : > { %v6665_v32 = vpop.permute.xlu0 %6664 }
 0x277   : > { %v6667_v20 = vunpack.i.h.bf16 %v6665_v32  ;;  %v6666_v46 = vunpack.i.l.bf16 %v6665_v32 }
 0x278   : > { %2053 = vmax.xlane.f32.xlu0 %v2052_v58 }
 0x279   : > { %v6344_v52 = vpack.c.bf16 %v6667_v20, %v6666_v46 }
 0x27b   : > { %6346 = vmatprep.subr.msk.bf16.mxu1 %vm7419_vm2, %v6344_v52 }
 0x27c   : > { %6349 = vmatpush3.bf16.xpose.msk.msra.mxu1 %vm7419_vm2, %v6344_v52  ;;  %2059 = vmax.xlane.f32.xlu0 %v2058_v1 }
 0x27e   : > { %v6670_v27 = vpop.permute.xlu1 %6669 }
 0x27f   : > { %v6672_v33 = vunpack.i.h.bf16 %v6670_v27  ;;  %v6671_v8 = vunpack.i.l.bf16 %v6670_v27 }
 0x281   : > { %v6356_v16 = vpack.c.bf16 %v6672_v33, %v6671_v8 }
 0x282   : > { %2041 = vmax.xlane.f32.xlu1 %v2040_v26 }
 0x283   : > { %5807 = vmatmul.mubr.msk.f32.vlgmr.msra.gmra.mrb[24].mxu1 %vm636_vm1, %v9483_v35  ;;  %6358 = vmatprep.subr.msk.bf16.mxu0 %vm7419_vm2, %v6356_v16 }
 0x284   : > { %5809 = vmatprep.mubr.msk.f32.mxu1 %vm636_vm1, %v7617_v41  ;;  %6361 = vmatpush3.bf16.xpose.msk.msra.mxu0 %vm7419_vm2, %v6356_v16  ;;  %v2055_v41 = vsel %vm2036_vm3, %v8057_v36, -inf }
 0x286   : > { %2050 = vmax.xlane.f32.xlu1 %v2049_v50  ;;  %v8092_v50 = vld [vmem:[%s7933_s10 + $0x40] sm:$0xff] }
 0x287   : > { %v6675_v42 = vpop.permute.xlu0 %6674  ;;  %5810 = vmatmul.mubr.msk.f32.gmra.mrb[26].mxu1 %vm636_vm1, %v9484_v21 }
 0x288   : > { %v6677_v24 = vunpack.i.h.bf16 %v6675_v42  ;;  %v6676_v59 = vunpack.i.l.bf16 %v6675_v42  ;;  %5812 = vmatprep.mubr.msk.f32.mxu1 %vm636_vm1, %v9485_v56 }
 0x28a   : > { %v6362_v7 = vpack.c.bf16 %v6677_v24, %v6676_v59  ;;  %2056 = vmax.xlane.f32.xlu1 %v2055_v41  ;;  %v9487_v24 = vld [vmem:[#allocation15_spill] sm:$0xff] }
 0x28b   : > { %v6690_v63 = vpop.permute.xlu0 %6689  ;;  %5813 = vmatmul.mubr.msk.f32.gmra.mrb[28].mxu1 %vm636_vm1, %v9486_v18 }
 0x28c   : > { %5815 = vmatprep.mubr.msk.f32.mxu1 %vm636_vm1, %v7697_v60  ;;  %6364 = vmatprep.subr.msk.bf16.mxu0 %vm7419_vm2, %v6362_v7  ;;  %v6692_v29 = vunpack.i.h.bf16 %v6690_v63  ;;  %v6691_v20 = vunpack.i.l.bf16 %v6690_v63 }
 0x28d   : > { %6367 = vmatpush3.bf16.xpose.msk.msra.mxu0 %vm7419_vm2, %v6362_v7 }
 0x28e   : > { %v6378_v27 = vpack.c.bf16 %v6692_v29, %v6691_v20 }
 0x28f   : > { %v6680_v19 = vpop.permute.xlu1 %6679  ;;  %v6705_v40 = vpop.permute.xlu0 %6704  ;;  %5816 = vmatmul.mubr.msk.f32.gmra.mrb[30].mxu1 %vm636_vm1, %v7705_v47 }
 0x290   : > { %v6682_v0 = vunpack.i.h.bf16 %v6680_v19  ;;  %v6681_v38 = vunpack.i.l.bf16 %v6680_v19  ;;  %v6707_v5 = vunpack.i.h.bf16 %v6705_v40  ;;  %v6706_v11 = vunpack.i.l.bf16 %v6705_v40 }
 0x292   : > { %v6368_v61 = vpack.c.bf16 %v6682_v0, %v6681_v38  ;;  %v6390_v23 = vpack.c.bf16 %v6707_v5, %v6706_v11  ;;  %v8109_v0 = vld [vmem:[%s7933_s10 + $0x58] sm:$0xff]  ;;  %v9489_v5 = vld [vmem:[#allocation16_spill] sm:$0xff] }
 0x293   : > { %v6685_v32 = vpop.permute.xlu1 %6684  ;;  %v8077_v60 = vpop.permute.xlu0 %6709 }
 0x294   : > { %v6687_v46 = vunpack.i.h.bf16 %v6685_v32  ;;  %v6686_v58 = vunpack.i.l.bf16 %v6685_v32  ;;  %6370 = vmatprep.subr.msk.bf16.mxu0 %vm7419_vm2, %v6368_v61  ;;  %v6712_v19 = vunpack.i.h.bf16 %v8077_v60  ;;  %v6711_v40 = vunpack.i.l.bf16 %v8077_v60 }
 0x295   : > { %6373 = vmatpush3.bf16.xpose.msk.msra.mxu0 %vm7419_vm2, %v6368_v61 }
 0x296   : > { %6391 = vmatprep.subr.bf16.mxu0 %v6390_v23  ;;  %v6374_v47 = vpack.c.bf16 %v6687_v46, %v6686_v58 }
 0x297   : > { %v6725_v15 = vpop.permute.xlu0 %6724 }
 0x298   : > { %v6695_v52 = vpop.permute.xlu1 %6694  ;;  %v5668_v1 = vpop.f32.mrb[16].mxu0  ;;  %6375 = vmatprep.subr.bf16.mxu1 %v6374_v47  ;;  %v6727_v61 = vunpack.i.h.bf16 %v6725_v15  ;;  %v6726_v29 = vunpack.i.l.bf16 %v6725_v15 }
 0x299   : > { %v6697_v33 = vunpack.i.h.bf16 %v6695_v52  ;;  %v6696_v8 = vunpack.i.l.bf16 %v6695_v52  ;;  %v1886_v16 = vadd.f32 %v5668_v1, %v8005_v9  ;;  %v888_v26 = vpop.f32.mrb[17].mxu0  ;;  %6377 = vmatpush3.bf16.msra.mxu1 %v6374_v47  ;;  %v8122_v47 = vld [vmem:[%s7933_s10 + $0x50] sm:$0xff] }
 0x29a   : > { %v1885_v35 = vadd.f32 %v7940_v17, %v888_v26  ;;  %6379 = vmatprep.subr.bf16.mxu1 %v6378_v27  ;;  %v9492_v26 = vld [vmem:[#allocation18_spill] sm:$0xff] }
 0x29b   : > { %v8089_v10 = vadd.f32 %v8084_v12, %v1886_v16  ;;  %v6382_v59 = vpack.c.bf16 %v6697_v33, %v6696_v8  ;;  %v8103_v63 = vpop.permute.xlu0 %6729  ;;  %v8130_v33 = vpack.c.bf16 %v6712_v19, %v6711_v40  ;;  %v8140_v16 = vld [vmem:[%s7933_s10 + $0x68] sm:$0xff]  ;;  %v8163_v40 = vld [vmem:[%s7933_s10 + $0x78] sm:$0xff] }
 0x29c   : > { %v6700_v42 = vpop.permute.xlu1 %6699  ;;  %v5671_v21 = vpop.f32.mrb[18].mxu0  ;;  %5835 = vmatmul.mubr.msk.f32.vlgmr.msra.gmra.mrb[40].mxu0 %vm636_vm1, %v9487_v24  ;;  %v8101_v7 = vadd.f32 %v8092_v50, %v1885_v35  ;;  %9488 = vst [vmem:[#allocation2_spill] sm:$0xff] %v8103_v63 }
 0x29d   : > { %v6702_v56 = vunpack.i.h.bf16 %v6700_v42  ;;  %v6701_v41 = vunpack.i.l.bf16 %v6700_v42  ;;  %v898_v9 = vpop.f32.mrb[19].mxu0  ;;  %5837 = vmatprep.mubr.msk.f32.mxu0 %vm636_vm1, %v7725_v43  ;;  %6381 = vmatpush3.bf16.msra.mxu1 %v6378_v27  ;;  %v2064_v17 = vsel %vm2036_vm3, %v8089_v10, -inf  ;;  %v1888_v18 = vadd.f32 %v5671_v21, %v7951_v37  ;;  %9491 = vst [vmem:[#allocation12_spill] sm:$0xff] %v8130_v33 }
 0x29e   : > { %6393 = vmatpush3.bf16.msra.mxu0 %v6390_v23  ;;  %6383 = vmatprep.subr.bf16.mxu1 %v6382_v59  ;;  %v2061_v37 = vsel %vm2036_vm3, %v8101_v7, -inf  ;;  %v1887_v58 = vadd.f32 %v7962_v57, %v898_v9  ;;  %v6398_v27 = vpack.c.bf16 %v6727_v61, %v6726_v29  ;;  %v8151_v9 = vld [vmem:[%s7933_s10 + $0x60] sm:$0xff] }
 0x29f   : > { %2065 = vmax.xlane.f32.xlu1 %v2064_v17  ;;  %v6386_v11 = vpack.c.bf16 %v6702_v56, %v6701_v41  ;;  %v8118_v60 = vadd.f32 %v8109_v0, %v1888_v18  ;;  %v6745_v57 = vpop.permute.xlu0 %6744 }
 0x2a0   : > { %v6715_v43 = vpop.permute.xlu1 %6714  ;;  %v5674_v38 = vpop.f32.mrb[20].mxu0  ;;  %5838 = vmatmul.mubr.msk.f32.gmra.mrb[42].mxu0 %vm636_vm1, %v9489_v5  ;;  %v8133_v8 = vadd.f32 %v8122_v47, %v1887_v58  ;;  %v6747_v35 = vunpack.i.h.bf16 %v6745_v57  ;;  %v6746_v42 = vunpack.i.l.bf16 %v6745_v57 }
 0x2a1   : > { %v6717_v32 = vunpack.i.h.bf16 %v6715_v43  ;;  %v6716_v20 = vunpack.i.l.bf16 %v6715_v43  ;;  %v908_v46 = vpop.f32.mrb[21].mxu0  ;;  %5840 = vmatprep.mubr.msk.f32.mxu0 %vm636_vm1, %v7749_v49  ;;  %6385 = vmatpush3.bf16.msra.mxu1 %v6382_v59  ;;  %v1890_v15 = vadd.f32 %v5674_v38, %v7977_v39 }
 0x2a2   : > { %6387 = vmatprep.subr.bf16.mxu1 %v6386_v11  ;;  %v1889_v59 = vadd.f32 %v8019_v62, %v908_v46  ;;  %v2067_v56 = vsel %vm2036_vm3, %v8133_v8, -inf  ;;  %v8153_v17 = vpack.c.bf16 %v6747_v35, %v6746_v42 }
 0x2a3   : > { %2062 = vmax.xlane.f32.xlu1 %v2061_v37  ;;  %v6394_v23 = vpack.c.bf16 %v6717_v32, %v6716_v20  ;;  %v8145_v39 = vadd.f32 %v8140_v16, %v1890_v15  ;;  %v8181_v32 = vpop.permute.xlu0 %6749  ;;  %v1853_v20 = vld [vmem:[%s9384_s3 + $0x40] sm:$0xff] }
 0x2a4   : > { %v8124_v52 = vpop.permute.xlu1 %6719  ;;  %v5677_v1 = vpop.f32.mrb[22].mxu0  ;;  %5841 = vmatmul.mubr.msk.f32.gmra.mrb[44].mxu0 %vm636_vm1, %v7747_v6  ;;  %v2070_v6 = vsel %vm2036_vm3, %v8118_v60, -inf  ;;  %9493 = vst [vmem:[#allocation10_spill] sm:$0xff] %v8153_v17  ;;  %v8156_v18 = vadd.f32 %v8151_v9, %v1889_v59  ;;  %9494 = vst [vmem:[#allocation4_spill] sm:$0xff] %v8181_v32 }
 0x2a5   : > { %9490 = vst [vmem:[#allocation3_spill] sm:$0xff] %v8124_v52  ;;  %6395 = vmatprep.subr.bf16.mxu0 %v6394_v23  ;;  %v918_v49 = vpop.f32.mrb[23].mxu0  ;;  %5843 = vmatprep.mubr.msk.f32.mxu0 %vm636_vm1, %v7769_v3  ;;  %v1892_v19 = vadd.f32 %v5677_v1, %v7991_v31  ;;  %v2076_v62 = vsel %vm2036_vm3, %v8145_v39, -inf  ;;  %v8326_v52 = vld [vmem:[%s9384_s3 + $0x98] sm:$0xff] }
 0x2a6   : > { %6389 = vmatpush3.bf16.msra.mxu1 %v6386_v11  ;;  %6397 = vmatpush3.bf16.msra.mxu0 %v6394_v23  ;;  %v1891_v38 = vadd.f32 %v8037_v25, %v918_v49  ;;  %v2073_v5 = vsel %vm2036_vm3, %v8156_v18, -inf  ;;  %v8172_v11 = vld [vmem:[%s7933_s10 + $0x70] sm:$0xff]  ;;  %v1854_v25 = vld [vmem:[%s9384_s3 + $0x48] sm:$0xff] }
 0x2a7   : > { %6399 = vmatprep.subr.bf16.mxu0 %v6398_v27  ;;  %6407 = vmatprep.subr.bf16.mxu1 %v8130_v33  ;;  %v8166_v43 = vadd.f32 %v8163_v40, %v1892_v19  ;;  %v8191_v58 = vpop.permute.xlu0 %6764 }
 0x2a8   : > { %2071 = vmax.xlane.f32.xlu1 %v2070_v6  ;;  %v6735_v3 = vpop.permute.xlu1 %6734  ;;  %5844 = vmatmul.mubr.msk.f32.gmra.mrb[46].mxu0 %vm636_vm1, %v9492_v26  ;;  %v8175_v31 = vadd.f32 %v8172_v11, %v1891_v38  ;;  %9496 = vst [vmem:[#allocation9_spill] sm:$0xff] %v8191_v58  ;;  %v1858_v38 = vld [vmem:[%s9384_s3 + $0x68] sm:$0xff] }
 0x2a9   : > { %v6737_v21 = vunpack.i.h.bf16 %v6735_v3  ;;  %v6736_v24 = vunpack.i.l.bf16 %v6735_v3  ;;  %v2082_v61 = vsel %vm2036_vm3, %v8166_v43, -inf }
 0x2aa   : > { %6401 = vmatpush3.bf16.msra.mxu0 %v6398_v27  ;;  %v2079_v29 = vsel %vm2036_vm3, %v8175_v31, -inf  ;;  %v1856_v27 = vld [vmem:[%s9384_s3 + $0x58] sm:$0xff] }
 0x2ab   : > { %v6402_v41 = vpack.c.bf16 %v6737_v21, %v6736_v24  ;;  %v1855_v21 = vld [vmem:[%s9384_s3 + $0x50] sm:$0xff]  ;;  %v8209_v24 = vpop.permute.xlu0 %6769 }
 0x2ac   : > { %2068 = vmax.xlane.f32.xlu1 %v2067_v56  ;;  %v8189_v46 = vpop.permute.xlu1 %6739  ;;  %9498 = vst [vmem:[#allocation5_spill] sm:$0xff] %v8209_v24 }
 0x2ad   : > { %6403 = vmatprep.subr.bf16.mxu0 %v6402_v41  ;;  %9495 = vst [vmem:[#allocation7_spill] sm:$0xff] %v8189_v46 }
 0x2ae   : > { %6405 = vmatpush3.bf16.msra.mxu0 %v6402_v41 }
 0x2af   : > { %6423 = vmatprep.subr.bf16.mxu0 %v8153_v17 }
 0x2b0   : > { %2077 = vmax.xlane.f32.xlu1 %v2076_v62  ;;  %v8204_v42 = vpop.permute.xlu1 %6754 }
 0x2b1   : > { %9497 = vst [vmem:[#allocation6_spill] sm:$0xff] %v8204_v42 }
 0x2b4   : > { %2074 = vmax.xlane.f32.xlu1 %v2073_v5  ;;  %v8219_v5 = vpop.permute.xlu1 %6759 }
 0x2b5   : > { %9499 = vst [vmem:[#allocation8_spill] sm:$0xff] %v8219_v5 }
 0x2b8   : > { %2083 = vmax.xlane.f32.xlu1 %v2082_v61 }
 0x2bc   : > { %2080 = vmax.xlane.f32.xlu1 %v2079_v29  ;;  %v8221_v29 = vpop.permute.xlu0 %6779 }
 0x2bd   : > { %9500 = vst [vmem:[#allocation11_spill] sm:$0xff] %v8221_v29 }
 0x2d5   : > { %v5696_v37 = vpop.f32.mrb[8].mxu1 }
 0x2d6   : > { %v1894_v23 = vadd.f32 %v5696_v37, %v1854_v25  ;;  %v1041_v1 = vpop.f32.mrb[9].mxu1 }
 0x2d7   : > { %v1893_v49 = vadd.f32 %v1853_v20, %v1041_v1 }
 0x2d8   : > { %v8197_v57 = vadd.f32 %v8014_v30, %v1894_v23 }
 0x2d9   : > { %v5699_v15 = vpop.f32.mrb[10].mxu1  ;;  %v8200_v6 = vadd.f32 %v7945_v22, %v1893_v49 }
 0x2da   : > { %v1896_v3 = vadd.f32 %v5699_v15, %v1856_v27  ;;  %v1051_v26 = vpop.f32.mrb[11].mxu1  ;;  %v2088_v35 = vsel %vm2036_vm3, %v8197_v57, -inf  ;;  %v1857_v15 = vld [vmem:[%s9384_s3 + $0x60] sm:$0xff] }
 0x2db   : > { %2089 = vmax.xlane.f32.xlu0 %v2088_v35  ;;  %v1895_v41 = vadd.f32 %v1855_v21, %v1051_v26  ;;  %v2085_v62 = vsel %vm2036_vm3, %v8200_v6, -inf }
 0x2dc   : > { %v8212_v56 = vadd.f32 %v7957_v51, %v1896_v3 }
 0x2dd   : > { %v5702_v59 = vpop.f32.mrb[12].mxu1  ;;  %v8224_v37 = vadd.f32 %v7972_v53, %v1895_v41  ;;  %v8243_v41 = vpop.permute.xlu0 %6784 }
 0x2de   : > { %v1061_v19 = vpop.f32.mrb[13].mxu1  ;;  %v1898_v23 = vadd.f32 %v5702_v59, %v1858_v38  ;;  %v2094_v49 = vsel %vm2036_vm3, %v8212_v56, -inf  ;;  %v8241_v59 = vld [vmem:[%s9384_s3 + $0x78] sm:$0xff]  ;;  %9502 = vst [vmem:[#allocation14_spill] sm:$0xff] %v8243_v41 }
 0x2df   : > { %2086 = vmax.xlane.f32.xlu0 %v2085_v62  ;;  %v1897_v26 = vadd.f32 %v1857_v15, %v1061_v19  ;;  %v2091_v35 = vsel %vm2036_vm3, %v8224_v37, -inf  ;;  %v8236_v62 = vpop.permute.xlu1 %6774 }
 0x2e0   : > { %v8232_v3 = vadd.f32 %v7986_v34, %v1898_v23  ;;  %9501 = vst [vmem:[#allocation13_spill] sm:$0xff] %v8236_v62 }
 0x2e1   : > { %v5705_v61 = vpop.f32.mrb[14].mxu1  ;;  %v8246_v24 = vadd.f32 %v8032_v14, %v1897_v26  ;;  %v8258_v5 = vpop.permute.xlu0 %6799 }
 0x2e2   : > { %v1071_v1 = vpop.f32.mrb[15].mxu1  ;;  %v1900_v23 = vadd.f32 %v5705_v61, %v8241_v59  ;;  %v2100_v19 = vsel %vm2036_vm3, %v8232_v3, -inf  ;;  %9504 = vst [vmem:[#allocation16_spill] sm:$0xff] %v8258_v5 }
 0x2e3   : > { %2095 = vmax.xlane.f32.xlu0 %v2094_v49  ;;  %v8254_v49 = vld [vmem:[%s9384_s3 + $0x70] sm:$0xff]  ;;  %v8256_v62 = vpop.permute.xlu1 %6789  ;;  %v2097_v61 = vsel %vm2036_vm3, %v8246_v24, -inf }
 0x2e4   : > { %9503 = vst [vmem:[#allocation15_spill] sm:$0xff] %v8256_v62  ;;  %v1899_v26 = vadd.f32 %v8254_v49, %v1071_v1 }
 0x2e5   : > { %v8273_v62 = vpop.permute.xlu0 %6804 }
 0x2e6   : > { %v8267_v41 = vadd.f32 %v8046_v28, %v1899_v26  ;;  %9506 = vst [vmem:[#allocation20_spill] sm:$0xff] %v8273_v62 }
 0x2e7   : > { %2092 = vmax.xlane.f32.xlu0 %v2091_v35  ;;  %v8261_v35 = vadd.f32 %v8000_v45, %v1900_v23 }
 0x2e8   : > { %v2103_v23 = vsel %vm2036_vm3, %v8267_v41, -inf }
 0x2e9   : > { %v2106_v29 = vsel %vm2036_vm3, %v8261_v35, -inf  ;;  %v8282_v42 = vpop.permute.xlu0 %6814 }
 0x2ea   : > { %9509 = vst [vmem:[#allocation23_spill] sm:$0xff] %v8282_v42 }
 0x2eb   : > { %2101 = vmax.xlane.f32.xlu0 %v2100_v19  ;;  %v8271_v19 = vpop.permute.xlu1 %6794 }
 0x2ec   : > { %9505 = vst [vmem:[#allocation18_spill] sm:$0xff] %v8271_v19 }
 0x2ef   : > { %2098 = vmax.xlane.f32.xlu0 %v2097_v61  ;;  %v8277_v61 = vpop.permute.xlu1 %6809 }
 0x2f0   : > { %9507 = vst [vmem:[#allocation21_spill] sm:$0xff] %v8277_v61 }
 0x2f3   : > { %2107 = vmax.xlane.f32.xlu0 %v2106_v29 }
 0x2f6   : > { %v5724_v5 = vpop.f32.mrb[24].mxu0 }
 0x2f7   : > { %v1902_v1 = vadd.f32 %v5724_v5, %v1854_v25  ;;  %v1194_v17 = vpop.f32.mrb[25].mxu0  ;;  %2104 = vmax.xlane.f32.xlu0 %v2103_v23 }
 0x2f8   : > { %v1901_v58 = vadd.f32 %v1853_v20, %v1194_v17  ;;  %v8289_v17 = vpop.permute.xlu1 %6819 }
 0x2f9   : > { %v8280_v26 = vadd.f32 %v8084_v12, %v1902_v1  ;;  %v2039_v25 = vpop.xlane.xlu0 %2038  ;;  %9511 = vst [vmem:[#allocation25_spill] sm:$0xff] %v8289_v17 }
 0x2fa   : > { %v5727_v32 = vpop.f32.mrb[26].mxu0  ;;  %v8285_v29 = vadd.f32 %v8092_v50, %v1901_v58 }
 0x2fb   : > { %9508 = vst [vmem:[#allocation22_spill] sm:$0xff] %v8280_v26  ;;  %v1904_v62 = vadd.f32 %v5727_v32, %v1856_v27  ;;  %v1204_v19 = vpop.f32.mrb[27].mxu0  ;;  %v2112_v46 = vsel %vm2036_vm3, %v8280_v26, -inf }
 0x2fc   : > { %9510 = vst [vmem:[#allocation24_spill] sm:$0xff] %v8285_v29  ;;  %2113 = vmax.xlane.f32.xlu1 %v2112_v46  ;;  %v1903_v23 = vadd.f32 %v1855_v21, %v1204_v19  ;;  %v2109_v61 = vsel %vm2036_vm3, %v8285_v29, -inf  ;;  %v8306_v21 = vld [vmem:[%s9384_s3 + $0x88] sm:$0xff]  ;;  %v8313_v19 = vld [vmem:[%s9384_s3 + $0x80] sm:$0xff] }
 0x2fd   : > { %v8292_v20 = vadd.f32 %v8109_v0, %v1904_v62  ;;  %v8301_v33 = vpop.xlane.xlu0 %2047  ;;  %v8308_v62 = vpop.permute.xlu1 %6824 }
 0x2fe   : > { %v5730_v5 = vpop.f32.mrb[28].mxu0  ;;  %v8297_v32 = vadd.f32 %v8122_v47, %v1903_v23  ;;  %9513 = vst [vmem:[#allocation27_spill] sm:$0xff] %v8308_v62 }
 0x2ff   : > { %v1214_v1 = vpop.f32.mrb[29].mxu0  ;;  %v1906_v27 = vadd.f32 %v5730_v5, %v1858_v38  ;;  %v2118_v46 = vsel %vm2036_vm3, %v8292_v20, -inf  ;;  %v2229_v38 = vsub.f32 %v7954_v48, %v2039_v25 }
 0x300   : > { %2110 = vmax.xlane.f32.xlu1 %v2109_v61  ;;  %9512 = vst [vmem:[#allocation26_spill] sm:$0xff] %v8297_v32  ;;  %v1905_v61 = vadd.f32 %v1857_v15, %v1214_v1  ;;  %v2115_v63 = vsel %vm2036_vm3, %v8297_v32, -inf }
 0x301   : > { %v8317_v23 = vadd.f32 %v8140_v16, %v1906_v27  ;;  %v2293_v15 = vmul.f32 1.442695, %v2229_v38  ;;  %v2045_v1 = vpop.xlane.xlu0 %2044  ;;  %v8335_v32 = vpop.permute.xlu1 %6829 }
 0x302   : > { %v5733_v58 = vpop.f32.mrb[30].mxu0  ;;  %v8332_v25 = vadd.f32 %v8151_v9, %v1905_v61  ;;  %9517 = vst [vmem:[#allocation31_spill] sm:$0xff] %v8335_v32  ;;  %v8348_v61 = vld [vmem:[%s9384_s3 + $0x90] sm:$0xff] }
 0x303   : > { %v1224_v42 = vpop.f32.mrb[31].mxu0  ;;  %9514 = vst [vmem:[#allocation28_spill] sm:$0xff] %v8317_v23  ;;  %v1908_v27 = vadd.f32 %v5733_v58, %v8241_v59  ;;  %v2231_v59 = vsub.f32 %v7980_v55, %v2045_v1  ;;  %6843 = vpow2.f32 %v2293_v15 }
 0x304   : > { %2119 = vmax.xlane.f32.xlu1 %v2118_v46  ;;  %9516 = vst [vmem:[#allocation30_spill] sm:$0xff] %v8332_v25  ;;  %v1907_v58 = vadd.f32 %v8254_v49, %v1224_v42  ;;  %v8367_v42 = vld [vmem:[%s9384_s3 + $0xa8] sm:$0xff] }
 0x305   : > { %v8355_v32 = vadd.f32 %v8163_v40, %v1908_v27  ;;  %v2297_v49 = vmul.f32 1.442695, %v2231_v59  ;;  %v8383_v59 = vld [vmem:[%s9384_s3 + $0xa0] sm:$0xff] }
 0x306   : > { %v5752_v5 = vpop.f32.mrb[16].mxu1  ;;  %v8370_v1 = vadd.f32 %v8172_v11, %v1907_v58 }
 0x307   : > { %v1910_v46 = vadd.f32 %v5752_v5, %v8306_v21  ;;  %v1347_v17 = vpop.f32.mrb[17].mxu1  ;;  %6845 = vpow2.f32 %v2297_v49  ;;  %v2054_v49 = vpop.xlane.xlu0 %2053 }
 0x308   : > { %v1909_v62 = vadd.f32 %v8313_v19, %v1347_v17  ;;  %2116 = vmax.xlane.f32.xlu1 %v2115_v63  ;;  %9518 = vst [vmem:[#allocation32_spill] sm:$0xff] %v8370_v1 }
 0x309   : > { %v8329_v48 = vadd.f32 %v8014_v30, %v1910_v46  ;;  %v2124_v46 = vsel %vm2036_vm3, %v8317_v23, -inf }
 0x30a   : > { %v5755_v5 = vpop.f32.mrb[18].mxu1  ;;  %v8338_v63 = vadd.f32 %v7945_v22, %v1909_v62 }
 0x30b   : > { %9515 = vst [vmem:[#allocation29_spill] sm:$0xff] %v8329_v48  ;;  %v1912_v17 = vadd.f32 %v5755_v5, %v8326_v52  ;;  %v1357_v29 = vpop.f32.mrb[19].mxu1  ;;  %v2136_v38 = vsel %vm2036_vm3, %v8329_v48, -inf  ;;  %v2121_v5 = vsel %vm2036_vm3, %v8332_v25, -inf }
 0x30c   : > { %2125 = vmax.xlane.f32.xlu1 %v2124_v46  ;;  %2137 = vmax.xlane.f32.xlu0 %v2136_v38  ;;  %v1911_v23 = vadd.f32 %v8348_v61, %v1357_v29  ;;  %v2133_v55 = vsel %vm2036_vm3, %v8338_v63, -inf }
 0x30d   : > { %v8358_v48 = vadd.f32 %v7957_v51, %v1912_v17 }
 0x30e   : > { %v5758_v62 = vpop.f32.mrb[20].mxu1  ;;  %v8373_v17 = vadd.f32 %v7972_v53, %v1911_v23 }
 0x30f   : > { %v2042_v26 = vpop.xlane.xlu1 %2041  ;;  %v1367_v46 = vpop.f32.mrb[21].mxu1  ;;  %v1914_v38 = vadd.f32 %v5758_v62, %v8367_v42 }
 0x310   : > { %v2230_v15 = vsub.f32 %v8028_v4, %v2042_v26  ;;  %2122 = vmax.xlane.f32.xlu1 %v2121_v5  ;;  %2134 = vmax.xlane.f32.xlu0 %v2133_v55  ;;  %9519 = vst [vmem:[#allocation33_spill] sm:$0xff] %v8373_v17  ;;  %v2130_v4 = vsel %vm2036_vm3, %v8355_v32, -inf  ;;  %v2142_v26 = vsel %vm2036_vm3, %v8358_v48, -inf  ;;  %v1913_v23 = vadd.f32 %v8383_v59, %v1367_v46 }
 0x311   : > { %v8386_v53 = vadd.f32 %v7986_v34, %v1914_v38  ;;  %v2127_v5 = vsel %vm2036_vm3, %v8370_v1, -inf  ;;  %v2139_v55 = vsel %vm2036_vm3, %v8373_v17, -inf  ;;  %v2232_v34 = vsub.f32 %v7968_v2, %v8301_v33  ;;  %v8412_v2 = vld [vmem:[%s9384_s3 + $0xb8] sm:$0xff] }
 0x312   : > { %v2295_v27 = vmul.f32 1.442695, %v2230_v15  ;;  %v5761_v29 = vpop.f32.mrb[22].mxu1  ;;  %v8393_v15 = vpop.eup %6843 }
 0x313   : > { %v1377_v25 = vpop.f32.mrb[23].mxu1  ;;  %9520 = vst [vmem:[#allocation34_spill] sm:$0xff] %v8386_v53  ;;  %v2051_v58 = vpop.xlane.xlu1 %2050  ;;  %9521 = vst [vmem:[#allocation35_spill] sm:$0xff] %v8393_v15  ;;  %v2421_v17 = vsel %vm2036_vm3, %v8393_v15, 0.0 }
 0x314   : > { %2131 = vmax.xlane.f32.xlu1 %v2130_v4  ;;  %2143 = vmax.xlane.f32.xlu0 %v2142_v26  ;;  %6847 = vpow2.f32 %v2295_v27  ;;  %v2233_v46 = vsub.f32 %v8040_v13, %v2051_v58  ;;  %v8400_v27 = vadd.f32 %v8032_v14, %v1913_v23  ;;  %v2299_v14 = vmul.f32 1.442695, %v2232_v34  ;;  %v8415_v58 = vpop.eup %6845 }
 0x315   : > { %v2234_v13 = vsub.f32 %v7994_v44, %v2054_v49 }
 0x316   : > { %v2301_v23 = vmul.f32 1.442695, %v2233_v46  ;;  %v2145_v44 = vsel %vm2036_vm3, %v8400_v27, -inf  ;;  %6849 = vpow2.f32 %v2299_v14 }
 0x317   : > { %v5780_v62 = vpop.f32.mrb[32].mxu0 }
 0x318   : > { %v1918_v4 = vadd.f32 %v5780_v62, %v8306_v21  ;;  %v1500_v26 = vpop.f32.mrb[33].mxu0  ;;  %2128 = vmax.xlane.f32.xlu1 %v2127_v5  ;;  %2140 = vmax.xlane.f32.xlu0 %v2139_v55  ;;  %v2148_v21 = vsel %vm2036_vm3, %v8386_v53, -inf  ;;  %v2060_v62 = vpop.xlane.xlu0 %2059  ;;  %v1916_v5 = vadd.f32 %v5761_v29, %v8412_v2  ;;  %v8421_v55 = vld [vmem:[%s9384_s3 + $0xb0] sm:$0xff]  ;;  %v2303_v29 = vmul.f32 1.442695, %v2234_v13 }
 0x319   : > { %v2236_v46 = vsub.f32 %v8008_v54, %v2060_v62  ;;  %6851 = vpow2.f32 %v2301_v23 }
 0x31a   : > { %v8403_v38 = vadd.f32 %v8084_v12, %v1918_v4  ;;  %v1917_v4 = vadd.f32 %v8313_v19, %v1500_v26  ;;  %v2427_v19 = vsel %vm2036_vm3, %v8415_v58, 0.0  ;;  %v8435_v26 = vadd.f32 %v8000_v45, %v1916_v5 }
 0x31b   : > { %v5783_v1 = vpop.f32.mrb[34].mxu0  ;;  %6853 = vpow2.f32 %v2303_v29 }
 0x31c   : > { %9522 = vst [vmem:[#allocation36_spill] sm:$0xff] %v8403_v38  ;;  %v1510_v33 = vpop.f32.mrb[35].mxu0  ;;  %2422 = vadd.xlane.f32.xlu1 %v2421_v17  ;;  %2149 = vmax.xlane.f32.xlu0 %v2148_v21  ;;  %v2160_v17 = vsel %vm2036_vm3, %v8403_v38, -inf  ;;  %v1915_v21 = vadd.f32 %v8421_v55, %v1377_v25  ;;  %v2057_v38 = vpop.xlane.xlu1 %2056  ;;  %v8438_v53 = vadd.f32 %v8092_v50, %v1917_v4  ;;  %v2307_v25 = vmul.f32 1.442695, %v2236_v46 }
 0x31d   : > { %v2235_v13 = vsub.f32 %v8057_v36, %v2057_v38  ;;  %v1919_v36 = vadd.f32 %v8348_v61, %v1510_v33 }
 0x31e   : > { %v8428_v34 = vpop.eup %6847  ;;  %v8447_v45 = vadd.f32 %v8046_v28, %v1915_v21  ;;  %6855 = vpow2.f32 %v2307_v25 }
 0x31f   : > { %v5786_v15 = vpop.f32.mrb[36].mxu0  ;;  %v2424_v14 = vsel %vm2036_vm3, %v8428_v34, 0.0  ;;  %v2305_v62 = vmul.f32 1.442695, %v2235_v13 }
 0x320   : > { %v1520_v49 = vpop.f32.mrb[37].mxu0  ;;  %2161 = vmax.xlane.f32.xlu1 %v2160_v17  ;;  %2146 = vmax.xlane.f32.xlu0 %v2145_v44  ;;  %v1920_v17 = vadd.f32 %v5783_v1, %v8326_v52  ;;  %v2157_v52 = vsel %vm2036_vm3, %v8438_v53, -inf  ;;  %v2154_v1 = vsel %vm2036_vm3, %v8435_v26, -inf  ;;  %v8456_v5 = vpop.eup %6849  ;;  %v2151_v38 = vsel %vm2036_vm3, %v8447_v45, -inf }
 0x321   : > { %6857 = vpow2.f32 %v2305_v62  ;;  %v2430_v21 = vsel %vm2036_vm3, %v8456_v5, 0.0  ;;  %v1922_v61 = vadd.f32 %v5786_v15, %v8367_v42 }
 0x322   : > { %v8450_v23 = vadd.f32 %v8109_v0, %v1920_v17 }
 0x323   : > { %v5789_v44 = vpop.f32.mrb[38].mxu0  ;;  %v8463_v4 = vpop.eup %6851  ;;  %v8478_v13 = vadd.f32 %v8140_v16, %v1922_v61 }
 0x324   : > { %v8443_v54 = vpop.f32.mrb[39].mxu0  ;;  %2428 = vadd.xlane.f32.xlu1 %v2427_v19  ;;  %2425 = vadd.xlane.f32.xlu0 %v2424_v14  ;;  %v2166_v28 = vsel %vm2036_vm3, %v8450_v23, -inf  ;;  %v8469_v19 = vadd.f32 %v8122_v47, %v1919_v36  ;;  %v2433_v17 = vsel %vm2036_vm3, %v8463_v4, 0.0 }
 0x325   : > { %v8474_v14 = vpop.eup %6853 }
 0x326   : > { %v2163_v42 = vsel %vm2036_vm3, %v8469_v19, -inf  ;;  %v2436_v15 = vsel %vm2036_vm3, %v8474_v14, 0.0 }
 0x328   : > { %2158 = vmax.xlane.f32.xlu1 %v2157_v52  ;;  %2155 = vmax.xlane.f32.xlu0 %v2154_v1  ;;  %v1921_v52 = vadd.f32 %v8383_v59, %v1520_v49  ;;  %v8485_v1 = vpop.eup %6855  ;;  %v2172_v59 = vsel %vm2036_vm3, %v8478_v13, -inf }
 0x329   : > { %v2442_v49 = vsel %vm2036_vm3, %v8485_v1, 0.0 }
 0x32c   : > { %v2066_v29 = vpop.xlane.xlu1 %2065  ;;  %2167 = vmax.xlane.f32.xlu1 %v2166_v28  ;;  %2152 = vmax.xlane.f32.xlu0 %v2151_v38  ;;  %v8489_v28 = vadd.f32 %v8151_v9, %v1921_v52  ;;  %v8495_v38 = vpop.eup %6857 }
 0x32d   : > { %v2238_v46 = vsub.f32 %v8089_v10, %v2066_v29  ;;  %v2439_v61 = vsel %vm2036_vm3, %v8495_v38, 0.0 }
 0x32f   : > { %v2311_v33 = vmul.f32 1.442695, %v2238_v46 }
 0x330   : > { %v2063_v25 = vpop.xlane.xlu1 %2062  ;;  %2434 = vadd.xlane.f32.xlu1 %v2433_v17  ;;  %2431 = vadd.xlane.f32.xlu0 %v2430_v21  ;;  %v1924_v21 = vadd.f32 %v5789_v44, %v8412_v2  ;;  %v1923_v44 = vadd.f32 %v8421_v55, %v8443_v54 }
 0x331   : > { %v2237_v10 = vsub.f32 %v8101_v7, %v2063_v25  ;;  %6859 = vpow2.f32 %v2311_v33 }
 0x332   : > { %v8505_v25 = vadd.f32 %v8163_v40, %v1924_v21 }
 0x333   : > { %v2309_v62 = vmul.f32 1.442695, %v2237_v10 }
 0x334   : > { %2164 = vmax.xlane.f32.xlu1 %v2163_v42  ;;  %2437 = vadd.xlane.f32.xlu0 %v2436_v15  ;;  %v2178_v42 = vsel %vm2036_vm3, %v8505_v25, -inf }
 0x335   : > { %v2072_v36 = vpop.xlane.xlu1 %2071  ;;  %6861 = vpow2.f32 %v2309_v62 }
 0x336   : > { %v2240_v7 = vsub.f32 %v8118_v60, %v2072_v36  ;;  %v2169_v60 = vsel %vm2036_vm3, %v8489_v28, -inf }
 0x338   : > { %v2315_v29 = vmul.f32 1.442695, %v2240_v7  ;;  %2173 = vmax.xlane.f32.xlu1 %v2172_v59  ;;  %2443 = vadd.xlane.f32.xlu0 %v2442_v49  ;;  %v8521_v59 = vadd.f32 %v8172_v11, %v1923_v44 }
 0x339   : > { %v2069_v46 = vpop.xlane.xlu1 %2068 }
 0x33a   : > { %6863 = vpow2.f32 %v2315_v29  ;;  %v2239_v54 = vsub.f32 %v8133_v8, %v2069_v46  ;;  %v2175_v29 = vsel %vm2036_vm3, %v8521_v59, -inf }
 0x33b   : > { %v8502_v33 = vpop.eup %6859 }
 0x33c   : > { %9523 = vst [vmem:[#allocation37_spill] sm:$0xff] %v8502_v33  ;;  %2170 = vmax.xlane.f32.xlu1 %v2169_v60  ;;  %2440 = vadd.xlane.f32.xlu0 %v2439_v61  ;;  %v2448_v10 = vsel %vm2036_vm3, %v8502_v33, 0.0  ;;  %v2313_v21 = vmul.f32 1.442695, %v2239_v54  ;;  %v8534_v61 = vld [vmem:[%s9384_s3 + $0xc8] sm:$0xff] }
 0x33d   : > { %v2078_v17 = vpop.xlane.xlu1 %2077 }
 0x33f   : > { %v8509_v2 = vpop.eup %6861 }
 0x340   : > { %2449 = vadd.xlane.f32.xlu1 %v2448_v10  ;;  %v2445_v49 = vsel %vm2036_vm3, %v8509_v2, 0.0 }
 0x341   : > { %v2075_v52 = vpop.xlane.xlu1 %2074 }
 0x344   : > { %v8515_v15 = vpop.eup %6863  ;;  %2179 = vmax.xlane.f32.xlu1 %v2178_v42 }
 0x345   : > { %9524 = vst [vmem:[#allocation38_spill] sm:$0xff] %v8515_v15  ;;  %v2084_v62 = vpop.xlane.xlu1 %2083  ;;  %v2454_v36 = vsel %vm2036_vm3, %v8515_v15, 0.0 }
 0x346   : > { %v2244_v7 = vsub.f32 %v8166_v43, %v2084_v62  ;;  %2455 = vadd.xlane.f32.xlu0 %v2454_v36  ;;  %v2242_v43 = vsub.f32 %v8145_v39, %v2078_v17  ;;  %v1869_v39 = vld [vmem:[%s9384_s3 + $0xc0] sm:$0xff]  ;;  %v2241_v62 = vsub.f32 %v8156_v18, %v2075_v52  ;;  %v8558_v18 = vld [vmem:[%s9384_s3 + $0xd8] sm:$0xff] }
 0x348   : > { %v2323_v55 = vmul.f32 1.442695, %v2244_v7  ;;  %2446 = vadd.xlane.f32.xlu1 %v2445_v49  ;;  %v2319_v8 = vmul.f32 1.442695, %v2242_v43 }
 0x34a   : > { %6865 = vpow2.f32 %v2323_v55 }
 0x34b   : > { %6867 = vpow2.f32 %v2313_v21 }
 0x34c   : > { %2176 = vmax.xlane.f32.xlu1 %v2175_v29  ;;  %6869 = vpow2.f32 %v2319_v8  ;;  %v2317_v29 = vmul.f32 1.442695, %v2241_v62  ;;  %v2081_v8 = vpop.xlane.xlu1 %2080 }
 0x34d   : > { %v2243_v62 = vsub.f32 %v8175_v31, %v2081_v8  ;;  %v7099_v8 = vld [vmem:[%s7933_s10 + $0x10] sm:$0xff] }
 0x34e   : > { %6871 = vpow2.f32 %v2317_v29 }
 0x354   : > { %v8529_v60 = vpop.eup %6865 }
 0x355   : > { %9525 = vst [vmem:[#allocation39_spill] sm:$0xff] %v8529_v60  ;;  %v2466_v10 = vsel %vm2036_vm3, %v8529_v60, 0.0  ;;  %v8548_v54 = vpop.eup %6867 }
 0x356   : > { %2467 = vadd.xlane.f32.xlu1 %v2466_v10  ;;  %v5808_v46 = vpop.f32.mrb[24].mxu1  ;;  %9527 = vst [vmem:[#allocation41_spill] sm:$0xff] %v8548_v54 }
 0x357   : > { %v1926_v44 = vadd.f32 %v5808_v46, %v8534_v61  ;;  %v1653_v42 = vpop.f32.mrb[25].mxu1 }
 0x358   : > { %v1925_v7 = vadd.f32 %v1869_v39, %v1653_v42  ;;  %v8565_v42 = vpop.eup %6869 }
 0x359   : > { %v8543_v17 = vadd.f32 %v8014_v30, %v1926_v44  ;;  %v2451_v30 = vsel %vm2036_vm3, %v8548_v54, 0.0  ;;  %9529 = vst [vmem:[#allocation43_spill] sm:$0xff] %v8565_v42 }
 0x35a   : > { %v5811_v36 = vpop.f32.mrb[26].mxu1  ;;  %v8551_v43 = vadd.f32 %v7945_v22, %v1925_v7 }
 0x35b   : > { %9526 = vst [vmem:[#allocation40_spill] sm:$0xff] %v8543_v17  ;;  %v1663_v49 = vpop.f32.mrb[27].mxu1  ;;  %v2184_v55 = vsel %vm2036_vm3, %v8543_v17, -inf  ;;  %v1928_v46 = vadd.f32 %v5811_v36, %v8558_v18  ;;  %v1871_v36 = vld [vmem:[%s9384_s3 + $0xd0] sm:$0xff]  ;;  %v7100_v17 = vld [vmem:[%s7933_s10 + $0x28] sm:$0xff] }
 0x35c   : > { %2185 = vmax.xlane.f32.xlu0 %v2184_v55  ;;  %9528 = vst [vmem:[#allocation42_spill] sm:$0xff] %v8551_v43  ;;  %v2181_v22 = vsel %vm2036_vm3, %v8551_v43, -inf  ;;  %v2460_v55 = vsel %vm2036_vm3, %v8565_v42, 0.0  ;;  %v1927_v60 = vadd.f32 %v1871_v36, %v1663_v49 }
 0x35d   : > { %v8569_v7 = vadd.f32 %v7957_v51, %v1928_v46  ;;  %v8583_v51 = vld [vmem:[%s9384_s3 + $0xe8] sm:$0xff] }
 0x35e   : > { %v5814_v21 = vpop.f32.mrb[28].mxu1  ;;  %v8588_v46 = vadd.f32 %v7099_v8, %v1927_v60 }
 0x35f   : > { %v1673_v10 = vpop.f32.mrb[29].mxu1  ;;  %9530 = vst [vmem:[#allocation44_spill] sm:$0xff] %v8569_v7  ;;  %v2190_v15 = vsel %vm2036_vm3, %v8569_v7, -inf  ;;  %v1930_v49 = vadd.f32 %v5814_v21, %v8583_v51 }
 0x360   : > { %2452 = vadd.xlane.f32.xlu0 %v2451_v30  ;;  %v2321_v30 = vmul.f32 1.442695, %v2243_v62  ;;  %v2187_v21 = vsel %vm2036_vm3, %v8588_v46, -inf }
 0x361   : > { %v8597_v33 = vadd.f32 %v7100_v17, %v1930_v49 }
 0x362   : > { %v5817_v52 = vpop.f32.mrb[30].mxu1  ;;  %6873 = vpow2.f32 %v2321_v30 }
 0x363   : > { %v8561_v44 = vpop.f32.mrb[31].mxu1  ;;  %9532 = vst [vmem:[#allocation46_spill] sm:$0xff] %v8597_v33  ;;  %v2196_v49 = vsel %vm2036_vm3, %v8597_v33, -inf }
 0x364   : > { %2182 = vmax.xlane.f32.xlu0 %v2181_v22  ;;  %v8578_v22 = vpop.eup %6871 }
 0x365   : > { %9531 = vst [vmem:[#allocation45_spill] sm:$0xff] %v8578_v22 }
 0x368   : > { %v2090_v29 = vpop.xlane.xlu0 %2089  ;;  %2461 = vadd.xlane.f32.xlu0 %v2460_v55  ;;  %v2457_v55 = vsel %vm2036_vm3, %v8578_v22, 0.0  ;;  %v1875_v22 = vld [vmem:[%s9384_s3 + $0xf0] sm:$0xff] }
 0x369   : > { %v2246_v42 = vsub.f32 %v8197_v57, %v2090_v29  ;;  %v1873_v57 = vld [vmem:[%s9384_s3 + $0xe0] sm:$0xff] }
 0x36a   : > { %v1929_v17 = vadd.f32 %v1873_v57, %v1673_v10 }
 0x36b   : > { %v2327_v29 = vmul.f32 1.442695, %v2246_v42  ;;  %v8623_v42 = vld [vmem:[%s9384_s3 + $0xf8] sm:$0xff] }
 0x36c   : > { %v8585_v31 = vpop.xlane.xlu0 %2086  ;;  %2191 = vmax.xlane.f32.xlu0 %v2190_v15 }
 0x36d   : > { %6875 = vpow2.f32 %v2327_v29 }
 0x36f   : > { %v5836_v62 = vpop.f32.mrb[40].mxu0 }
 0x370   : > { %v1806_v54 = vpop.f32.mrb[41].mxu0  ;;  %v8594_v7 = vpop.xlane.xlu0 %2095  ;;  %2458 = vadd.xlane.f32.xlu0 %v2457_v55 }
 0x371   : > { %v1933_v43 = vadd.f32 %v1869_v39, %v1806_v54  ;;  %v8618_v55 = vpop.eup %6873 }
 0x372   : > { %9534 = vst [vmem:[#allocation48_spill] sm:$0xff] %v8618_v55 }
 0x373   : > { %v8600_v15 = vadd.f32 %v8092_v50, %v1933_v43  ;;  %v8602_v60 = vpop.f32.mrb[42].mxu0 }
 0x374   : > { %v1816_v30 = vpop.f32.mrb[43].mxu0  ;;  %v8609_v8 = vpop.xlane.xlu0 %2092  ;;  %2188 = vmax.xlane.f32.xlu0 %v2187_v21 }
 0x375   : > { %v1935_v39 = vadd.f32 %v1871_v36, %v1816_v30  ;;  %v2205_v50 = vsel %vm2036_vm3, %v8600_v15, -inf  ;;  %v7101_v30 = vld [vmem:[%s7933_s10 + $0x20] sm:$0xff] }
 0x376   : > { %2206 = vmax.xlane.f32.xlu1 %v2205_v50  ;;  %v1932_v50 = vadd.f32 %v5817_v52, %v8623_v42 }
 0x377   : > { %v8614_v54 = vadd.f32 %v8122_v47, %v1935_v39  ;;  %v5842_v43 = vpop.f32.mrb[44].mxu0  ;;  %v8630_v39 = vadd.f32 %v7101_v30, %v1929_v17  ;;  %v1931_v30 = vadd.f32 %v1875_v22, %v8561_v44  ;;  %v8656_v44 = vpop.eup %6875 }
 0x378   : > { %v1826_v36 = vpop.f32.mrb[45].mxu0  ;;  %v8625_v21 = vpop.xlane.xlu0 %2101  ;;  %2197 = vmax.xlane.f32.xlu0 %v2196_v49 }
 0x379   : > { %9533 = vst [vmem:[#allocation47_spill] sm:$0xff] %v8614_v54  ;;  %v1937_v10 = vadd.f32 %v1873_v57, %v1826_v36  ;;  %v2211_v47 = vsel %vm2036_vm3, %v8614_v54, -inf  ;;  %v2463_v57 = vsel %vm2036_vm3, %v8618_v55, 0.0  ;;  %v7102_v54 = vld [vmem:[%s7933_s10 + $0x38] sm:$0xff] }
 0x37a   : > { %2212 = vmax.xlane.f32.xlu1 %v2211_v47 }
 0x37b   : > { %v8637_v29 = vadd.f32 %v8151_v9, %v1937_v10  ;;  %v5845_v33 = vpop.f32.mrb[46].mxu0  ;;  %v8646_v9 = vadd.f32 %v7102_v54, %v1932_v50 }
 0x37c   : > { %v1836_v49 = vpop.f32.mrb[47].mxu0  ;;  %v2099_v36 = vpop.xlane.xlu0 %2098  ;;  %2464 = vadd.xlane.f32.xlu0 %v2463_v57  ;;  %v2193_v57 = vsel %vm2036_vm3, %v8630_v39, -inf }
 0x37d   : > { %v1939_v47 = vadd.f32 %v1875_v22, %v1836_v49  ;;  %v2249_v17 = vsub.f32 %v8246_v24, %v2099_v36  ;;  %v2217_v52 = vsel %vm2036_vm3, %v8637_v29, -inf  ;;  %v7103_v22 = vld [vmem:[%s7933_s10 + $0x30] sm:$0xff] }
 0x37e   : > { %2218 = vmax.xlane.f32.xlu1 %v2217_v52  ;;  %v8659_v54 = vadd.f32 %v7103_v22, %v1931_v30  ;;  %v2245_v52 = vsub.f32 %v8200_v6, %v8585_v31 }
 0x37f   : > { %v8649_v10 = vadd.f32 %v8172_v11, %v1939_v47  ;;  %v2333_v55 = vmul.f32 1.442695, %v2249_v17  ;;  %v1934_v11 = vadd.f32 %v5836_v62, %v8534_v61  ;;  %v2202_v47 = vsel %vm2036_vm3, %v8646_v9, -inf }
 0x380   : > { %v2108_v49 = vpop.xlane.xlu0 %2107  ;;  %2194 = vmax.xlane.f32.xlu0 %v2193_v57  ;;  %v1936_v61 = vadd.f32 %v8602_v60, %v8558_v18  ;;  %v2199_v57 = vsel %vm2036_vm3, %v8659_v54, -inf  ;;  %v2247_v60 = vsub.f32 %v8224_v37, %v8609_v8  ;;  %v2250_v8 = vsub.f32 %v8232_v3, %v8625_v21  ;;  %v9535_v3 = vld [vmem:[#allocation22_spill] sm:$0xff] }
 0x381   : > { %6877 = vpow2.f32 %v2333_v55  ;;  %v2252_v24 = vsub.f32 %v8261_v35, %v2108_v49  ;;  %v2223_v36 = vsel %vm2036_vm3, %v8649_v10, -inf  ;;  %v2472_v55 = vsel %vm2036_vm3, %v8656_v44, 0.0 }
 0x382   : > { %2224 = vmax.xlane.f32.xlu1 %v2223_v36  ;;  %v8670_v30 = vadd.f32 %v8084_v12, %v1934_v11  ;;  %v2325_v49 = vmul.f32 1.442695, %v2245_v52  ;;  %v8681_v6 = vadd.f32 %v8109_v0, %v1936_v61  ;;  %v1938_v12 = vadd.f32 %v5842_v43, %v8583_v51 }
 0x383   : > { %v2339_v50 = vmul.f32 1.442695, %v2252_v24  ;;  %v2248_v24 = vsub.f32 %v8212_v56, %v8594_v7  ;;  %v1940_v51 = vadd.f32 %v5845_v33, %v8623_v42  ;;  %v2335_v52 = vmul.f32 1.442695, %v2250_v8 }
 0x384   : > { %v2105_v17 = vpop.xlane.xlu0 %2104  ;;  %2203 = vmax.xlane.f32.xlu0 %v2202_v47  ;;  %v2208_v18 = vsel %vm2036_vm3, %v8670_v30, -inf  ;;  %v8693_v0 = vadd.f32 %v8140_v16, %v1938_v12  ;;  %v2214_v43 = vsel %vm2036_vm3, %v8681_v6, -inf }
 0x385   : > { %6879 = vpow2.f32 %v2339_v50  ;;  %v2251_v35 = vsub.f32 %v8267_v41, %v2105_v17  ;;  %v2331_v56 = vmul.f32 1.442695, %v2248_v24  ;;  %v2329_v50 = vmul.f32 1.442695, %v2247_v60 }
 0x386   : > { %2473 = vadd.xlane.f32.xlu1 %v2472_v55  ;;  %v8706_v33 = vadd.f32 %v8163_v40, %v1940_v51  ;;  %v2220_v42 = vsel %vm2036_vm3, %v8693_v0, -inf }
 0x387   : > { %v2337_v62 = vmul.f32 1.442695, %v2251_v35 }
 0x388   : > { %2200 = vmax.xlane.f32.xlu0 %v2199_v57 }
 0x389   : > { %6881 = vpow2.f32 %v2337_v62  ;;  %v2114_v41 = vpop.xlane.xlu1 %2113 }
 0x38a   : > { %6883 = vpow2.f32 %v2325_v49  ;;  %v2254_v21 = vsub.f32 %v9535_v3, %v2114_v41  ;;  %v9536_v49 = vld [vmem:[#allocation24_spill] sm:$0xff]  ;;  %v9537_v41 = vld [vmem:[#allocation26_spill] sm:$0xff] }
 0x38b   : > { %v8678_v36 = vpop.eup %6877  ;;  %6885 = vpow2.f32 %v2331_v56 }
 0x38c   : > { %2209 = vmax.xlane.f32.xlu0 %v2208_v18  ;;  %v2481_v31 = vsel %vm2036_vm3, %v8678_v36, 0.0  ;;  %6887 = vpow2.f32 %v2329_v50  ;;  %v2343_v57 = vmul.f32 1.442695, %v2254_v21 }
 0x38d   : > { %v2111_v22 = vpop.xlane.xlu1 %2110  ;;  %2482 = vadd.xlane.f32.xlu1 %v2481_v31 }
 0x38e   : > { %v2253_v24 = vsub.f32 %v9536_v49, %v2111_v22 }
 0x38f   : > { %v8690_v7 = vpop.eup %6879 }
 0x390   : > { %2215 = vmax.xlane.f32.xlu0 %v2214_v43  ;;  %v2490_v11 = vsel %vm2036_vm3, %v8690_v7, 0.0  ;;  %v2341_v51 = vmul.f32 1.442695, %v2253_v24 }
 0x391   : > { %v2120_v37 = vpop.xlane.xlu1 %2119  ;;  %2491 = vadd.xlane.f32.xlu1 %v2490_v11 }
 0x392   : > { %v2256_v47 = vsub.f32 %v8292_v20, %v2120_v37  ;;  %v2226_v20 = vsel %vm2036_vm3, %v8706_v33, -inf }
 0x393   : > { %v8703_v16 = vpop.eup %6881 }
 0x394   : > { %v2347_v17 = vmul.f32 1.442695, %v2256_v47  ;;  %2221 = vmax.xlane.f32.xlu0 %v2220_v42  ;;  %v2487_v35 = vsel %vm2036_vm3, %v8703_v16, 0.0  ;;  %v8715_v40 = vpop.eup %6883 }
 0x395   : > { %v2117_v55 = vpop.xlane.xlu1 %2116  ;;  %2488 = vadd.xlane.f32.xlu1 %v2487_v35  ;;  %v2469_v12 = vsel %vm2036_vm3, %v8715_v40, 0.0  ;;  %v8722_v18 = vpop.eup %6885 }
 0x396   : > { %6889 = vpow2.f32 %v2347_v17  ;;  %v2255_v31 = vsub.f32 %v9537_v41, %v2117_v55  ;;  %v8725_v43 = vpop.eup %6887  ;;  %v2478_v11 = vsel %vm2036_vm3, %v8722_v18, 0.0  ;;  %v9538_v17 = vld [vmem:[#allocation28_spill] sm:$0xff] }
 0x397   : > { %6891 = vpow2.f32 %v2335_v52  ;;  %v2475_v3 = vsel %vm2036_vm3, %v8725_v43, 0.0 }
 0x398   : > { %2227 = vmax.xlane.f32.xlu0 %v2226_v20  ;;  %6893 = vpow2.f32 %v2343_v57  ;;  %v2345_v37 = vmul.f32 1.442695, %v2255_v31  ;;  %v9540_v31 = vld [vmem:[#allocation33_spill] sm:$0xff] }
 0x399   : > { %v2126_v61 = vpop.xlane.xlu1 %2125  ;;  %v8717_v62 = vpop.xlane.xlu0 %2137  ;;  %6895 = vpow2.f32 %v2341_v51 }
 0x39a   : > { %v2258_v35 = vsub.f32 %v9538_v17, %v2126_v61  ;;  %6897 = vpow2.f32 %v2345_v37  ;;  %v9541_v37 = vld [vmem:[#allocation32_spill] sm:$0xff] }
 0x39c   : > { %2470 = vadd.xlane.f32.xlu0 %v2469_v12  ;;  %v2351_v24 = vmul.f32 1.442695, %v2258_v35  ;;  %v9539_v12 = vld [vmem:[#allocation30_spill] sm:$0xff] }
 0x39d   : > { %v2123_v60 = vpop.xlane.xlu1 %2122  ;;  %v2135_v56 = vpop.xlane.xlu0 %2134 }
 0x39e   : > { %v2261_v22 = vsub.f32 %v8338_v63, %v2135_v56  ;;  %v2257_v41 = vsub.f32 %v9539_v12, %v2123_v60 }
 0x3a0   : > { %v8729_v50 = vpop.eup %6889  ;;  %2479 = vadd.xlane.f32.xlu0 %v2478_v11  ;;  %v2357_v63 = vmul.f32 1.442695, %v2261_v22  ;;  %v2349_v22 = vmul.f32 1.442695, %v2257_v41 }
 0x3a1   : > { %v2132_v8 = vpop.xlane.xlu1 %2131  ;;  %v2144_v47 = vpop.xlane.xlu0 %2143  ;;  %v2502_v42 = vsel %vm2036_vm3, %v8729_v50, 0.0 }
 0x3a2   : > { %v2260_v55 = vsub.f32 %v8355_v32, %v2132_v8  ;;  %2503 = vadd.xlane.f32.xlu1 %v2502_v42  ;;  %v2264_v52 = vsub.f32 %v8358_v48, %v2144_v47  ;;  %v8739_v21 = vpop.eup %6891 }
 0x3a3   : > { %v2484_v32 = vsel %vm2036_vm3, %v8739_v21, 0.0  ;;  %v8744_v48 = vpop.eup %6893 }
 0x3a4   : > { %v2355_v20 = vmul.f32 1.442695, %v2260_v55  ;;  %2476 = vadd.xlane.f32.xlu0 %v2475_v3  ;;  %v2363_v61 = vmul.f32 1.442695, %v2264_v52  ;;  %v2496_v60 = vsel %vm2036_vm3, %v8744_v48, 0.0  ;;  %v8750_v47 = vpop.eup %6895  ;;  %v9542_v55 = vld [vmem:[#allocation29_spill] sm:$0xff] }
 0x3a5   : > { %v2129_v57 = vpop.xlane.xlu1 %2128  ;;  %v2141_v49 = vpop.xlane.xlu0 %2140  ;;  %v2262_v52 = vsub.f32 %v9542_v55, %v8717_v62 }
 0x3a6   : > { %6899 = vpow2.f32 %v2355_v20  ;;  %v2263_v56 = vsub.f32 %v9540_v31, %v2141_v49  ;;  %v2259_v8 = vsub.f32 %v9541_v37, %v2129_v57  ;;  %v8755_v20 = vpop.eup %6897  ;;  %v2493_v57 = vsel %vm2036_vm3, %v8750_v47, 0.0  ;;  %v9544_v37 = vld [vmem:[#allocation36_spill] sm:$0xff] }
 0x3a7   : > { %6901 = vpow2.f32 %v2357_v63 }
 0x3a8   : > { %2485 = vadd.xlane.f32.xlu0 %v2484_v32  ;;  %6903 = vpow2.f32 %v2351_v24  ;;  %v2361_v42 = vmul.f32 1.442695, %v2263_v56  ;;  %v2353_v3 = vmul.f32 1.442695, %v2259_v8  ;;  %v2359_v32 = vmul.f32 1.442695, %v2262_v52 }
 0x3a9   : > { %v2423_v51 = vpop.xlane.xlu1 %2422  ;;  %v2150_v11 = vpop.xlane.xlu0 %2149  ;;  %6905 = vpow2.f32 %v2363_v61  ;;  %v2499_v56 = vsel %vm2036_vm3, %v8755_v20, 0.0 }
 0x3aa   : > { %6907 = vrcp.f32 %v2423_v51 }
 0x3ab   : > { %6909 = vpow2.f32 %v2349_v22 }
 0x3ac   : > { %2497 = vadd.xlane.f32.xlu0 %v2496_v60  ;;  %6911 = vpow2.f32 %v2361_v42 }
 0x3ad   : > { %v2162_v17 = vpop.xlane.xlu1 %2161  ;;  %v2147_v35 = vpop.xlane.xlu0 %2146  ;;  %6913 = vpow2.f32 %v2353_v3  ;;  %v9545_v3 = vld [vmem:[#allocation35_spill] sm:$0xff] }
 0x3ae   : > { %v2265_v63 = vsub.f32 %v8400_v27, %v2147_v35  ;;  %v9543_v27 = vld [vmem:[#allocation34_spill] sm:$0xff]  ;;  %v2270_v8 = vsub.f32 %v9544_v37, %v2162_v17 }
 0x3af   : > { %v2266_v31 = vsub.f32 %v9543_v27, %v2150_v11 }
 0x3b0   : > { %v8759_v49 = vpop.eup %6899  ;;  %v2365_v24 = vmul.f32 1.442695, %v2265_v63  ;;  %2494 = vadd.xlane.f32.xlu0 %v2493_v57 }
 0x3b1   : > { %v2429_v12 = vpop.xlane.xlu1 %2428  ;;  %v2426_v41 = vpop.xlane.xlu0 %2425  ;;  %v2514_v61 = vsel %vm2036_vm3, %v8759_v49, 0.0  ;;  %v2367_v55 = vmul.f32 1.442695, %v2266_v31 }
 0x3b2   : > { %v8763_v62 = vpop.eup %6901  ;;  %2515 = vadd.xlane.f32.xlu1 %v2514_v61  ;;  %6915 = vpow2.f32 %v2365_v24 }
 0x3b3   : > { %v8768_v51 = vpop.eup %6903  ;;  %6917 = vrcp.f32 %v2429_v12  ;;  %v2517_v35 = vsel %vm2036_vm3, %v8763_v62, 0.0  ;;  %v2375_v12 = vmul.f32 1.442695, %v2270_v8 }
 0x3b4   : > { %2500 = vadd.xlane.f32.xlu0 %v2499_v56  ;;  %v8770_v22 = vpop.eup %6905  ;;  %6919 = vrcp.f32 %v2426_v41  ;;  %v2508_v57 = vsel %vm2036_vm3, %v8768_v51, 0.0 }
 0x3b5   : > { %v2159_v60 = vpop.xlane.xlu1 %2158  ;;  %v2156_v42 = vpop.xlane.xlu0 %2155  ;;  %6921 = vpow2.f32 %v2359_v32  ;;  %v2526_v32 = vsel %vm2036_vm3, %v8770_v22, 0.0 }
 0x3b6   : > { %v6908_v11 = vpop.eup %6907  ;;  %v2268_v52 = vsub.f32 %v8435_v26, %v2156_v42  ;;  %2518 = vadd.xlane.f32.xlu1 %v2517_v35  ;;  %6923 = vpow2.f32 %v2367_v55  ;;  %v2269_v56 = vsub.f32 %v8438_v53, %v2159_v60 }
 0x3b7   : > { %v2677_v63 = vmul.f32 %v6908_v11, %v9545_v3  ;;  %v8779_v24 = vpop.eup %6909  ;;  %v9546_v3 = vld [vmem:[#allocation3_spill] sm:$0xff] }
 0x3b8   : > { %v2371_v17 = vmul.f32 1.442695, %v2268_v52  ;;  %2509 = vadd.xlane.f32.xlu0 %v2508_v57  ;;  %v8784_v27 = vpop.eup %6911  ;;  %v2505_v37 = vsel %vm2036_vm3, %v8779_v24, 0.0  ;;  %v6722_v53 = vunpack.i.h.bf16 %v9546_v3  ;;  %v6721_v60 = vunpack.i.l.bf16 %v9546_v3 }
 0x3b9   : > { %5862 = vmatprep.mubr.msk.f32.mxu1 %vm2036_vm3, %v2677_v63  ;;  %v2168_v41 = vpop.xlane.xlu1 %2167  ;;  %v2153_v61 = vpop.xlane.xlu0 %2152  ;;  %v2373_v57 = vmul.f32 1.442695, %v2269_v56 }
 0x3ba   : > { %v2272_v26 = vsub.f32 %v8450_v23, %v2168_v41  ;;  %v2267_v31 = vsub.f32 %v8447_v45, %v2153_v61  ;;  %2527 = vadd.xlane.f32.xlu1 %v2526_v32  ;;  %6925 = vpow2.f32 %v2371_v17  ;;  %v8791_v8 = vpop.eup %6913  ;;  %v2523_v45 = vsel %vm2036_vm3, %v8784_v27, 0.0  ;;  %v9547_v32 = vld [vmem:[#allocation2_spill] sm:$0xff] }
 0x3bb   : > { %6927 = vpow2.f32 %v2375_v12  ;;  %v2511_v12 = vsel %vm2036_vm3, %v8791_v8, 0.0 }
 0x3bc   : > { %v2379_v42 = vmul.f32 1.442695, %v2272_v26  ;;  %v2369_v35 = vmul.f32 1.442695, %v2267_v31  ;;  %2506 = vadd.xlane.f32.xlu0 %v2505_v37  ;;  %v8793_v11 = vpop.eup %6915  ;;  %v6732_v26 = vunpack.i.h.bf16 %v9547_v32  ;;  %v6731_v31 = vunpack.i.l.bf16 %v9547_v32 }
 0x3bd   : > { %v2435_v55 = vpop.xlane.xlu1 %2434  ;;  %v2432_v52 = vpop.xlane.xlu0 %2431  ;;  %v2529_v56 = vsel %vm2036_vm3, %v8793_v11, 0.0 }
 0x3be   : > { %v6918_v23 = vpop.eup %6917  ;;  %6929 = vpow2.f32 %v2379_v42  ;;  %2524 = vadd.xlane.f32.xlu1 %v2523_v45  ;;  %v6414_v3 = vpack.c.bf16 %v6732_v26, %v6731_v31 }
 0x3bf   : > { %v6920_v63 = vpop.eup %6919  ;;  %6931 = vpow2.f32 %v2369_v35  ;;  %v2679_v17 = vmul.f32 %v6918_v23, %v8415_v58  ;;  %v6410_v58 = vpack.c.bf16 %v6722_v53, %v6721_v60  ;;  %v9549_v60 = vld [vmem:[#allocation7_spill] sm:$0xff] }
 0x3c0   : > { %v8802_v41 = vpop.eup %6921  ;;  %v2678_v61 = vmul.f32 %v6920_v63, %v8428_v34  ;;  %6933 = vrcp.f32 %v2435_v55  ;;  %2512 = vadd.xlane.f32.xlu0 %v2511_v12  ;;  %v9548_v34 = vld [vmem:[#allocation12_spill] sm:$0xff]  ;;  %v6742_v63 = vunpack.i.h.bf16 %v9549_v60 }
 0x3c1   : > { %6935 = vrcp.f32 %v2432_v52  ;;  %v2165_v37 = vpop.xlane.xlu1 %2164  ;;  %v2438_v42 = vpop.xlane.xlu0 %2437  ;;  %v2520_v55 = vsel %vm2036_vm3, %v8802_v41, 0.0 }
 0x3c2   : > { %5863 = vmatmul.mubr.msk.f32.vlgmr.msra.gmra.mrb[32].mxu1 %vm2036_vm3, %v2678_v61  ;;  %v2271_v35 = vsub.f32 %v8469_v19, %v2165_v37  ;;  %6937 = vrcp.f32 %v2438_v42  ;;  %2530 = vadd.xlane.f32.xlu1 %v2529_v56  ;;  %v8815_v52 = vpop.eup %6923  ;;  %v9550_v42 = vld [vmem:[#allocation4_spill] sm:$0xff] }
 0x3c3   : > { %6939 = vpow2.f32 %v2373_v57  ;;  %6409 = vmatpush3.bf16.msra.mxu1 %v9548_v34  ;;  %5865 = vmatprep.mubr.msk.f32.mxu1 %vm2036_vm3, %v2679_v17  ;;  %v6741_v57 = vunpack.i.l.bf16 %v9549_v60  ;;  %v2532_v32 = vsel %vm2036_vm3, %v8815_v52, 0.0  ;;  %v6751_v56 = vunpack.i.l.bf16 %v9550_v42 }
 0x3c4   : > { %6411 = vmatprep.subr.bf16.mxu1 %v6410_v58  ;;  %v2377_v45 = vmul.f32 1.442695, %v2271_v35  ;;  %2521 = vadd.xlane.f32.xlu0 %v2520_v55  ;;  %v8817_v23 = vpop.eup %6925 }
 0x3c5   : > { %v2174_v53 = vpop.xlane.xlu1 %2173  ;;  %v2444_v19 = vpop.xlane.xlu0 %2443  ;;  %v2538_v17 = vsel %vm2036_vm3, %v8817_v23, 0.0 }
 0x3c6   : > { %v2274_v12 = vsub.f32 %v8478_v13, %v2174_v53  ;;  %v8824_v61 = vpop.eup %6927  ;;  %6941 = vpow2.f32 %v2377_v45  ;;  %2539 = vadd.xlane.f32.xlu1 %v2538_v17  ;;  %v6752_v13 = vunpack.i.h.bf16 %v9550_v42 }
 0x3c7   : > { %6413 = vmatpush3.bf16.msra.mxu1 %v6410_v58  ;;  %6943 = vrcp.f32 %v2444_v19  ;;  %v6418_v58 = vpack.c.bf16 %v6742_v63, %v6741_v57  ;;  %v2544_v17 = vsel %vm2036_vm3, %v8824_v61, 0.0 }
 0x3c8   : > { %v8828_v26 = vpop.eup %6929  ;;  %6415 = vmatprep.subr.bf16.mxu1 %v6414_v3  ;;  %v2383_v31 = vmul.f32 1.442695, %v2274_v12  ;;  %2533 = vadd.xlane.f32.xlu0 %v2532_v32  ;;  %v8844_v57 = vpack.c.bf16 %v6752_v13, %v6751_v56 }
 0x3c9   : > { %v8830_v37 = vpop.eup %6931  ;;  %v2171_v35 = vpop.xlane.xlu1 %2170 }
 0x3ca   : > { %v2441_v34 = vpop.xlane.xlu0 %2440  ;;  %v6934_v55 = vpop.eup %6933  ;;  %6945 = vpow2.f32 %v2383_v31  ;;  %v2273_v45 = vsub.f32 %v8489_v28, %v2171_v35  ;;  %v2535_v53 = vsel %vm2036_vm3, %v8830_v37, 0.0 }
 0x3cb   : > { %v6936_v60 = vpop.eup %6935  ;;  %6417 = vmatpush3.bf16.msra.mxu1 %v6414_v3  ;;  %6947 = vrcp.f32 %v2441_v34  ;;  %2536 = vadd.xlane.f32.xlu1 %v2535_v53  ;;  %v2681_v12 = vmul.f32 %v6934_v55, %v8463_v4  ;;  %v2550_v4 = vsel %vm2036_vm3, %v8828_v26, 0.0 }
 0x3cc   : > { %v6938_v19 = vpop.eup %6937  ;;  %6419 = vmatprep.subr.bf16.mxu1 %v6418_v58  ;;  %v2381_v32 = vmul.f32 1.442695, %v2273_v45  ;;  %v2680_v31 = vmul.f32 %v6936_v60, %v8456_v5  ;;  %2545 = vadd.xlane.f32.xlu0 %v2544_v17 }
 0x3cd   : > { %v8841_v63 = vpop.eup %6939  ;;  %v2450_v28 = vpop.xlane.xlu1 %2449  ;;  %v2682_v3 = vmul.f32 %v6938_v19, %v8474_v14 }
 0x3ce   : > { %5866 = vmatmul.mubr.msk.f32.gmra.mrb[34].mxu1 %vm2036_vm3, %v2680_v31  ;;  %6949 = vpow2.f32 %v2381_v32  ;;  %v2541_v5 = vsel %vm2036_vm3, %v8841_v63, 0.0 }
 0x3cf   : > { %6421 = vmatpush3.bf16.msra.mxu1 %v6418_v58  ;;  %5868 = vmatprep.mubr.msk.f32.mxu1 %vm2036_vm3, %v2681_v12  ;;  %6951 = vrcp.f32 %v2450_v28 }
 0x3d0   : > { %6439 = vmatprep.subr.bf16.mxu1 %v8844_v57  ;;  %2551 = vadd.xlane.f32.xlu1 %v2550_v4  ;;  %v8853_v42 = vpop.eup %6941 }
 0x3d1   : > { %2542 = vadd.xlane.f32.xlu0 %v2541_v5  ;;  %v2180_v13 = vpop.xlane.xlu1 %2179  ;;  %v6944_v56 = vpop.eup %6943  ;;  %v2547_v55 = vsel %vm2036_vm3, %v8853_v42, 0.0 }
 0x3d2   : > { %5869 = vmatmul.mubr.msk.f32.gmra.mrb[36].mxu1 %vm2036_vm3, %v2682_v3  ;;  %v2276_v14 = vsub.f32 %v8505_v25, %v2180_v13  ;;  %v2684_v60 = vmul.f32 %v6944_v56, %v8485_v1  ;;  %v9551_v3 = vld [vmem:[#allocation6_spill] sm:$0xff] }
 0x3d3   : > { %v6757_v4 = vunpack.i.h.bf16 %v9551_v3  ;;  %v6756_v5 = vunpack.i.l.bf16 %v9551_v3 }
 0x3d4   : > { %v8857_v35 = vpop.eup %6945  ;;  %v2387_v34 = vmul.f32 1.442695, %v2276_v14  ;;  %v9552_v14 = vld [vmem:[#allocation37_spill] sm:$0xff] }
 0x3d5   : > { %v6948_v58 = vpop.eup %6947  ;;  %2548 = vadd.xlane.f32.xlu0 %v2547_v55  ;;  %v2447_v45 = vpop.xlane.xlu1 %2446  ;;  %v2556_v25 = vsel %vm2036_vm3, %v8857_v35, 0.0 }
 0x3d6   : > { %6953 = vpow2.f32 %v2387_v34  ;;  %v2683_v53 = vmul.f32 %v6948_v58, %v8495_v38  ;;  %v9553_v34 = vld [vmem:[#allocation9_spill] sm:$0xff] }
 0x3d7   : > { %6955 = vrcp.f32 %v2447_v45  ;;  %v6767_v55 = vunpack.i.h.bf16 %v9553_v34  ;;  %v6766_v58 = vunpack.i.l.bf16 %v9553_v34  ;;  %v2456_v45 = vpop.xlane.xlu0 %2455 }
 0x3d8   : > { %5871 = vmatprep.mubr.msk.f32.mxu1 %vm2036_vm3, %v2683_v53  ;;  %v8866_v12 = vpop.eup %6949  ;;  %v6426_v53 = vpack.c.bf16 %v6757_v4, %v6756_v5  ;;  %v9557_v5 = vld [vmem:[#allocation11_spill] sm:$0xff] }
 0x3d9   : > { %5872 = vmatmul.mubr.msk.f32.gmra.mrb[38].mxu1 %vm2036_vm3, %v2684_v60  ;;  %2557 = vadd.xlane.f32.xlu0 %v2556_v25  ;;  %v2177_v17 = vpop.xlane.xlu1 %2176  ;;  %v2553_v38 = vsel %vm2036_vm3, %v8866_v12, 0.0  ;;  %v6952_v1 = vpop.eup %6951  ;;  %v9554_v60 = vld [vmem:[#allocation10_spill] sm:$0xff] }
 0x3da   : > { %v2275_v19 = vsub.f32 %v8521_v59, %v2177_v17  ;;  %v2686_v56 = vmul.f32 %v6952_v1, %v9552_v14  ;;  %v9555_v17 = vld [vmem:[#allocation27_spill] sm:$0xff] }
 0x3dc   : > { %v2385_v32 = vmul.f32 1.442695, %v2275_v19  ;;  %v6827_v19 = vunpack.i.h.bf16 %v9555_v17 }
 0x3dd   : > { %2554 = vadd.xlane.f32.xlu0 %v2553_v38 }
 0x3de   : > { %6957 = vpow2.f32 %v2385_v32  ;;  %v6430_v32 = vpack.c.bf16 %v6767_v55, %v6766_v58  ;;  %v9558_v58 = vld [vmem:[#allocation42_spill] sm:$0xff] }
 0x3df   : > { %6959 = vrcp.f32 %v2456_v45 }
 0x3e0   : > { %v8872_v31 = vpop.eup %6953 }
 0x3e1   : > { %v6956_v28 = vpop.eup %6955  ;;  %v2562_v13 = vsel %vm2036_vm3, %v8872_v31, 0.0 }
 0x3e2   : > { %2563 = vadd.xlane.f32.xlu1 %v2562_v13  ;;  %v2685_v59 = vmul.f32 %v6956_v28, %v8509_v2  ;;  %v6826_v2 = vunpack.i.l.bf16 %v9555_v17  ;;  %v9556_v28 = vld [vmem:[#allocation40_spill] sm:$0xff]  ;;  %v6782_v13 = vunpack.i.h.bf16 %v9557_v5 }
 0x3e4   : > { %5890 = vmatprep.mubr.msk.f32.mxu0 %vm2036_vm3, %v2685_v59  ;;  %v6781_v59 = vunpack.i.l.bf16 %v9557_v5  ;;  %v6434_v14 = vpack.c.bf16 %v6827_v19, %v6826_v2  ;;  %v9562_v5 = vld [vmem:[#allocation38_spill] sm:$0xff] }
 0x3e5   : > { %5891 = vmatmul.mubr.msk.f32.vlgmr.msra.gmra.mrb[48].mxu0 %vm2036_vm3, %v2686_v56 }
 0x3e6   : > { %6425 = vmatpush3.bf16.msra.mxu0 %v9554_v60  ;;  %v8894_v34 = vpack.c.bf16 %v6782_v13, %v6781_v59 }
 0x3e7   : > { %6427 = vmatprep.subr.bf16.mxu0 %v6426_v53 }
 0x3e8   : > { %v8885_v25 = vpop.eup %6957 }
 0x3e9   : > { %v2186_v38 = vpop.xlane.xlu0 %2185  ;;  %v2559_v1 = vsel %vm2036_vm3, %v8885_v25, 0.0 }
 0x3ea   : > { %6429 = vmatpush3.bf16.msra.mxu0 %v6426_v53  ;;  %v2278_v3 = vsub.f32 %v9556_v28, %v2186_v38  ;;  %2560 = vadd.xlane.f32.xlu0 %v2559_v1  ;;  %v6960_v38 = vpop.eup %6959 }
 0x3eb   : > { %6431 = vmatprep.subr.bf16.mxu0 %v6430_v32  ;;  %v2688_v13 = vmul.f32 %v6960_v38, %v9562_v5 }
 0x3ec   : > { %v2391_v4 = vmul.f32 1.442695, %v2278_v3  ;;  %v9561_v3 = vld [vmem:[#allocation41_spill] sm:$0xff] }
 0x3ed   : > { %v2453_v56 = vpop.xlane.xlu0 %2452 }
 0x3ee   : > { %6961 = vpow2.f32 %v2391_v4  ;;  %6433 = vmatpush3.bf16.msra.mxu0 %v6430_v32  ;;  %v9560_v32 = vld [vmem:[#allocation44_spill] sm:$0xff] }
 0x3ef   : > { %6435 = vmatprep.subr.bf16.mxu0 %v6434_v14  ;;  %6963 = vrcp.f32 %v2453_v56  ;;  %v2468_v56 = vpop.xlane.xlu1 %2467 }
 0x3f1   : > { %v2183_v55 = vpop.xlane.xlu0 %2182 }
 0x3f2   : > { %6437 = vmatpush3.bf16.msra.mxu0 %v6434_v14  ;;  %v2277_v53 = vsub.f32 %v9558_v58, %v2183_v55 }
 0x3f3   : > { %6455 = vmatprep.subr.bf16.mxu0 %v8894_v34 }
 0x3f4   : > { %v2389_v60 = vmul.f32 1.442695, %v2277_v53 }
 0x3f5   : > { %v2462_v17 = vpop.xlane.xlu0 %2461 }
 0x3f6   : > { %6965 = vpow2.f32 %v2389_v60 }
 0x3f7   : > { %6967 = vrcp.f32 %v2462_v17 }
 0x3f8   : > { %v8898_v1 = vpop.eup %6961 }
 0x3f9   : > { %9559 = vst [vmem:[#allocation22_spill] sm:$0xff] %v8898_v1  ;;  %v6964_v45 = vpop.eup %6963  ;;  %v2192_v19 = vpop.xlane.xlu0 %2191  ;;  %v2568_v2 = vsel %vm2036_vm3, %v8898_v1, 0.0 }
 0x3fa   : > { %v2280_v28 = vsub.f32 %v9560_v32, %v2192_v19  ;;  %2569 = vadd.xlane.f32.xlu0 %v2568_v2  ;;  %v2687_v4 = vmul.f32 %v6964_v45, %v9561_v3  ;;  %v9563_v2 = vld [vmem:[#allocation46_spill] sm:$0xff] }
 0x3fc   : > { %v2395_v59 = vmul.f32 1.442695, %v2280_v28  ;;  %5893 = vmatprep.mubr.msk.f32.mxu0 %vm2036_vm3, %v2687_v4 }
 0x3fd   : > { %5894 = vmatmul.mubr.msk.f32.gmra.mrb[50].mxu0 %vm2036_vm3, %v2688_v13  ;;  %v2459_v14 = vpop.xlane.xlu0 %2458 }
 0x3fe   : > { %6969 = vpow2.f32 %v2395_v59  ;;  %v9564_v59 = vld [vmem:[#allocation47_spill] sm:$0xff] }
 0x3ff   : > { %6971 = vrcp.f32 %v2459_v14 }
 0x400   : > { %v8907_v55 = vpop.eup %6965 }
 0x401   : > { %v2189_v58 = vpop.xlane.xlu0 %2188  ;;  %v2565_v53 = vsel %vm2036_vm3, %v8907_v55, 0.0  ;;  %v6968_v28 = vpop.eup %6967 }
 0x402   : > { %v2279_v60 = vsub.f32 %v8588_v46, %v2189_v58  ;;  %2566 = vadd.xlane.f32.xlu1 %v2565_v53 }
 0x403   : > { %v2207_v38 = vpop.xlane.xlu1 %2206 }
 0x404   : > { %v2393_v45 = vmul.f32 1.442695, %v2279_v60  ;;  %v2285_v19 = vsub.f32 %v8600_v15, %v2207_v38  ;;  %v9565_v15 = vld [vmem:[#allocation45_spill] sm:$0xff]  ;;  %v9566_v38 = vld [vmem:[#allocation43_spill] sm:$0xff] }
 0x405   : > { %v2198_v17 = vpop.xlane.xlu0 %2197 }
 0x406   : > { %6973 = vpow2.f32 %v2393_v45  ;;  %v2282_v32 = vsub.f32 %v9563_v2, %v2198_v17  ;;  %v2405_v5 = vmul.f32 1.442695, %v2285_v19  ;;  %v2690_v45 = vmul.f32 %v6968_v28, %v9566_v38 }
 0x407   : > { %v2213_v3 = vpop.xlane.xlu1 %2212  ;;  %6975 = vrcp.f32 %v2468_v56 }
 0x408   : > { %v8914_v4 = vpop.eup %6969  ;;  %v2399_v13 = vmul.f32 1.442695, %v2282_v32  ;;  %v2287_v14 = vsub.f32 %v9564_v59, %v2213_v3 }
 0x409   : > { %v6972_v1 = vpop.eup %6971  ;;  %v2465_v46 = vpop.xlane.xlu0 %2464  ;;  %v2574_v58 = vsel %vm2036_vm3, %v8914_v4, 0.0 }
 0x40a   : > { %6977 = vpow2.f32 %v2399_v13  ;;  %2575 = vadd.xlane.f32.xlu1 %v2574_v58  ;;  %v2689_v53 = vmul.f32 %v6972_v1, %v9565_v15  ;;  %v2409_v17 = vmul.f32 1.442695, %v2287_v14 }
 0x40b   : > { %6979 = vrcp.f32 %v2465_v46  ;;  %v2219_v60 = vpop.xlane.xlu1 %2218 }
 0x40c   : > { %6981 = vpow2.f32 %v2405_v5  ;;  %v2289_v19 = vsub.f32 %v8637_v29, %v2219_v60  ;;  %5896 = vmatprep.mubr.msk.f32.mxu0 %vm2036_vm3, %v2689_v53 }
 0x40d   : > { %5897 = vmatmul.mubr.msk.f32.gmra.mrb[52].mxu0 %vm2036_vm3, %v2690_v45  ;;  %v2195_v56 = vpop.xlane.xlu0 %2194  ;;  %6983 = vpow2.f32 %v2409_v17  ;;  %v9567_v45 = vld [vmem:[#allocation48_spill] sm:$0xff]  ;;  %v9568_v17 = vld [vmem:[#allocation39_spill] sm:$0xff] }
 0x40e   : > { %v2281_v2 = vsub.f32 %v8630_v39, %v2195_v56  ;;  %v2413_v1 = vmul.f32 1.442695, %v2289_v19 }
 0x40f   : > { %v2225_v32 = vpop.xlane.xlu1 %2224 }
 0x410   : > { %v8925_v3 = vpop.eup %6973  ;;  %v2397_v13 = vmul.f32 1.442695, %v2281_v2  ;;  %v2291_v59 = vsub.f32 %v8649_v10, %v2225_v32 }
 0x411   : > { %v2204_v28 = vpop.xlane.xlu0 %2203  ;;  %v2571_v5 = vsel %vm2036_vm3, %v8925_v3, 0.0  ;;  %v6976_v14 = vpop.eup %6975 }
 0x412   : > { %6985 = vpow2.f32 %v2397_v13  ;;  %v2284_v29 = vsub.f32 %v8646_v9, %v2204_v28  ;;  %2572 = vadd.xlane.f32.xlu1 %v2571_v5  ;;  %v2417_v39 = vmul.f32 1.442695, %v2291_v59  ;;  %v2692_v19 = vmul.f32 %v6976_v14, %v9568_v17 }
 0x413   : > { %6987 = vpow2.f32 %v2413_v1 }
 0x414   : > { %v8931_v46 = vpop.eup %6977  ;;  %v2403_v58 = vmul.f32 1.442695, %v2284_v29 }
 0x415   : > { %v6980_v15 = vpop.eup %6979  ;;  %v2201_v53 = vpop.xlane.xlu0 %2200  ;;  %v2580_v60 = vsel %vm2036_vm3, %v8931_v46, 0.0 }
 0x416   : > { %v8935_v10 = vpop.eup %6981  ;;  %6989 = vpow2.f32 %v2403_v58  ;;  %v2283_v38 = vsub.f32 %v8659_v54, %v2201_v53  ;;  %2581 = vadd.xlane.f32.xlu0 %v2580_v60  ;;  %v2691_v9 = vmul.f32 %v6980_v15, %v9567_v45  ;;  %v2474_v45 = vpop.xlane.xlu1 %2473 }
 0x417   : > { %6991 = vpow2.f32 %v2417_v39  ;;  %v2589_v32 = vsel %vm2036_vm3, %v8935_v10, 0.0  ;;  %v8944_v1 = vpop.eup %6983 }
 0x418   : > { %v2401_v56 = vmul.f32 1.442695, %v2283_v38  ;;  %5899 = vmatprep.mubr.msk.f32.mxu0 %vm2036_vm3, %v2691_v9  ;;  %v2595_v29 = vsel %vm2036_vm3, %v8944_v1, 0.0 }
 0x419   : > { %5900 = vmatmul.mubr.msk.f32.gmra.mrb[54].mxu0 %vm2036_vm3, %v2692_v19  ;;  %v2210_v2 = vpop.xlane.xlu0 %2209 }
 0x41a   : > { %6993 = vpow2.f32 %v2401_v56  ;;  %v2286_v54 = vsub.f32 %v8670_v30, %v2210_v2  ;;  %2590 = vadd.xlane.f32.xlu0 %v2589_v32  ;;  %v2483_v32 = vpop.xlane.xlu1 %2482 }
 0x41c   : > { %v8947_v13 = vpop.eup %6985  ;;  %v2407_v59 = vmul.f32 1.442695, %v2286_v54 }
 0x41d   : > { %v2216_v28 = vpop.xlane.xlu0 %2215  ;;  %v2577_v5 = vsel %vm2036_vm3, %v8947_v13, 0.0  ;;  %v8953_v14 = vpop.eup %6987 }
 0x41e   : > { %6995 = vpow2.f32 %v2407_v59  ;;  %v2288_v39 = vsub.f32 %v8681_v6, %v2216_v28  ;;  %2578 = vadd.xlane.f32.xlu1 %v2577_v5  ;;  %2596 = vadd.xlane.f32.xlu0 %v2595_v29  ;;  %v2601_v60 = vsel %vm2036_vm3, %v8953_v14, 0.0 }
 0x420   : > { %v8956_v58 = vpop.eup %6989  ;;  %v2411_v30 = vmul.f32 1.442695, %v2288_v39  ;;  %v2492_v39 = vpop.xlane.xlu1 %2491 }
 0x421   : > { %v2222_v15 = vpop.xlane.xlu0 %2221  ;;  %v2586_v53 = vsel %vm2036_vm3, %v8956_v58, 0.0  ;;  %v8962_v38 = vpop.eup %6991 }
 0x422   : > { %6997 = vpow2.f32 %v2411_v30  ;;  %v2290_v9 = vsub.f32 %v8693_v0, %v2222_v15  ;;  %2587 = vadd.xlane.f32.xlu1 %v2586_v53  ;;  %2602 = vadd.xlane.f32.xlu0 %v2601_v60  ;;  %v2607_v56 = vsel %vm2036_vm3, %v8962_v38, 0.0 }
 0x424   : > { %v8965_v6 = vpop.eup %6993  ;;  %v2415_v17 = vmul.f32 1.442695, %v2290_v9 }
 0x425   : > { %v2228_v19 = vpop.xlane.xlu0 %2227  ;;  %v2583_v2 = vsel %vm2036_vm3, %v8965_v6, 0.0 }
 0x426   : > { %6999 = vpow2.f32 %v2415_v17  ;;  %v2292_v54 = vsub.f32 %v8706_v33, %v2228_v19  ;;  %2608 = vadd.xlane.f32.xlu0 %v2607_v56  ;;  %2584 = vadd.xlane.f32.xlu1 %v2583_v2  ;;  %v9570_v56 = vld [vmem:[#allocation8_spill] sm:$0xff] }
 0x427   : > { %7001 = vrcp.f32 %v2474_v45  ;;  %v2489_v45 = vpop.xlane.xlu1 %2488  ;;  %v6762_v2 = vunpack.i.h.bf16 %v9570_v56 }
 0x428   : > { %v8972_v59 = vpop.eup %6995  ;;  %v2419_v0 = vmul.f32 1.442695, %v2292_v54  ;;  %v6761_v54 = vunpack.i.l.bf16 %v9570_v56 }
 0x429   : > { %v2471_v28 = vpop.xlane.xlu0 %2470  ;;  %v2592_v5 = vsel %vm2036_vm3, %v8972_v59, 0.0 }
 0x42a   : > { %7003 = vpow2.f32 %v2419_v0  ;;  %2593 = vadd.xlane.f32.xlu1 %v2592_v5 }
 0x42b   : > { %7005 = vrcp.f32 %v2471_v28 }
 0x42c   : > { %v8976_v29 = vpop.eup %6997  ;;  %7007 = vrcp.f32 %v2483_v32 }
 0x42d   : > { %v2480_v30 = vpop.xlane.xlu0 %2479  ;;  %v2598_v33 = vsel %vm2036_vm3, %v8976_v29, 0.0 }
 0x42e   : > { %2599 = vadd.xlane.f32.xlu1 %v2598_v33  ;;  %7009 = vrcp.f32 %v2480_v30  ;;  %v9571_v30 = vld [vmem:[#allocation5_spill] sm:$0xff] }
 0x42f   : > { %v6772_v33 = vunpack.i.h.bf16 %v9571_v30 }
 0x430   : > { %v8980_v15 = vpop.eup %6999 }
 0x431   : > { %9569 = vst [vmem:[#allocation24_spill] sm:$0xff] %v8980_v15  ;;  %v2477_v53 = vpop.xlane.xlu0 %2476  ;;  %v2604_v60 = vsel %vm2036_vm3, %v8980_v15, 0.0  ;;  %v7002_v9 = vpop.eup %7001 }
 0x432   : > { %7011 = vrcp.f32 %v2477_v53  ;;  %2605 = vadd.xlane.f32.xlu1 %v2604_v60  ;;  %v2694_v5 = vmul.f32 %v7002_v9, %v8656_v44  ;;  %v6771_v53 = vunpack.i.l.bf16 %v9571_v30  ;;  %v6442_v60 = vpack.c.bf16 %v6762_v2, %v6761_v54  ;;  %v9572_v44 = vld [vmem:[#allocation17_spill] sm:$0xff] }
 0x433   : > { %7013 = vrcp.f32 %v2489_v45 }
 0x434   : > { %v8984_v17 = vpop.eup %7003  ;;  %v6446_v9 = vpack.c.bf16 %v6772_v33, %v6771_v53  ;;  %v9574_v53 = vld [vmem:[#allocation14_spill] sm:$0xff] }
 0x435   : > { %v7006_v19 = vpop.eup %7005  ;;  %v2486_v0 = vpop.xlane.xlu0 %2485  ;;  %v2610_v32 = vsel %vm2036_vm3, %v8984_v17, 0.0  ;;  %v6787_v15 = vunpack.i.h.bf16 %v9574_v53 }
 0x436   : > { %7015 = vrcp.f32 %v2486_v0  ;;  %2611 = vadd.xlane.f32.xlu1 %v2610_v32  ;;  %v2693_v28 = vmul.f32 %v7006_v19, %v8715_v40  ;;  %v7008_v56 = vpop.eup %7007  ;;  %v2504_v32 = vpop.xlane.xlu1 %2503  ;;  %v9573_v19 = vld [vmem:[#allocation13_spill] sm:$0xff] }
 0x437   : > { %7017 = vrcp.f32 %v2492_v39  ;;  %v6777_v30 = vunpack.i.h.bf16 %v9573_v19 }
 0x438   : > { %5918 = vmatprep.mubr.msk.f32.mxu1 %vm2036_vm3, %v2693_v28  ;;  %v7010_v0 = vpop.eup %7009  ;;  %v6776_v28 = vunpack.i.l.bf16 %v9573_v19 }
 0x439   : > { %5919 = vmatmul.mubr.msk.f32.vlgmr.msra.gmra.mrb[40].mxu1 %vm2036_vm3, %v2694_v5  ;;  %v2498_v45 = vpop.xlane.xlu0 %2497 }
 0x43a   : > { %6441 = vmatpush3.bf16.msra.mxu1 %v8844_v57  ;;  %7019 = vrcp.f32 %v2498_v45  ;;  %v2696_v57 = vmul.f32 %v7010_v0, %v8722_v18  ;;  %v6786_v45 = vunpack.i.l.bf16 %v9574_v53  ;;  %v9577_v53 = vld [vmem:[#allocation16_spill] sm:$0xff] }
 0x43b   : > { %6443 = vmatprep.subr.bf16.mxu1 %v6442_v60 }
 0x43c   : > { %v7012_v40 = vpop.eup %7011  ;;  %6834 = vrot.lane.b32.xlu0 %v9572_v44, %s7116_s23  ;;  %v2697_v44 = vmul.f32 %v7008_v56, %v8678_v36  ;;  %v9013_v56 = vpack.c.bf16 %v6787_v15, %v6786_v45  ;;  %v6802_v45 = vunpack.i.h.bf16 %v9577_v53 }
 0x43d   : > { %v2495_v39 = vpop.xlane.xlu0 %2494  ;;  %v2695_v2 = vmul.f32 %v7012_v40, %v8725_v43  ;;  %v7014_v54 = vpop.eup %7013  ;;  %v6450_v43 = vpack.c.bf16 %v6777_v30, %v6776_v28 }
 0x43e   : > { %6445 = vmatpush3.bf16.msra.mxu1 %v6442_v60  ;;  %7021 = vrcp.f32 %v2495_v39  ;;  %v2699_v36 = vmul.f32 %v7014_v54, %v8703_v16  ;;  %v9576_v16 = vld [vmem:[#allocation15_spill] sm:$0xff] }
 0x43f   : > { %6447 = vmatprep.subr.bf16.mxu1 %v6446_v9  ;;  %v2516_v5 = vpop.xlane.xlu1 %2515  ;;  %5921 = vmatprep.mubr.msk.f32.mxu1 %vm2036_vm3, %v2695_v2  ;;  %7023 = vrcp.f32 %v2504_v32  ;;  %v6792_v39 = vunpack.i.h.bf16 %v9576_v16  ;;  %v6791_v2 = vunpack.i.l.bf16 %v9576_v16 }
 0x440   : > { %v7016_v33 = vpop.eup %7015  ;;  %5922 = vmatmul.mubr.msk.f32.gmra.mrb[42].mxu1 %vm2036_vm3, %v2696_v57 }
 0x441   : > { %5924 = vmatprep.mubr.msk.f32.mxu1 %vm2036_vm3, %v2697_v44  ;;  %v2501_v60 = vpop.xlane.xlu0 %2500  ;;  %v2698_v18 = vmul.f32 %v7016_v33, %v8739_v21  ;;  %v7018_v0 = vpop.eup %7017 }
 0x442   : > { %6449 = vmatpush3.bf16.msra.mxu1 %v6446_v9  ;;  %7025 = vrcp.f32 %v2501_v60  ;;  %v2700_v19 = vmul.f32 %v7018_v0, %v8690_v7  ;;  %v9575_v9 = vld [vmem:[#allocation19_spill] sm:$0xff]  ;;  %v6458_v60 = vpack.c.bf16 %v6792_v39, %v6791_v2 }
 0x443   : > { %6451 = vmatprep.subr.bf16.mxu1 %v6450_v43  ;;  %v2519_v40 = vpop.xlane.xlu1 %2518 }
 0x444   : > { %7027 = vrcp.f32 %v2519_v40  ;;  %5925 = vmatmul.mubr.msk.f32.gmra.mrb[44].mxu1 %vm2036_vm3, %v2698_v18  ;;  %v7020_v30 = vpop.eup %7019 }
 0x445   : > { %5927 = vmatprep.mubr.msk.f32.mxu1 %vm2036_vm3, %v2699_v36  ;;  %v2510_v32 = vpop.xlane.xlu0 %2509  ;;  %v2702_v7 = vmul.f32 %v7020_v30, %v8744_v48 }
 0x446   : > { %6453 = vmatpush3.bf16.msra.mxu1 %v6450_v43  ;;  %7029 = vrcp.f32 %v2510_v32  ;;  %v6801_v43 = vunpack.i.l.bf16 %v9577_v53  ;;  %v9578_v32 = vld [vmem:[#allocation31_spill] sm:$0xff] }
 0x447   : > { %6471 = vmatprep.subr.bf16.mxu1 %v9013_v56  ;;  %v2528_v21 = vpop.xlane.xlu1 %2527  ;;  %6839 = vrot.lane.b32.xlu1 %v9575_v9, %s7116_s23  ;;  %v6831_v30 = vunpack.i.l.bf16 %v9578_v32  ;;  %v9579_v9 = vld [vmem:[#allocation23_spill] sm:$0xff] }
 0x448   : > { %v7022_v28 = vpop.eup %7021  ;;  %5928 = vmatmul.mubr.msk.f32.gmra.mrb[46].mxu1 %vm2036_vm3, %v2700_v19  ;;  %v6832_v19 = vunpack.i.h.bf16 %v9578_v32 }
 0x449   : > { %v2507_v15 = vpop.xlane.xlu0 %2506  ;;  %v2701_v57 = vmul.f32 %v7022_v28, %v8750_v47  ;;  %v7024_v54 = vpop.eup %7023  ;;  %v6817_v28 = vunpack.i.h.bf16 %v9579_v9 }
 0x44a   : > { %7031 = vrcp.f32 %v2507_v15  ;;  %v2704_v0 = vmul.f32 %v7024_v54, %v8729_v50  ;;  %v6466_v39 = vpack.c.bf16 %v6832_v19, %v6831_v30 }
 0x44b   : > { %v2525_v44 = vpop.xlane.xlu1 %2524  ;;  %5946 = vmatprep.mubr.msk.f32.mxu0 %vm2036_vm3, %v2701_v57  ;;  %7033 = vrcp.f32 %v2516_v5 }
 0x44c   : > { %v7026_v33 = vpop.eup %7025  ;;  %5947 = vmatmul.mubr.msk.f32.vlgmr.msra.gmra.mrb[56].mxu0 %vm2036_vm3, %v2702_v7 }
 0x44d   : > { %6457 = vmatpush3.bf16.msra.mxu0 %v8894_v34  ;;  %v2513_v18 = vpop.xlane.xlu0 %2512  ;;  %v2703_v47 = vmul.f32 %v7026_v33, %v8755_v20  ;;  %v6462_v34 = vpack.c.bf16 %v6802_v45, %v6801_v43  ;;  %v9580_v45 = vld [vmem:[#allocation18_spill] sm:$0xff] }
 0x44e   : > { %v7028_v48 = vpop.eup %7027  ;;  %6459 = vmatprep.subr.bf16.mxu0 %v6458_v60  ;;  %7035 = vrcp.f32 %v2513_v18  ;;  %v6797_v43 = vunpack.i.h.bf16 %v9580_v45 }
 0x44f   : > { %v2531_v40 = vpop.xlane.xlu1 %2530  ;;  %5949 = vmatprep.mubr.msk.f32.mxu0 %vm2036_vm3, %v2703_v47  ;;  %v2709_v36 = vmul.f32 %v7028_v48, %v8763_v62  ;;  %7037 = vrcp.f32 %v2525_v44  ;;  %v6816_v62 = vunpack.i.l.bf16 %v9579_v9 }
 0x450   : > { %5950 = vmatmul.mubr.msk.f32.gmra.mrb[58].mxu0 %vm2036_vm3, %v2704_v0  ;;  %v7030_v50 = vpop.eup %7029 }
 0x451   : > { %6461 = vmatpush3.bf16.msra.mxu0 %v6458_v60  ;;  %5974 = vmatprep.mubr.msk.f32.mxu1 %vm2036_vm3, %v2709_v36  ;;  %v2522_v20 = vpop.xlane.xlu0 %2521  ;;  %v2706_v57 = vmul.f32 %v7030_v50, %v8768_v51  ;;  %v9042_v44 = vpack.c.bf16 %v6817_v28, %v6816_v62  ;;  %v6796_v60 = vunpack.i.l.bf16 %v9580_v45 }
 0x452   : > { %6463 = vmatprep.subr.bf16.mxu0 %v6462_v34  ;;  %7039 = vrcp.f32 %v2522_v20 }
 0x453   : > { %7041 = vrcp.f32 %v2528_v21  ;;  %v2540_v16 = vpop.xlane.xlu1 %2539  ;;  %v6474_v30 = vpack.c.bf16 %v6797_v43, %v6796_v60 }
 0x454   : > { %v7032_v5 = vpop.eup %7031  ;;  %7043 = vrcp.f32 %v2531_v40 }
 0x455   : > { %6465 = vmatpush3.bf16.msra.mxu0 %v6462_v34  ;;  %v2534_v2 = vpop.xlane.xlu0 %2533  ;;  %v2705_v15 = vmul.f32 %v7032_v5, %v8779_v24  ;;  %v7034_v7 = vpop.eup %7033  ;;  %v9582_v5 = vld [vmem:[#allocation21_spill] sm:$0xff] }
 0x456   : > { %6467 = vmatprep.subr.bf16.mxu0 %v6466_v39  ;;  %7045 = vrcp.f32 %v2534_v2  ;;  %v2708_v24 = vmul.f32 %v7034_v7, %v8759_v49  ;;  %v9581_v49 = vld [vmem:[#allocation20_spill] sm:$0xff]  ;;  %v6812_v9 = vunpack.i.h.bf16 %v9582_v5  ;;  %v6811_v28 = vunpack.i.l.bf16 %v9582_v5 }
 0x457   : > { %5952 = vmatprep.mubr.msk.f32.mxu0 %vm2036_vm3, %v2705_v15  ;;  %v6807_v36 = vunpack.i.h.bf16 %v9581_v49  ;;  %v6806_v32 = vunpack.i.l.bf16 %v9581_v49 }
 0x458   : > { %v7036_v54 = vpop.eup %7035  ;;  %v2537_v33 = vpop.xlane.xlu1 %2536  ;;  %5953 = vmatmul.mubr.msk.f32.gmra.mrb[60].mxu0 %vm2036_vm3, %v2706_v57  ;;  %v9583_v57 = vld [vmem:[#allocation25_spill] sm:$0xff] }
 0x459   : > { %7047 = vrcp.f32 %v2537_v33  ;;  %6469 = vmatpush3.bf16.msra.mxu0 %v6466_v39  ;;  %v2546_v21 = vpop.xlane.xlu0 %2545  ;;  %v2707_v53 = vmul.f32 %v7036_v54, %v8791_v8  ;;  %v7038_v51 = vpop.eup %7037  ;;  %v6478_v62 = vpack.c.bf16 %v6807_v36, %v6806_v32  ;;  %v6822_v7 = vunpack.i.h.bf16 %v9583_v57 }
 0x45a   : > { %6487 = vmatprep.subr.bf16.mxu0 %v9042_v44  ;;  %7049 = vrcp.f32 %v2540_v16  ;;  %v2711_v0 = vmul.f32 %v7038_v51, %v8784_v27  ;;  %v6821_v54 = vunpack.i.l.bf16 %v9583_v57 }
 0x45b   : > { %5955 = vmatprep.mubr.msk.f32.mxu0 %vm2036_vm3, %v2707_v53  ;;  %7051 = vrcp.f32 %v2546_v21 }
 0x45c   : > { %v7040_v18 = vpop.eup %7039  ;;  %5956 = vmatmul.mubr.msk.f32.gmra.mrb[62].mxu0 %vm2036_vm3, %v2708_v24  ;;  %v6490_v51 = vpack.c.bf16 %v6822_v7, %v6821_v54 }
 0x45d   : > { %v2710_v47 = vmul.f32 %v7040_v18, %v8802_v41  ;;  %v7042_v48 = vpop.eup %7041  ;;  %v2552_v19 = vpop.xlane.xlu1 %2551 }
 0x45e   : > { %v2543_v8 = vpop.xlane.xlu0 %2542  ;;  %v7044_v40 = vpop.eup %7043  ;;  %v2712_v41 = vmul.f32 %v7042_v48, %v8770_v22 }
 0x45f   : > { %7053 = vrcp.f32 %v2543_v8  ;;  %5975 = vmatmul.mubr.msk.f32.vlgmr.msra.gmra.mrb[48].mxu1 %vm2036_vm3, %v2710_v47  ;;  %v2713_v20 = vmul.f32 %v7044_v40, %v8793_v11  ;;  %v6482_v11 = vpack.c.bf16 %v6812_v9, %v6811_v28 }
 0x460   : > { %6473 = vmatpush3.bf16.msra.mxu1 %v9013_v56  ;;  %5977 = vmatprep.mubr.msk.f32.mxu1 %vm2036_vm3, %v2711_v0  ;;  %v7046_v34 = vpop.eup %7045  ;;  %7055 = vrcp.f32 %v2552_v19 }
 0x461   : > { %6475 = vmatprep.subr.bf16.mxu1 %v6474_v30  ;;  %v2714_v22 = vmul.f32 %v7046_v34, %v8815_v52 }
 0x462   : > { %v2549_v27 = vpop.xlane.xlu0 %2548 }
 0x463   : > { %v7048_v50 = vpop.eup %7047  ;;  %7057 = vrcp.f32 %v2549_v27  ;;  %5978 = vmatmul.mubr.msk.f32.gmra.mrb[50].mxu1 %vm2036_vm3, %v2712_v41 }
 0x464   : > { %6477 = vmatpush3.bf16.msra.mxu1 %v6474_v30  ;;  %5980 = vmatprep.mubr.msk.f32.mxu1 %vm2036_vm3, %v2713_v20  ;;  %v7050_v56 = vpop.eup %7049  ;;  %v2715_v39 = vmul.f32 %v7048_v50, %v8830_v37 }
 0x465   : > { %6479 = vmatprep.subr.bf16.mxu1 %v6478_v62  ;;  %v7052_v2 = vpop.eup %7051  ;;  %v2716_v33 = vmul.f32 %v7050_v56, %v8817_v23 }
 0x466   : > { %v2558_v16 = vpop.xlane.xlu0 %2557  ;;  %v2718_v37 = vmul.f32 %v7052_v2, %v8824_v61 }
 0x467   : > { %5981 = vmatmul.mubr.msk.f32.gmra.mrb[52].mxu1 %vm2036_vm3, %v2714_v22  ;;  %7059 = vrcp.f32 %v2558_v16 }
 0x468   : > { %6481 = vmatpush3.bf16.msra.mxu1 %v6478_v62  ;;  %5983 = vmatprep.mubr.msk.f32.mxu1 %vm2036_vm3, %v2715_v39 }
 0x469   : > { %v7054_v15 = vpop.eup %7053  ;;  %6483 = vmatprep.subr.bf16.mxu1 %v6482_v11 }
 0x46a   : > { %v2555_v52 = vpop.xlane.xlu0 %2554  ;;  %v2717_v21 = vmul.f32 %v7054_v15, %v8841_v63  ;;  %v7056_v53 = vpop.eup %7055 }
 0x46b   : > { %7061 = vrcp.f32 %v2555_v52  ;;  %5984 = vmatmul.mubr.msk.f32.gmra.mrb[54].mxu1 %vm2036_vm3, %v2716_v33  ;;  %v2720_v61 = vmul.f32 %v7056_v53, %v8828_v26 }
 0x46c   : > { %6002 = vmatprep.mubr.msk.f32.mxu0 %vm2036_vm3, %v2717_v21  ;;  %6485 = vmatpush3.bf16.msra.mxu1 %v6482_v11 }
 0x46d   : > { %v7058_v24 = vpop.eup %7057  ;;  %6003 = vmatmul.mubr.msk.f32.vlgmr.msra.gmra.mrb[64].mxu0 %vm2036_vm3, %v2718_v37  ;;  %6502 = vmatprep.subr.bf16.mxu1 %v9042_v44 }
 0x46e   : > { %6489 = vmatpush3.bf16.msra.mxu0 %v9042_v44  ;;  %v2719_v23 = vmul.f32 %v7058_v24, %v8853_v42 }
 0x46f   : > { %6491 = vmatprep.subr.bf16.mxu0 %v6490_v51  ;;  %v2564_v45 = vpop.xlane.xlu1 %2563 }
 0x470   : > { %6005 = vmatprep.mubr.msk.f32.mxu0 %vm2036_vm3, %v2719_v23  ;;  %7063 = vrcp.f32 %v2564_v45 }
 0x471   : > { %6006 = vmatmul.mubr.msk.f32.gmra.mrb[66].mxu0 %vm2036_vm3, %v2720_v61  ;;  %v7060_v63 = vpop.eup %7059 }
 0x472   : > { %6493 = vmatpush3.bf16.msra.mxu0 %v6490_v51  ;;  %v2722_v47 = vmul.f32 %v7060_v63, %v8857_v35 }
 0x475   : > { %v7062_v43 = vpop.eup %7061 }
 0x476   : > { %v2721_v60 = vmul.f32 %v7062_v43, %v8866_v12 }
 0x477   : > { %v2561_v18 = vpop.xlane.xlu0 %2560 }
 0x478   : > { %6008 = vmatprep.mubr.msk.f32.mxu0 %vm2036_vm3, %v2721_v60  ;;  %7065 = vrcp.f32 %v2561_v18 }
 0x479   : > { %6009 = vmatmul.mubr.msk.f32.gmra.mrb[68].mxu0 %vm2036_vm3, %v2722_v47 }
 0x47a   : > { %v7064_v26 = vpop.eup %7063 }
 0x47b   : > { %v2724_v8 = vmul.f32 %v7064_v26, %v8872_v31 }
 0x482   : > { %v7066_v42 = vpop.eup %7065 }
 0x483   : > { %v2723_v48 = vmul.f32 %v7066_v42, %v8885_v25  ;;  %v9584_v25 = vld [vmem:[#allocation22_spill] sm:$0xff] }
 0x485   : > { %6011 = vmatprep.mubr.msk.f32.mxu0 %vm2036_vm3, %v2723_v48  ;;  %v3965_v48 = vld [vmem:[%s9385_s4] sm:$0xff] }
 0x486   : > { %6012 = vmatmul.mubr.msk.f32.gmra.mrb[70].mxu0 %vm2036_vm3, %v2724_v8 }
 0x487   : > { %v2570_v12 = vpop.xlane.xlu0 %2569 }
 0x488   : > { %7067 = vrcp.f32 %v2570_v12 }
 0x48f   : > { %v2567_v0 = vpop.xlane.xlu1 %2566 }
 0x490   : > { %7069 = vrcp.f32 %v2567_v0 }
 0x492   : > { %v7068_v49 = vpop.eup %7067 }
 0x493   : > { %v2726_v30 = vmul.f32 %v7068_v49, %v9584_v25 }
 0x495   : > { %v9091_v35 = vpop.f32.mrb[32].mxu1 }
 0x496   : > { %v9093_v40 = vpop.f32.mrb[33].mxu1 }
 0x497   : > { %v2576_v32 = vpop.xlane.xlu1 %2575 }
 0x498   : > { %7071 = vrcp.f32 %v2576_v32 }
 0x49a   : > { %v7070_v36 = vpop.eup %7069 }
 0x49b   : > { %v2725_v19 = vmul.f32 %v7070_v36, %v8907_v55 }
 0x49d   : > { %6030 = vmatprep.mubr.msk.f32.mxu1 %vm2036_vm3, %v2725_v19 }
 0x49e   : > { %6031 = vmatmul.mubr.msk.f32.vlgmr.msra.gmra.mrb[56].mxu1 %vm2036_vm3, %v2726_v30  ;;  %v3967_v30 = vld [vmem:[%s9385_s4 + $0x10] sm:$0xff] }
 0x49f   : > { %6506 = vmatpush3.bf16.msra.mxu1 %v9042_v44  ;;  %v2573_v31 = vpop.xlane.xlu1 %2572 }
 0x4a0   : > { %7073 = vrcp.f32 %v2573_v31  ;;  %6503 = vmatprep.subr.bf16.mxu1 %v6490_v51 }
 0x4a1   : > { %v9100_v41 = vpop.f32.mrb[34].mxu1 }
 0x4a2   : > { %v9102_v34 = vpop.f32.mrb[35].mxu1  ;;  %v7072_v5 = vpop.eup %7071 }
 0x4a3   : > { %6507 = vmatpush3.bf16.msra.mxu1 %v6490_v51  ;;  %v2582_v27 = vpop.xlane.xlu0 %2581  ;;  %v2728_v56 = vmul.f32 %v7072_v5, %v8914_v4 }
 0x4a5   : > { %v9104_v20 = vpop.f32.mrb[36].mxu1 }
 0x4a6   : > { %v9106_v55 = vpop.f32.mrb[37].mxu1 }
 0x4a7   : > { %v2591_v50 = vpop.xlane.xlu0 %2590 }
 0x4a8   : > { %7075 = vrcp.f32 %v2591_v50 }
 0x4a9   : > { %7077 = vrcp.f32 %v2582_v27  ;;  %v9585_v27 = vld [vmem:[#allocation24_spill] sm:$0xff] }
 0x4aa   : > { %v7074_v9 = vpop.eup %7073 }
 0x4ab   : > { %v2579_v28 = vpop.xlane.xlu1 %2578  ;;  %v2597_v44 = vpop.xlane.xlu0 %2596  ;;  %v2727_v62 = vmul.f32 %v7074_v9, %v8925_v3 }
 0x4ac   : > { %7079 = vrcp.f32 %v2579_v28  ;;  %v9109_v22 = vpop.f32.mrb[38].mxu1 }
 0x4ad   : > { %v9112_v16 = vpop.f32.mrb[39].mxu1  ;;  %6033 = vmatprep.mubr.msk.f32.mxu1 %vm2036_vm3, %v2727_v62 }
 0x4ae   : > { %6034 = vmatmul.mubr.msk.f32.gmra.mrb[58].mxu1 %vm2036_vm3, %v2728_v56 }
 0x4af   : > { %v2588_v39 = vpop.xlane.xlu1 %2587  ;;  %v2603_v11 = vpop.xlane.xlu0 %2602 }
 0x4b0   : > { %7081 = vrcp.f32 %v2588_v39 }
 0x4b2   : > { %v7076_v2 = vpop.eup %7075 }
 0x4b3   : > { %v2585_v15 = vpop.xlane.xlu1 %2584  ;;  %v2609_v57 = vpop.xlane.xlu0 %2608  ;;  %v2733_v7 = vmul.f32 %v7076_v2, %v8935_v10 }
 0x4b4   : > { %7083 = vrcp.f32 %v2585_v15  ;;  %v7078_v3 = vpop.eup %7077 }
 0x4b5   : > { %7085 = vrcp.f32 %v2609_v57  ;;  %6058 = vmatprep.mubr.msk.f32.mxu0 %vm2036_vm3, %v2733_v7  ;;  %v2730_v24 = vmul.f32 %v7078_v3, %v8931_v46 }
 0x4b6   : > { %v7080_v4 = vpop.eup %7079 }
 0x4b7   : > { %v2594_v54 = vpop.xlane.xlu1 %2593  ;;  %v6835_v33 = vpop.permute.xlu0 %6834  ;;  %v2729_v52 = vmul.f32 %v7080_v4, %v8947_v13 }
 0x4b8   : > { %v9119_v21 = vpop.f32.mrb[48].mxu0  ;;  %v6837_v37 = vunpack.i.h.bf16 %v6835_v33  ;;  %v6836_v53 = vunpack.i.l.bf16 %v6835_v33  ;;  %7087 = vrcp.f32 %v2594_v54 }
 0x4b9   : > { %v9122_v51 = vpop.f32.mrb[49].mxu0  ;;  %6036 = vmatprep.mubr.msk.f32.mxu1 %vm2036_vm3, %v2729_v52  ;;  %7089 = vrcp.f32 %v2597_v44 }
 0x4ba   : > { %v6494_v10 = vpack.c.bf16 %v6837_v37, %v6836_v53  ;;  %6037 = vmatmul.mubr.msk.f32.gmra.mrb[60].mxu1 %vm2036_vm3, %v2730_v24  ;;  %v7082_v61 = vpop.eup %7081 }
 0x4bb   : > { %v2600_v23 = vpop.xlane.xlu1 %2599  ;;  %v2732_v46 = vmul.f32 %v7082_v61, %v8956_v58 }
 0x4bc   : > { %6495 = vmatprep.subr.bf16.mxu0 %v6494_v10  ;;  %6504 = vmatprep.subr.bf16.mxu1 %v6494_v10 }
 0x4bd   : > { %6497 = vmatpush3.bf16.msra.mxu0 %v6494_v10  ;;  %6508 = vmatpush3.bf16.msra.mxu1 %v6494_v10 }
 0x4be   : > { %v7084_v13 = vpop.eup %7083 }
 0x4bf   : > { %v7086_v63 = vpop.eup %7085  ;;  %v2606_v45 = vpop.xlane.xlu1 %2605  ;;  %v2731_v43 = vmul.f32 %v7084_v13, %v8965_v6 }
 0x4c0   : > { %v2739_v60 = vmul.f32 %v7086_v63, %v8962_v38  ;;  %v3966_v38 = vld [vmem:[%s9385_s4 + $0x8] sm:$0xff] }
 0x4c1   : > { %6039 = vmatprep.mubr.msk.f32.mxu1 %vm2036_vm3, %v2731_v43 }
 0x4c2   : > { %6040 = vmatmul.mubr.msk.f32.gmra.mrb[62].mxu1 %vm2036_vm3, %v2732_v46  ;;  %v7088_v58 = vpop.eup %7087 }
 0x4c3   : > { %v2612_v18 = vpop.xlane.xlu1 %2611  ;;  %6067 = vmatprep.mubr.msk.f32.mxu1 %vm2036_vm3, %v2739_v60  ;;  %v7090_v8 = vpop.eup %7089  ;;  %v2734_v0 = vmul.f32 %v7088_v58, %v8972_v59 }
 0x4c4   : > { %7091 = vrcp.f32 %v2612_v18  ;;  %v2735_v32 = vmul.f32 %v7090_v8, %v8944_v1 }
 0x4c5   : > { %7093 = vrcp.f32 %v2600_v23 }
 0x4c6   : > { %7095 = vrcp.f32 %v2603_v11 }
 0x4c7   : > { %v6840_v47 = vpop.permute.xlu1 %6839  ;;  %7097 = vrcp.f32 %v2606_v45 }
 0x4c8   : > { %v6842_v26 = vunpack.i.h.bf16 %v6840_v47  ;;  %v6841_v42 = vunpack.i.l.bf16 %v6840_v47 }
 0x4ca   : > { %v6498_v6 = vpack.c.bf16 %v6842_v26, %v6841_v42 }
 0x4cc   : > { %6499 = vmatprep.subr.bf16.mxu0 %v6498_v6  ;;  %6505 = vmatprep.subr.bf16.mxu1 %v6498_v6 }
 0x4cd   : > { %6501 = vmatpush3.bf16.msra.mxu0 %v6498_v6  ;;  %6509 = vmatpush3.bf16.msra.mxu1 %v6498_v6 }
 0x4ce   : > { %v7092_v12 = vpop.eup %7091  ;;  %6070 = vmatprep.subr.mxu1 %v3965_v48  ;;  %6096 = vmatprep.subr.mxu0 %v3966_v38 }
 0x4cf   : > { %v7094_v49 = vpop.eup %7093  ;;  %v2740_v36 = vmul.f32 %v7092_v12, %v8984_v17 }
 0x4d0   : > { %v7096_v19 = vpop.eup %7095  ;;  %v5895_v25 = vpop.f32.mrb[50].mxu0  ;;  %6059 = vmatmul.mubr.msk.f32.vlgmr.msra.gmra.mrb[72].mxu0 %vm2036_vm3, %v2734_v0  ;;  %v2736_v59 = vmul.f32 %v7094_v49, %v8976_v29 }
 0x4d1   : > { %v3018_v31 = vpop.f32.mrb[51].mxu0  ;;  %6061 = vmatprep.mubr.msk.f32.mxu0 %vm2036_vm3, %v2735_v32  ;;  %6068 = vmatmul.mubr.msk.f32.vlgmr.msra.gmra.mrb[64].mxu1 %vm2036_vm3, %v2740_v36  ;;  %v7098_v1 = vpop.eup %7097  ;;  %v2737_v17 = vmul.f32 %v7096_v19, %v8953_v14 }
 0x4d2   : > { %6072 = vmatprep.mubr.msk.f32.mxu1 %vm636_vm1, %v9093_v40  ;;  %6071 = vmatpush3.msra.mxu1 %v3965_v48  ;;  %v2738_v40 = vmul.f32 %v7098_v1, %v9585_v27 }
 0x4d3   : > { %6097 = vmatpush3.msra.mxu0 %v3966_v38  ;;  %6122 = vmatprep.subr.mxu1 %v3967_v30 }
 0x4d4   : > { %6062 = vmatmul.mubr.msk.f32.gmra.mrb[74].mxu0 %vm2036_vm3, %v2736_v59 }
 0x4d5   : > { %6064 = vmatprep.mubr.msk.f32.mxu0 %vm2036_vm3, %v2737_v17  ;;  %6073 = vmatmul.mubr.msk.f32.vlgmr.msra.gmra.mrb[66].mxu1 %vm636_vm1, %v9091_v35 }
 0x4d6   : > { %6075 = vmatprep.mubr.msk.f32.mxu1 %vm636_vm1, %v9102_v34  ;;  %6123 = vmatpush3.msra.mxu1 %v3967_v30  ;;  %v3968_v34 = vld [vmem:[%s9385_s4 + $0x18] sm:$0xff] }
 0x4d7   : > { %6148 = vmatprep.subr.mxu0 %v3968_v34 }
 0x4d8   : > { %6065 = vmatmul.mubr.msk.f32.gmra.mrb[76].mxu0 %vm2036_vm3, %v2738_v40 }
 0x4d9   : > { %6076 = vmatmul.mubr.msk.f32.gmra.mrb[68].mxu1 %vm636_vm1, %v9100_v41 }
 0x4da   : > { %6078 = vmatprep.mubr.msk.f32.mxu1 %vm636_vm1, %v9106_v55 }
 0x4dd   : > { %6079 = vmatmul.mubr.msk.f32.gmra.mrb[70].mxu1 %vm636_vm1, %v9104_v20 }
 0x4de   : > { %6081 = vmatprep.mubr.msk.f32.mxu1 %vm636_vm1, %v9112_v16 }
 0x4e0   : > { %v5898_v14 = vpop.f32.mrb[52].mxu0 }
 0x4e1   : > { %v3028_v29 = vpop.f32.mrb[53].mxu0  ;;  %6082 = vmatmul.mubr.msk.f32.gmra.mrb[72].mxu1 %vm636_vm1, %v9109_v22 }
 0x4e2   : > { %6084 = vmatprep.mubr.msk.f32.mxu1 %vm636_vm1, %v9122_v51 }
 0x4e5   : > { %6085 = vmatmul.mubr.msk.f32.gmra.mrb[74].mxu1 %vm636_vm1, %v9119_v21 }
 0x4e6   : > { %6087 = vmatprep.mubr.msk.f32.mxu1 %vm636_vm1, %v3018_v31 }
 0x4e9   : > { %6088 = vmatmul.mubr.msk.f32.gmra.mrb[76].mxu1 %vm636_vm1, %v5895_v25 }
 0x4ea   : > { %6090 = vmatprep.mubr.msk.f32.mxu1 %vm636_vm1, %v3028_v29 }
 0x4ec   : > { %v5901_v35 = vpop.f32.mrb[54].mxu0 }
 0x4ed   : > { %v3038_v41 = vpop.f32.mrb[55].mxu0  ;;  %6091 = vmatmul.mubr.msk.f32.gmra.mrb[78].mxu1 %vm636_vm1, %v5898_v14 }
 0x4ee   : > { %6093 = vmatprep.mubr.msk.f32.mxu1 %vm636_vm1, %v3038_v41 }
 0x4f1   : > { %6094 = vmatmul.mubr.msk.f32.gmra.mrb[80].mxu1 %vm636_vm1, %v5901_v35 }
 0x50c   : > { %v5920_v20 = vpop.f32.mrb[40].mxu1 }
 0x50d   : > { %v3161_v55 = vpop.f32.mrb[41].mxu1 }
 0x50e   : > { %6098 = vmatprep.mubr.msk.f32.mxu0 %vm636_vm1, %v3161_v55 }
 0x50f   : > { %6099 = vmatmul.mubr.msk.f32.vlgmr.msra.gmra.mrb[78].mxu0 %vm636_vm1, %v5920_v20 }
 0x510   : > { %6149 = vmatpush3.msra.mxu0 %v3968_v34 }
 0x513   : > { %v5923_v50 = vpop.f32.mrb[42].mxu1 }
 0x514   : > { %v3171_v5 = vpop.f32.mrb[43].mxu1 }
 0x515   : > { %6101 = vmatprep.mubr.msk.f32.mxu0 %vm636_vm1, %v3171_v5 }
 0x516   : > { %6102 = vmatmul.mubr.msk.f32.gmra.mrb[80].mxu0 %vm636_vm1, %v5923_v50 }
 0x517   : > { %v5926_v9 = vpop.f32.mrb[44].mxu1 }
 0x518   : > { %v3181_v28 = vpop.f32.mrb[45].mxu1 }
 0x519   : > { %6104 = vmatprep.mubr.msk.f32.mxu0 %vm636_vm1, %v3181_v28 }
 0x51a   : > { %6105 = vmatmul.mubr.msk.f32.gmra.mrb[82].mxu0 %vm636_vm1, %v5926_v9 }
 0x51b   : > { %v5929_v44 = vpop.f32.mrb[46].mxu1 }
 0x51c   : > { %v3191_v62 = vpop.f32.mrb[47].mxu1 }
 0x51d   : > { %6107 = vmatprep.mubr.msk.f32.mxu0 %vm636_vm1, %v3191_v62 }
 0x51e   : > { %6108 = vmatmul.mubr.msk.f32.gmra.mrb[84].mxu0 %vm636_vm1, %v5929_v44 }
 0x51f   : > { %v5948_v22 = vpop.f32.mrb[56].mxu0 }
 0x520   : > { %v3314_v56 = vpop.f32.mrb[57].mxu0 }
 0x521   : > { %6110 = vmatprep.mubr.msk.f32.mxu0 %vm636_vm1, %v3314_v56 }
 0x522   : > { %6111 = vmatmul.mubr.msk.f32.gmra.mrb[86].mxu0 %vm636_vm1, %v5948_v22 }
 0x523   : > { %v5951_v16 = vpop.f32.mrb[58].mxu0 }
 0x524   : > { %v3324_v39 = vpop.f32.mrb[59].mxu0 }
 0x525   : > { %6113 = vmatprep.mubr.msk.f32.mxu0 %vm636_vm1, %v3324_v39 }
 0x526   : > { %6114 = vmatmul.mubr.msk.f32.gmra.mrb[88].mxu0 %vm636_vm1, %v5951_v16 }
 0x52b   : > { %v5954_v11 = vpop.f32.mrb[60].mxu0 }
 0x52c   : > { %v3334_v2 = vpop.f32.mrb[61].mxu0 }
 0x52d   : > { %6116 = vmatprep.mubr.msk.f32.mxu0 %vm636_vm1, %v3334_v2 }
 0x52e   : > { %6117 = vmatmul.mubr.msk.f32.gmra.mrb[90].mxu0 %vm636_vm1, %v5954_v11 }
 0x52f   : > { %v5957_v15 = vpop.f32.mrb[62].mxu0 }
 0x530   : > { %v3344_v57 = vpop.f32.mrb[63].mxu0 }
 0x531   : > { %6119 = vmatprep.mubr.msk.f32.mxu0 %vm636_vm1, %v3344_v57 }
 0x532   : > { %v5976_v7 = vpop.f32.mrb[48].mxu1  ;;  %6120 = vmatmul.mubr.msk.f32.gmra.mrb[92].mxu0 %vm636_vm1, %v5957_v15 }
 0x533   : > { %v3467_v3 = vpop.f32.mrb[49].mxu1 }
 0x534   : > { %6124 = vmatprep.mubr.msk.f32.mxu1 %vm636_vm1, %v3467_v3 }
 0x535   : > { %6125 = vmatmul.mubr.msk.f32.vlgmr.msra.gmra.mrb[82].mxu1 %vm636_vm1, %v5976_v7 }
 0x536   : > { %v5979_v4 = vpop.f32.mrb[50].mxu1 }
 0x537   : > { %v3477_v54 = vpop.f32.mrb[51].mxu1 }
 0x538   : > { %6127 = vmatprep.mubr.msk.f32.mxu1 %vm636_vm1, %v3477_v54 }
 0x539   : > { %6128 = vmatmul.mubr.msk.f32.gmra.mrb[84].mxu1 %vm636_vm1, %v5979_v4 }
 0x53a   : > { %v5982_v33 = vpop.f32.mrb[52].mxu1 }
 0x53b   : > { %v3487_v52 = vpop.f32.mrb[53].mxu1 }
 0x53c   : > { %6130 = vmatprep.mubr.msk.f32.mxu1 %vm636_vm1, %v3487_v52 }
 0x53d   : > { %6131 = vmatmul.mubr.msk.f32.gmra.mrb[86].mxu1 %vm636_vm1, %v5982_v33 }
 0x53e   : > { %v5985_v21 = vpop.f32.mrb[54].mxu1 }
 0x53f   : > { %v3497_v37 = vpop.f32.mrb[55].mxu1 }
 0x540   : > { %v6004_v53 = vpop.f32.mrb[64].mxu0  ;;  %6133 = vmatprep.mubr.msk.f32.mxu1 %vm636_vm1, %v3497_v37 }
 0x541   : > { %v3620_v24 = vpop.f32.mrb[65].mxu0  ;;  %6134 = vmatmul.mubr.msk.f32.gmra.mrb[88].mxu1 %vm636_vm1, %v5985_v21 }
 0x542   : > { %6136 = vmatprep.mubr.msk.f32.mxu1 %vm636_vm1, %v3620_v24 }
 0x544   : > { %v6007_v51 = vpop.f32.mrb[66].mxu0 }
 0x545   : > { %v3630_v10 = vpop.f32.mrb[67].mxu0  ;;  %6137 = vmatmul.mubr.msk.f32.gmra.mrb[90].mxu1 %vm636_vm1, %v6004_v53 }
 0x546   : > { %6139 = vmatprep.mubr.msk.f32.mxu1 %vm636_vm1, %v3630_v10 }
 0x549   : > { %6140 = vmatmul.mubr.msk.f32.gmra.mrb[92].mxu1 %vm636_vm1, %v6007_v51 }
 0x54c   : > { %v6010_v23 = vpop.f32.mrb[68].mxu0 }
 0x54d   : > { %v3640_v61 = vpop.f32.mrb[69].mxu0 }
 0x54e   : > { %6142 = vmatprep.mubr.msk.f32.mxu1 %vm636_vm1, %v3640_v61 }
 0x54f   : > { %6143 = vmatmul.mubr.msk.f32.gmra.mrb[94].mxu1 %vm636_vm1, %v6010_v23 }
 0x559   : > { %v6013_v13 = vpop.f32.mrb[70].mxu0 }
 0x55a   : > { %v3650_v63 = vpop.f32.mrb[71].mxu0 }
 0x55b   : > { %6145 = vmatprep.mubr.msk.f32.mxu1 %vm636_vm1, %v3650_v63 }
 0x55c   : > { %6146 = vmatmul.mubr.msk.f32.gmra.mrb[96].mxu1 %vm636_vm1, %v6013_v13 }
 0x571   : > { %v6032_v45 = vpop.f32.mrb[56].mxu1 }
 0x572   : > { %v3773_v43 = vpop.f32.mrb[57].mxu1 }
 0x573   : > { %6150 = vmatprep.mubr.msk.f32.mxu0 %vm636_vm1, %v3773_v43 }
 0x574   : > { %6151 = vmatmul.mubr.msk.f32.vlgmr.msra.gmra.mrb[94].mxu0 %vm636_vm1, %v6032_v45 }
 0x581   : > { %v6035_v46 = vpop.f32.mrb[58].mxu1 }
 0x582   : > { %v3783_v60 = vpop.f32.mrb[59].mxu1 }
 0x583   : > { %6153 = vmatprep.mubr.msk.f32.mxu0 %vm636_vm1, %v3783_v60 }
 0x584   : > { %6154 = vmatmul.mubr.msk.f32.gmra.mrb[96].mxu0 %vm636_vm1, %v6035_v46 }
 0x58d   : > { %v6038_v18 = vpop.f32.mrb[60].mxu1 }
 0x58e   : > { %v3793_v47 = vpop.f32.mrb[61].mxu1 }
 0x58f   : > { %6156 = vmatprep.mubr.msk.f32.mxu0 %vm636_vm1, %v3793_v47 }
 0x590   : > { %6157 = vmatmul.mubr.msk.f32.gmra.mrb[98].mxu0 %vm636_vm1, %v6038_v18 }
 0x595   : > { %v6041_v26 = vpop.f32.mrb[62].mxu1 }
 0x596   : > { %v3803_v42 = vpop.f32.mrb[63].mxu1 }
 0x597   : > { %6159 = vmatprep.mubr.msk.f32.mxu0 %vm636_vm1, %v3803_v42 }
 0x598   : > { %6160 = vmatmul.mubr.msk.f32.gmra.mrb[100].mxu0 %vm636_vm1, %v6041_v26 }
 0x5a3   : > { %v6060_v6 = vpop.f32.mrb[72].mxu0 }
 0x5a4   : > { %v3926_v58 = vpop.f32.mrb[73].mxu0  ;;  %v6069_v48 = vpop.f32.mrb[64].mxu1 }
 0x5a5   : > { %v3956_v38 = vpop.f32.mrb[65].mxu1  ;;  %6162 = vmatprep.mubr.msk.f32.mxu0 %vm636_vm1, %v3926_v58 }
 0x5a6   : > { %6163 = vmatmul.mubr.msk.f32.gmra.mrb[102].mxu0 %vm636_vm1, %v6060_v6 }
 0x5a7   : > { %v6063_v8 = vpop.f32.mrb[74].mxu0 }
 0x5a8   : > { %v3936_v12 = vpop.f32.mrb[75].mxu0  ;;  %v6074_v0 = vpop.f32.mrb[66].mxu1 }
 0x5a9   : > { %v4083_v49 = vpop.f32.mrb[67].mxu1  ;;  %6165 = vmatprep.mubr.msk.f32.mxu0 %vm636_vm1, %v3936_v12  ;;  %v4748_v55 = vsel %vm314_vm0, %v6074_v0, 0.0 }
 0x5aa   : > { %6166 = vmatmul.mubr.msk.f32.gmra.mrb[104].mxu0 %vm636_vm1, %v6063_v8  ;;  %v4741_v9 = vsel %vm314_vm0, %v4083_v49, 0.0 }
 0x5ab   : > { %v6066_v36 = vpop.f32.mrb[76].mxu0 }
 0x5ac   : > { %v3946_v32 = vpop.f32.mrb[77].mxu0  ;;  %v6077_v19 = vpop.f32.mrb[68].mxu1 }
 0x5ad   : > { %v4093_v25 = vpop.f32.mrb[69].mxu1  ;;  %6168 = vmatprep.mubr.msk.f32.mxu0 %vm636_vm1, %v3946_v32  ;;  %v4762_v56 = vsel %vm314_vm0, %v6077_v19, 0.0 }
 0x5ae   : > { %6169 = vmatmul.mubr.msk.f32.gmra.mrb[106].mxu0 %vm636_vm1, %v6066_v36  ;;  %v4755_v11 = vsel %vm314_vm0, %v4093_v25, 0.0 }
 0x5af   : > { %6171 = vmatprep.mubr.msk.f32.mxu0 %vm636_vm1, %v3956_v38 }
 0x5b0   : > { %v6080_v30 = vpop.f32.mrb[70].mxu1 }
 0x5b1   : > { %v4103_v31 = vpop.f32.mrb[71].mxu1  ;;  %v4776_v3 = vsel %vm314_vm0, %v6080_v30, 0.0 }
 0x5b2   : > { %6172 = vmatmul.mubr.msk.f32.gmra.mrb[108].mxu0 %vm636_vm1, %v6069_v48  ;;  %v4769_v33 = vsel %vm314_vm0, %v4103_v31, 0.0 }
 0x5b4   : > { %v6083_v59 = vpop.f32.mrb[72].mxu1 }
 0x5b5   : > { %v4113_v1 = vpop.f32.mrb[73].mxu1  ;;  %v4790_v24 = vsel %vm314_vm0, %v6083_v59, 0.0 }
 0x5b6   : > { %v4783_v23 = vsel %vm314_vm0, %v4113_v1, 0.0 }
 0x5b8   : > { %v6086_v17 = vpop.f32.mrb[74].mxu1 }
 0x5b9   : > { %v4123_v27 = vpop.f32.mrb[75].mxu1  ;;  %v4804_v43 = vsel %vm314_vm0, %v6086_v17, 0.0 }
 0x5ba   : > { %v4797_v18 = vsel %vm314_vm0, %v4123_v27, 0.0 }
 0x5bc   : > { %v6089_v40 = vpop.f32.mrb[76].mxu1 }
 0x5bd   : > { %v4133_v14 = vpop.f32.mrb[77].mxu1  ;;  %v4818_v58 = vsel %vm314_vm0, %v6089_v40, 0.0 }
 0x5be   : > { %v4811_v8 = vsel %vm314_vm0, %v4133_v14, 0.0 }
 0x5c0   : > { %v6092_v29 = vpop.f32.mrb[78].mxu1 }
 0x5c1   : > { %v4143_v35 = vpop.f32.mrb[79].mxu1  ;;  %v4832_v32 = vsel %vm314_vm0, %v6092_v29, 0.0 }
 0x5c2   : > { %v4825_v30 = vsel %vm314_vm0, %v4143_v35, 0.0 }
 0x5c4   : > { %v6095_v41 = vpop.f32.mrb[80].mxu1 }
 0x5c5   : > { %v4153_v34 = vpop.f32.mrb[81].mxu1  ;;  %v4846_v27 = vsel %vm314_vm0, %v6095_v41, 0.0 }
 0x5e2   : > { %v6100_v20 = vpop.f32.mrb[78].mxu0 }
 0x5e3   : > { %v4749_v50 = vsel %vm314_vm0, %v6100_v20, 0.0  ;;  %v4276_v5 = vpop.f32.mrb[79].mxu0  ;;  %v4839_v20 = vsel %vm314_vm0, %v4153_v34, 0.0 }
 0x5e4   : > { %v4750_v28 = vadd.f32 %v4749_v50, %v4748_v55  ;;  %v4742_v44 = vsel %vm314_vm0, %v4276_v5, 0.0 }
 0x5e5   : > { %v4743_v62 = vadd.f32 %v4742_v44, %v4741_v9 }
 0x5e9   : > { %v6103_v22 = vpop.f32.mrb[80].mxu0 }
 0x5ea   : > { %v4763_v16 = vsel %vm314_vm0, %v6103_v22, 0.0  ;;  %v4286_v39 = vpop.f32.mrb[81].mxu0 }
 0x5eb   : > { %v4764_v2 = vadd.f32 %v4763_v16, %v4762_v56  ;;  %v4756_v15 = vsel %vm314_vm0, %v4286_v39, 0.0 }
 0x5ec   : > { %v4757_v57 = vadd.f32 %v4756_v15, %v4755_v11 }
 0x5ed   : > { %v6106_v7 = vpop.f32.mrb[82].mxu0 }
 0x5ee   : > { %v4777_v4 = vsel %vm314_vm0, %v6106_v7, 0.0  ;;  %v4296_v54 = vpop.f32.mrb[83].mxu0 }
 0x5ef   : > { %v4778_v52 = vadd.f32 %v4777_v4, %v4776_v3  ;;  %v4770_v21 = vsel %vm314_vm0, %v4296_v54, 0.0 }
 0x5f0   : > { %v4771_v37 = vadd.f32 %v4770_v21, %v4769_v33 }
 0x5f1   : > { %v6109_v53 = vpop.f32.mrb[84].mxu0 }
 0x5f2   : > { %v4791_v51 = vsel %vm314_vm0, %v6109_v53, 0.0  ;;  %v4306_v10 = vpop.f32.mrb[85].mxu0 }
 0x5f3   : > { %v4792_v61 = vadd.f32 %v4791_v51, %v4790_v24  ;;  %v4784_v13 = vsel %vm314_vm0, %v4306_v10, 0.0 }
 0x5f4   : > { %v4785_v63 = vadd.f32 %v4784_v13, %v4783_v23 }
 0x5f5   : > { %v6112_v45 = vpop.f32.mrb[86].mxu0 }
 0x5f6   : > { %v4805_v46 = vsel %vm314_vm0, %v6112_v45, 0.0  ;;  %v4316_v60 = vpop.f32.mrb[87].mxu0 }
 0x5f7   : > { %v4806_v47 = vadd.f32 %v4805_v46, %v4804_v43  ;;  %v4798_v26 = vsel %vm314_vm0, %v4316_v60, 0.0 }
 0x5f8   : > { %v4799_v42 = vadd.f32 %v4798_v26, %v4797_v18 }
 0x5f9   : > { %v6115_v6 = vpop.f32.mrb[88].mxu0 }
 0x5fa   : > { %v4819_v48 = vsel %vm314_vm0, %v6115_v6, 0.0  ;;  %v4326_v38 = vpop.f32.mrb[89].mxu0 }
 0x5fb   : > { %v4820_v12 = vadd.f32 %v4819_v48, %v4818_v58  ;;  %v4812_v0 = vsel %vm314_vm0, %v4326_v38, 0.0 }
 0x5fc   : > { %v4813_v49 = vadd.f32 %v4812_v0, %v4811_v8 }
 0x601   : > { %v6118_v36 = vpop.f32.mrb[90].mxu0 }
 0x602   : > { %v4833_v19 = vsel %vm314_vm0, %v6118_v36, 0.0  ;;  %v4336_v25 = vpop.f32.mrb[91].mxu0 }
 0x603   : > { %v4834_v31 = vadd.f32 %v4833_v19, %v4832_v32  ;;  %v4826_v59 = vsel %vm314_vm0, %v4336_v25, 0.0  ;;  %v9298_v19 = vld [vmem:[%s9386_s5] ss:$0 sm:$0xff] }
 0x604   : > { %v4827_v1 = vadd.f32 %v4826_v59, %v4825_v30 }
 0x605   : > { %v6121_v17 = vpop.f32.mrb[92].mxu0 }
 0x606   : > { %v4847_v40 = vsel %vm314_vm0, %v6121_v17, 0.0  ;;  %v4346_v14 = vpop.f32.mrb[93].mxu0 }
 0x607   : > { %v4848_v55 = vadd.f32 %v4847_v40, %v4846_v27  ;;  %v4840_v29 = vsel %vm314_vm0, %v4346_v14, 0.0 }
 0x608   : > { %v4841_v50 = vadd.f32 %v4840_v29, %v4839_v20  ;;  %v6126_v5 = vpop.f32.mrb[82].mxu1 }
 0x609   : > { %v4751_v9 = vsel %vm314_vm0, %v6126_v5, 0.0  ;;  %v4469_v35 = vpop.f32.mrb[83].mxu1 }
 0x60a   : > { %v4752_v44 = vadd.f32 %v4751_v9, %v4750_v28  ;;  %v4744_v22 = vsel %vm314_vm0, %v4469_v35, 0.0 }
 0x60b   : > { %v4745_v56 = vadd.f32 %v4744_v22, %v4743_v62 }
 0x60c   : > { %v6129_v16 = vpop.f32.mrb[84].mxu1 }
 0x60d   : > { %v4765_v41 = vsel %vm314_vm0, %v6129_v16, 0.0  ;;  %v4479_v39 = vpop.f32.mrb[85].mxu1 }
 0x60e   : > { %v4766_v11 = vadd.f32 %v4765_v41, %v4764_v2  ;;  %v4758_v15 = vsel %vm314_vm0, %v4479_v39, 0.0 }
 0x60f   : > { %v4759_v34 = vadd.f32 %v4758_v15, %v4757_v57 }
 0x610   : > { %v6132_v7 = vpop.f32.mrb[86].mxu1 }
 0x611   : > { %v4779_v3 = vsel %vm314_vm0, %v6132_v7, 0.0  ;;  %v4489_v4 = vpop.f32.mrb[87].mxu1 }
 0x612   : > { %v4780_v54 = vadd.f32 %v4779_v3, %v4778_v52  ;;  %v4772_v33 = vsel %vm314_vm0, %v4489_v4, 0.0 }
 0x613   : > { %v4773_v21 = vadd.f32 %v4772_v33, %v4771_v37 }
 0x614   : > { %v6135_v28 = vpop.f32.mrb[88].mxu1 }
 0x615   : > { %v4793_v53 = vsel %vm314_vm0, %v6135_v28, 0.0  ;;  %v4499_v62 = vpop.f32.mrb[89].mxu1 }
 0x616   : > { %v4794_v24 = vadd.f32 %v4793_v53, %v4792_v61  ;;  %v4786_v51 = vsel %vm314_vm0, %v4499_v62, 0.0 }
 0x617   : > { %v4787_v10 = vadd.f32 %v4786_v51, %v4785_v63 }
 0x618   : > { %v6138_v2 = vpop.f32.mrb[90].mxu1 }
 0x619   : > { %v4807_v23 = vsel %vm314_vm0, %v6138_v2, 0.0  ;;  %v4509_v57 = vpop.f32.mrb[91].mxu1 }
 0x61a   : > { %v9271_v13 = vadd.f32 %v4807_v23, %v4806_v47  ;;  %v4800_v45 = vsel %vm314_vm0, %v4509_v57, 0.0 }
 0x61b   : > { %v9274_v52 = vadd.f32 %v4800_v45, %v4799_v42 }
 0x61c   : > { %v6141_v43 = vpop.f32.mrb[92].mxu1 }
 0x61d   : > { %v4821_v37 = vsel %vm314_vm0, %v6141_v43, 0.0  ;;  %v4519_v46 = vpop.f32.mrb[93].mxu1 }
 0x61e   : > { %v9277_v60 = vadd.f32 %v4821_v37, %v4820_v12  ;;  %v4814_v61 = vsel %vm314_vm0, %v4519_v46, 0.0 }
 0x61f   : > { %v9280_v18 = vadd.f32 %v4814_v61, %v4813_v49 }
 0x622   : > { %v6144_v63 = vpop.f32.mrb[94].mxu1 }
 0x623   : > { %v4835_v26 = vsel %vm314_vm0, %v6144_v63, 0.0  ;;  %v4529_v6 = vpop.f32.mrb[95].mxu1 }
 0x624   : > { %v9283_v47 = vadd.f32 %v4835_v26, %v4834_v31  ;;  %v4828_v42 = vsel %vm314_vm0, %v4529_v6, 0.0 }
 0x625   : > { %v9286_v58 = vadd.f32 %v4828_v42, %v4827_v1 }
 0x62f   : > { %v6147_v48 = vpop.f32.mrb[96].mxu1 }
 0x630   : > { %v4849_v38 = vsel %vm314_vm0, %v6147_v48, 0.0  ;;  %v4539_v8 = vpop.f32.mrb[97].mxu1 }
 0x631   : > { %v9289_v12 = vadd.f32 %v4849_v38, %v4848_v55  ;;  %v4842_v0 = vsel %vm314_vm0, %v4539_v8, 0.0 }
 0x632   : > { %v9292_v49 = vadd.f32 %v4842_v0, %v4841_v50 }
 0x647   : > { %v6152_v36 = vpop.f32.mrb[94].mxu0 }
 0x648   : > { %v4753_v32 = vsel %vm314_vm0, %v6152_v36, 0.0  ;;  %v4662_v25 = vpop.f32.mrb[95].mxu0 }
 0x649   : > { %v4754_v30 = vadd.f32 %v4753_v32, %v4752_v44  ;;  %v4746_v31 = vsel %vm314_vm0, %v4662_v25, 0.0 }
 0x64a   : > { %v4747_v59 = vadd.f32 %v4746_v31, %v4745_v56 }
 0x64b   : > { %v4861_v1 = vadd.f32 %v9298_v19, %v4754_v30 }
 0x64c   : > { %v4860_v17 = vadd.f32 %v9298_v19, %v4747_v59 }
 0x64d   : > { %4877 = vst.msk [vmem:[%s9306_s15 + $0x8] sm:$0xff] %vm314_vm0, %v4861_v1 }
 0x64e   : > { %4876 = vst.msk [vmem:[%s9306_s15] sm:$0xff] %vm314_vm0, %v4860_v17 }
 0x657   : > { %v6155_v27 = vpop.f32.mrb[96].mxu0 }
 0x658   : > { %v4767_v40 = vsel %vm314_vm0, %v6155_v27, 0.0  ;;  %v4672_v14 = vpop.f32.mrb[97].mxu0 }
 0x659   : > { %v4768_v20 = vadd.f32 %v4767_v40, %v4766_v11  ;;  %v4760_v55 = vsel %vm314_vm0, %v4672_v14, 0.0 }
 0x65a   : > { %v4761_v29 = vadd.f32 %v4760_v55, %v4759_v34 }
 0x65b   : > { %v4863_v50 = vadd.f32 %v9298_v19, %v4768_v20 }
 0x65c   : > { %v4862_v5 = vadd.f32 %v9298_v19, %v4761_v29 }
 0x65d   : > { %4879 = vst.msk [vmem:[%s9306_s15 + $0x18] sm:$0xff] %vm314_vm0, %v4863_v50 }
 0x65e   : > { %4878 = vst.msk [vmem:[%s9306_s15 + $0x10] sm:$0xff] %vm314_vm0, %v4862_v5 }
 0x663   : > { %v6158_v9 = vpop.f32.mrb[98].mxu0 }
 0x664   : > { %v4781_v35 = vsel %vm314_vm0, %v6158_v9, 0.0  ;;  %v4682_v44 = vpop.f32.mrb[99].mxu0 }
 0x665   : > { %v4782_v22 = vadd.f32 %v4781_v35, %v4780_v54  ;;  %v4774_v56 = vsel %vm314_vm0, %v4682_v44, 0.0 }
 0x666   : > { %v4775_v16 = vadd.f32 %v4774_v56, %v4773_v21 }
 0x667   : > { %v4865_v41 = vadd.f32 %v9298_v19, %v4782_v22 }
 0x668   : > { %v4864_v39 = vadd.f32 %v9298_v19, %v4775_v16 }
 0x669   : > { %4881 = vst.msk [vmem:[%s9306_s15 + $0x28] sm:$0xff] %vm314_vm0, %v4865_v41 }
 0x66a   : > { %4880 = vst.msk [vmem:[%s9306_s15 + $0x20] sm:$0xff] %vm314_vm0, %v4864_v39 }
 0x66b   : > { %v6161_v11 = vpop.f32.mrb[100].mxu0 }
 0x66c   : > { %v4795_v15 = vsel %vm314_vm0, %v6161_v11, 0.0  ;;  %v4692_v34 = vpop.f32.mrb[101].mxu0 }
 0x66d   : > { %v4796_v7 = vadd.f32 %v4795_v15, %v4794_v24  ;;  %v4788_v3 = vsel %vm314_vm0, %v4692_v34, 0.0 }
 0x66e   : > { %v4789_v4 = vadd.f32 %v4788_v3, %v4787_v10 }
 0x66f   : > { %v4867_v54 = vadd.f32 %v9298_v19, %v4796_v7 }
 0x670   : > { %v4866_v33 = vadd.f32 %v9298_v19, %v4789_v4 }
 0x671   : > { %4883 = vst.msk [vmem:[%s9306_s15 + $0x38] sm:$0xff] %vm314_vm0, %v4867_v54 }
 0x672   : > { %4882 = vst.msk [vmem:[%s9306_s15 + $0x30] sm:$0xff] %vm314_vm0, %v4866_v33 }
 0x679   : > { %v6164_v21 = vpop.f32.mrb[102].mxu0 }
 0x67a   : > { %v4809_v28 = vsel %vm314_vm0, %v6164_v21, 0.0  ;;  %v4702_v53 = vpop.f32.mrb[103].mxu0 }
 0x67b   : > { %v4810_v62 = vadd.f32 %v4809_v28, %v9271_v13  ;;  %v4802_v24 = vsel %vm314_vm0, %v4702_v53, 0.0 }
 0x67c   : > { %v4803_v51 = vadd.f32 %v4802_v24, %v9274_v52 }
 0x67d   : > { %v4869_v10 = vadd.f32 %v9298_v19, %v4810_v62  ;;  %v6167_v2 = vpop.f32.mrb[104].mxu0 }
 0x67e   : > { %v4868_v23 = vadd.f32 %v9298_v19, %v4803_v51  ;;  %v4823_v57 = vsel %vm314_vm0, %v6167_v2, 0.0  ;;  %v4712_v45 = vpop.f32.mrb[105].mxu0 }
 0x67f   : > { %4885 = vst.msk [vmem:[%s9306_s15 + $0x48] sm:$0xff] %vm314_vm0, %v4869_v10  ;;  %v4824_v43 = vadd.f32 %v4823_v57, %v9277_v60  ;;  %v4816_v13 = vsel %vm314_vm0, %v4712_v45, 0.0 }
 0x680   : > { %4884 = vst.msk [vmem:[%s9306_s15 + $0x40] sm:$0xff] %vm314_vm0, %v4868_v23  ;;  %v4817_v52 = vadd.f32 %v4816_v13, %v9280_v18 }
 0x681   : > { %v4871_v37 = vadd.f32 %v9298_v19, %v4824_v43  ;;  %v6170_v46 = vpop.f32.mrb[106].mxu0 }
 0x682   : > { %v4870_v61 = vadd.f32 %v9298_v19, %v4817_v52  ;;  %v4837_v63 = vsel %vm314_vm0, %v6170_v46, 0.0  ;;  %v4722_v26 = vpop.f32.mrb[107].mxu0 }
 0x683   : > { %4887 = vst.msk [vmem:[%s9306_s15 + $0x58] sm:$0xff] %vm314_vm0, %v4871_v37  ;;  %v4838_v60 = vadd.f32 %v4837_v63, %v9283_v47  ;;  %v4830_v6 = vsel %vm314_vm0, %v4722_v26, 0.0 }
 0x684   : > { %4886 = vst.msk [vmem:[%s9306_s15 + $0x50] sm:$0xff] %vm314_vm0, %v4870_v61  ;;  %v4831_v18 = vadd.f32 %v4830_v6, %v9286_v58 }
 0x685   : > { %v4873_v42 = vadd.f32 %v9298_v19, %v4838_v60  ;;  %v6173_v48 = vpop.f32.mrb[108].mxu0 }
 0x686   : > { %v4872_v38 = vadd.f32 %v9298_v19, %v4831_v18  ;;  %v4851_v8 = vsel %vm314_vm0, %v6173_v48, 0.0  ;;  %v4732_v0 = vpop.f32.mrb[109].mxu0 }
 0x687   : > { %4889 = vst.msk [vmem:[%s9306_s15 + $0x68] sm:$0xff] %vm314_vm0, %v4873_v42  ;;  %v4852_v47 = vadd.f32 %v4851_v8, %v9289_v12  ;;  %v4844_v36 = vsel %vm314_vm0, %v4732_v0, 0.0 }
 0x688   : > { %4888 = vst.msk [vmem:[%s9306_s15 + $0x60] sm:$0xff] %vm314_vm0, %v4872_v38  ;;  %v4845_v32 = vadd.f32 %v4844_v36, %v9292_v49 }
 0x689   : > { %v4875_v58 = vadd.f32 %v9298_v19, %v4852_v47 }
 0x68a   : > { %v4874_v25 = vadd.f32 %v9298_v19, %v4845_v32 }
 0x68b   : > { %4891 = vst.msk [vmem:[%s9306_s15 + $0x78] sm:$0xff] %vm314_vm0, %v4875_v58 }
 0x68c   : > { %4890 = vst.msk [vmem:[%s9306_s15 + $0x70] sm:$0xff] %vm314_vm0, %v4874_v25 }
 0x68d PF: > { %s17_s24 = sadd.s32 1, %s7110_s24  }
 0x68e   : > { %p14_p6 = scmp.ge.s32.totalorder %s17_s24, 6  }
 0x690   :  { %16 = sbr.rel (!%p14_p6) target bundleno = 1 (0x1), region = 79 }

</bundles_post_ra>
